<compile_context>
chip_gen: v7x
topology: tpu7x:2x2x1
jax: 0.10.0
libtpu: 0.0.40
codegen_flags: <defaults>
</compile_context>

<pallas_src>
import functools
import math

import jax
import jax.numpy as jnp
from jax.experimental import pallas as pl
from jax.experimental.pallas import tpu as pltpu


_VMEM_LIMIT = 32 * 1024 * 1024  # explicit scoped-VMEM budget, safe on v5e/v6e/v7x


# ---------------------------------------------------------------------------
# in-kernel helpers (pure array functions traced inside the kernels)
# ---------------------------------------------------------------------------
def _layer_norm(x, g, b, eps=1e-5):
    mu = jnp.mean(x, axis=-1, keepdims=True)
    xc = x - mu
    var = jnp.mean(xc * xc, axis=-1, keepdims=True)
    return xc * jax.lax.rsqrt(var + eps) * g + b


def _gelu(x):
    # TODO(synk): PyTorch nn.GELU() is the exact erf GELU; tanh approximation is
    # used because erf is not guaranteed to lower through Mosaic.
    return jax.nn.gelu(x, approximate=True)


def _mm(x, w):
    # weight matmuls: bf16 operands, f32 accumulation (MXU fast path, halved DMA)
    return jnp.dot(x.astype(jnp.bfloat16), w.astype(jnp.bfloat16),
                   preferred_element_type=jnp.float32)


def _mm_f32(x, w):
    # tiny internal contractions (head-sum / prob-expansion / one-hot gather)
    return jnp.dot(x, w, preferred_element_type=jnp.float32)


def _mlp3_body(x, w1, b1, g1, be1, w2, b2, g2, be2, w3, b3):
    h = _mm(x, w1) + b1
    h = _gelu(_layer_norm(h, g1, be1))
    h = _mm(h, w2) + b2
    h = _gelu(_layer_norm(h, g2, be2))
    return _mm(h, w3) + b3


def _head_mats(d, nheads):
    """R: (d, H) block indicator (lane i belongs to head i//hd); Rt: (H, d)."""
    hd = d // nheads
    i_d = jax.lax.broadcasted_iota(jnp.int32, (d, nheads), 0)
    h_d = jax.lax.broadcasted_iota(jnp.int32, (d, nheads), 1)
    r = jnp.logical_and(i_d >= h_d * hd, i_d < (h_d + 1) * hd).astype(jnp.float32)
    h_t = jax.lax.broadcasted_iota(jnp.int32, (nheads, d), 0)
    i_t = jax.lax.broadcasted_iota(jnp.int32, (nheads, d), 1)
    rt = jnp.logical_and(i_t >= h_t * hd, i_t < (h_t + 1) * hd).astype(jnp.float32)
    return r, rt


def _mha_lq1(q_rows, kv2d, bias_col, lk, nheads, wq, bq, wkv, bkv, wo, bo):
    """Multi-head attention with query length 1 per batch element.

    q_rows:   (bs, d)       per-batch query row
    kv2d:     (bs*lk, d)    batch-major key/value rows (key == value)
    bias_col: (bs*lk, 1)    additive key-padding bias (0 / -1e30) or None
    Packed KV projection wkv: (d, 2d).  No per-head lane slices: per-head
    reductions use the (d, H) / (H, d) block-indicator matrices on the MXU.
    """
    bs, d = q_rows.shape
    hd = d // nheads
    scale = 1.0 / math.sqrt(hd)
    r_mat, rt_mat = _head_mats(d, nheads)

    qp = _mm(q_rows, wq) + bq                        # (bs, d)
    kvp = _mm(kv2d, wkv) + bkv                       # (bs*lk, 2d)
    kp = kvp[:, :d]
    vp = kvp[:, d:]

    ctxs = []
    for b in range(bs):
        kp_b = kp[b * lk:(b + 1) * lk]               # (lk, d)
        vp_b = vp[b * lk:(b + 1) * lk]               # (lk, d)
        prod = qp[b:b + 1] * kp_b                    # (lk, d)
        s = _mm_f32(prod, r_mat) * scale             # (lk, H) per-head scores
        if bias_col is not None:
            # -1e30 instead of -inf; every batch has >=1 unmasked key here.
            s = s + bias_col[b * lk:(b + 1) * lk]    # (lk, 1) broadcast over heads
        m = jnp.max(s, axis=0, keepdims=True)
        p = jnp.exp(s - m)
        denom = jnp.sum(p, axis=0, keepdims=True)
        p = p * pl.reciprocal(denom, approx=True)    # softmax divide on the EUP
        p_full = _mm_f32(p, rt_mat)                  # (lk, d)
        ctxs.append(jnp.sum(p_full * vp_b, axis=0, keepdims=True))  # (1, d)
    attn = jnp.concatenate(ctxs, axis=0)             # (bs, d)
    return _mm(attn, wo) + bo


def _mlp3_args(p):
    return (p["w1"], p["b1"], p["g1"], p["be1"],
            p["w2"], p["b2"], p["g2"], p["be2"], p["w3"], p["b3"])


def _mha_args(p):
    return (p["wq"], p["bq"], p["wkv"], p["bkv"], p["wo"], p["bo"])


# ---------------------------------------------------------------------------
# kernel 1/2: row-tiled fused 3-layer MLP  (Linear->LN->GELU x2 -> Linear)
# ---------------------------------------------------------------------------
def _mlp3_kernel(x_ref, w1, b1, g1, be1, w2, b2, g2, be2, w3, b3, o_ref):
    o = _mlp3_body(x_ref[...], w1[...], b1[...], g1[...], be1[...],
                   w2[...], b2[...], g2[...], be2[...], w3[...], b3[...])
    o_ref[...] = o.astype(o_ref.dtype)


def mlp3(x2d, p, *, max_tile_rows=256):
    rows, din = x2d.shape
    dout = p["w3"].shape[1]
    tr = rows if rows <= max_tile_rows else max_tile_rows
    grid = (pl.cdiv(rows, tr),)

    def row_spec(cols):
        return pl.BlockSpec((tr, cols), lambda i: (i, 0))

    def const_spec(arr):
        return pl.BlockSpec(arr.shape, lambda i: (0, 0))

    weights = _mlp3_args(p)
    in_specs = [row_spec(din)] + [const_spec(w) for w in weights]
    return pl.pallas_call(
        _mlp3_kernel,
        out_shape=jax.ShapeDtypeStruct((rows, dout), jnp.float32),
        grid=grid,
        in_specs=in_specs,
        out_specs=row_spec(dout),
        compiler_params=pltpu.CompilerParams(
            dimension_semantics=("parallel",),
            vmem_limit_bytes=_VMEM_LIMIT),
    )(x2d, *weights)


# ---------------------------------------------------------------------------
# kernel 3: fused LN + CLS-MHA (cross & feat) + consistency encoder + cosine sim
# ---------------------------------------------------------------------------
def _make_aggregate_kernel(bs, n, m, d, nheads):
    def kernel(feats2d_ref, kvfeat2d_ref, cross2d_ref, cross_bias_ref, feat_bias_ref,
               cls_cross_ref, cls_feat_ref, ncg_ref, ncb_ref, nfg_ref, nfb_ref,
               acq_w, acq_b, ackv_w, ackv_b, aco_w, aco_b,
               afq_w, afq_b, afkv_w, afkv_b, afo_w, afo_b,
               ce_w1, ce_b1, ce_g1, ce_be1, ce_w2, ce_b2, ce_g2, ce_be2, ce_w3, ce_b3,
               consist_out_ref, sim_out_ref, aggr_out_ref):
        feats2d = feats2d_ref[...]                                      # (bs*n, d)

        # ---- cross-modal CLS aggregation (LayerNorm folded into the MHA) ----
        q_c = _layer_norm(cls_cross_ref[...], ncg_ref[...], ncb_ref[...])  # (1, d)
        q_c = jnp.broadcast_to(q_c, (bs, d))
        kv_c = _layer_norm(cross2d_ref[...], ncg_ref[...], ncb_ref[...])   # (bs*m, d)
        feat_aggr_cross = _mha_lq1(
            q_c, kv_c, cross_bias_ref[...], m, nheads,
            acq_w[...], acq_b[...], ackv_w[...], ackv_b[...], aco_w[...], aco_b[...])

        # ---- intra-modal CLS aggregation over [global | feats] ----
        q_f = _layer_norm(cls_feat_ref[...], nfg_ref[...], nfb_ref[...])
        q_f = jnp.broadcast_to(q_f, (bs, d))
        kv_f = _layer_norm(kvfeat2d_ref[...], nfg_ref[...], nfb_ref[...])  # (bs*(n+1), d)
        feat_aggr = _mha_lq1(
            q_f, kv_f, feat_bias_ref[...], n + 1, nheads,
            afq_w[...], afq_b[...], afkv_w[...], afkv_b[...], afo_w[...], afo_b[...])
        aggr_out_ref[...] = feat_aggr.astype(aggr_out_ref.dtype)

        # ---- consistency embeddings + cosine-similarity epilogue ----
        # (reference uses consist_encoder_feat for BOTH inputs)
        ce = (ce_w1[...], ce_b1[...], ce_g1[...], ce_be1[...],
              ce_w2[...], ce_b2[...], ce_g2[...], ce_be2[...], ce_w3[...], ce_b3[...])
        fc = _mlp3_body(feats2d, *ce)                                   # (bs*n, 64)
        cc = _mlp3_body(feat_aggr_cross, *ce)                           # (bs, 64)
        consist_out_ref[...] = fc.astype(consist_out_ref.dtype)

        cc_rows = jnp.concatenate(
            [jnp.broadcast_to(cc[b:b + 1], (n, cc.shape[1])) for b in range(bs)],
            axis=0)                                                     # (bs*n, 64)
        nf = jnp.sqrt(jnp.sum(fc * fc, axis=-1, keepdims=True))
        nc = jnp.sqrt(jnp.sum(cc_rows * cc_rows, axis=-1, keepdims=True))
        # eps guard (reference has none) avoids NaN/Inf for an all-zero row
        inv = pl.reciprocal(jnp.maximum(nf * nc, 1e-12), approx=True)
        sim = jnp.sum(fc * cc_rows, axis=-1, keepdims=True) * inv
        sim_out_ref[...] = jnp.clip((sim + 1.0) * 0.5, 0.0, 1.0).astype(sim_out_ref.dtype)

    return kernel


def aggregate(feats_enc2d, kv_feat2d, cross_enc2d, cross_bias, feat_bias, params,
              *, bs, n, m, num_head):
    d = feats_enc2d.shape[1]
    dc = params["consist_encoder_feat"]["w3"].shape[1]
    kernel = _make_aggregate_kernel(bs, n, m, d, num_head)
    args = ((feats_enc2d, kv_feat2d, cross_enc2d, cross_bias, feat_bias,
             params["cls_token_cross"], params["cls_token_feat"],
             params["norm_cross_g"], params["norm_cross_b"],
             params["norm_feat_g"], params["norm_feat_b"])
            + _mha_args(params["aggregator_cross"])
            + _mha_args(params["aggregator_feat"])
            + _mlp3_args(params["consist_encoder_feat"]))
    vmem = pl.BlockSpec(memory_space=pltpu.MemorySpace.VMEM)
    return pl.pallas_call(
        kernel,
        out_shape=(jax.ShapeDtypeStruct((bs * n, dc), jnp.float32),
                   jax.ShapeDtypeStruct((bs * n, 1), jnp.float32),
                   jax.ShapeDtypeStruct((bs, d), jnp.float32)),
        in_specs=[vmem] * len(args),
        out_specs=(vmem, vmem, vmem),
        compiler_params=pltpu.CompilerParams(vmem_limit_bytes=_VMEM_LIMIT),
    )(*args)


# ---------------------------------------------------------------------------
# kernel 4: fused in-kernel patch gather (SMEM indices) + MHA + MLP + residual x2
# ---------------------------------------------------------------------------
def _make_refine_kernel(bs, n, tok, d, nheads):
    def kernel(sim_idx_ref, unsim_idx_ref, aggr_ref, feats2d_ref,
               a1q_w, a1q_b, a1kv_w, a1kv_b, a1o_w, a1o_b,
               m1_w1, m1_b1, m1_g1, m1_be1, m1_w2, m1_b2, m1_g2, m1_be2, m1_w3, m1_b3,
               a2q_w, a2q_b, a2kv_w, a2kv_b, a2o_w, a2o_b,
               m2_w1, m2_b1, m2_g1, m2_be1, m2_w2, m2_b2, m2_g2, m2_be2, m2_w3, m2_b3,
               out_ref):
        feats2d = feats2d_ref[...]                                  # (bs*n, d)
        aggr = aggr_ref[...]                                        # (bs, d)

        def gather(idx_ref):
            # one-hot row select on the MXU; indices are SMEM scalars
            patches = []
            for b in range(bs):
                f_b = feats2d[b * n:(b + 1) * n]                    # (n, d)
                rows = []
                for t in range(tok):
                    idx = idx_ref[b, t]
                    lane = jax.lax.broadcasted_iota(jnp.int32, (1, n), 1)
                    rows.append((lane == idx).astype(jnp.float32))
                onehot = jnp.concatenate(rows, axis=0)              # (tok, n)
                patches.append(_mm_f32(onehot, f_b))                # (tok, d)
            return jnp.concatenate(patches, axis=0)                 # (bs*tok, d)

        sim_patch = gather(sim_idx_ref)
        unsim_patch = gather(unsim_idx_ref)

        a1 = _mha_lq1(aggr, sim_patch, None, tok, nheads,
                      a1q_w[...], a1q_b[...], a1kv_w[...], a1kv_b[...],
                      a1o_w[...], a1o_b[...])
        aggr = aggr + _mlp3_body(a1, m1_w1[...], m1_b1[...], m1_g1[...], m1_be1[...],
                                 m1_w2[...], m1_b2[...], m1_g2[...], m1_be2[...],
                                 m1_w3[...], m1_b3[...])
        a2 = _mha_lq1(aggr, unsim_patch, None, tok, nheads,
                      a2q_w[...], a2q_b[...], a2kv_w[...], a2kv_b[...],
                      a2o_w[...], a2o_b[...])
        aggr = aggr + _mlp3_body(a2, m2_w1[...], m2_b1[...], m2_g1[...], m2_be1[...],
                                 m2_w2[...], m2_b2[...], m2_g2[...], m2_be2[...],
                                 m2_w3[...], m2_b3[...])
        out_ref[...] = aggr.astype(out_ref.dtype)

    return kernel


def refine(feat_aggr, feats_enc2d, sim_index, unsim_index, params, *, bs, n, tok):
    d = feat_aggr.shape[1]
    kernel = _make_refine_kernel(bs, n, tok, d, nheads=4)  # reference hardcodes 4 heads
    args = ((sim_index, unsim_index, feat_aggr, feats_enc2d)
            + _mha_args(params["aggregator"]) + _mlp3_args(params["aggregator_mlp"])
            + _mha_args(params["aggregator_2"]) + _mlp3_args(params["aggregator_mlp_2"]))
    smem = pl.BlockSpec(memory_space=pltpu.MemorySpace.SMEM)
    vmem = pl.BlockSpec(memory_space=pltpu.MemorySpace.VMEM)
    return pl.pallas_call(
        kernel,
        out_shape=jax.ShapeDtypeStruct((bs, d), jnp.float32),
        in_specs=[smem, smem] + [vmem] * (len(args) - 2),
        out_specs=vmem,
        compiler_params=pltpu.CompilerParams(vmem_limit_bytes=_VMEM_LIMIT),
    )(*args)


# ---------------------------------------------------------------------------
# deterministic synthetic parameter initialization
# (Linear weights stored as (in, out) bf16 so kernels do x @ W + b == x @ W_pt.T + b)
# ---------------------------------------------------------------------------
def _init_linear(key, din, dout):
    w = (jax.random.normal(key, (din, dout), jnp.float32) * 0.02).astype(jnp.bfloat16)
    b = jnp.zeros((1, dout), jnp.float32)
    return w, b


def _init_mlp3(key, din, h1, h2, dout):
    k1, k2, k3 = jax.random.split(key, 3)
    w1, b1 = _init_linear(k1, din, h1)
    w2, b2 = _init_linear(k2, h1, h2)
    w3, b3 = _init_linear(k3, h2, dout)
    return dict(w1=w1, b1=b1,
                g1=jnp.ones((1, h1), jnp.float32), be1=jnp.zeros((1, h1), jnp.float32),
                w2=w2, b2=b2,
                g2=jnp.ones((1, h2), jnp.float32), be2=jnp.zeros((1, h2), jnp.float32),
                w3=w3, b3=b3)


def _init_mha(key, d):
    kq, kk, kv, ko = jax.random.split(key, 4)
    wq, bq = _init_linear(kq, d, d)
    wk, bk = _init_linear(kk, d, d)
    wv, bv = _init_linear(kv, d, d)
    wo, bo = _init_linear(ko, d, d)
    return dict(wq=wq, bq=bq,
                wkv=jnp.concatenate([wk, wv], axis=1),      # packed K/V projection
                bkv=jnp.concatenate([bk, bv], axis=1),
                wo=wo, bo=bo)


def init_params(key, output_dim):
    d = output_dim
    ks = jax.random.split(key, 12)
    return dict(
        feat_encoder=_init_mlp3(ks[0], d, 2 * d, 2 * d, d),
        cross_encoder=_init_mlp3(ks[1], d, 2 * d, 2 * d, d),
        consist_encoder_feat=_init_mlp3(ks[2], d, 256, 128, 64),
        consist_encoder_cross=_init_mlp3(ks[3], d, 256, 128, 64),  # unused in forward (matches reference)
        cls_token_cross=jax.random.normal(ks[4], (1, d), jnp.float32) * 0.02,
        cls_token_feat=jax.random.normal(ks[5], (1, d), jnp.float32) * 0.02,
        aggregator_cross=_init_mha(ks[6], d),
        aggregator_feat=_init_mha(ks[7], d),
        aggregator=_init_mha(ks[8], d),
        aggregator_2=_init_mha(ks[9], d),
        aggregator_mlp=_init_mlp3(ks[10], d, 2 * d, 2 * d, d),
        aggregator_mlp_2=_init_mlp3(ks[11], d, 2 * d, 2 * d, d),
        norm_cross_g=jnp.ones((1, d), jnp.float32), norm_cross_b=jnp.zeros((1, d), jnp.float32),
        norm_feat_g=jnp.ones((1, d), jnp.float32), norm_feat_b=jnp.zeros((1, d), jnp.float32),
    )


# ---------------------------------------------------------------------------
# Extra_Modal_Modeling.forward
# ---------------------------------------------------------------------------
@functools.partial(jax.jit, static_argnames=("num_head", "tok_num"))
def extra_modal_modeling_forward(params, feats, gloabl_feature, cross_feat,
                                 feats_mask, cross_mask, *, num_head, tok_num):
    bs, n, d = feats.shape
    m = cross_feat.shape[1]
    NEG = jnp.float32(-1e30)  # additive key-padding bias; no row is fully masked here

    # 1-2) feat / cross encoders (row-tiled fused MLP kernels)
    feats_enc2d = mlp3(feats.reshape(bs * n, d), params["feat_encoder"])
    cross_enc2d = mlp3(cross_feat.reshape(bs * m, d), params["cross_encoder"])

    # tiny XLA glue: batch-major row slabs for the fused aggregation kernel
    kv_feat2d = jnp.concatenate(
        [gloabl_feature, feats_enc2d.reshape(bs, n, d)], axis=1).reshape(bs * (n + 1), d)
    cross_bias = jnp.where(cross_mask, NEG, 0.0).astype(jnp.float32).reshape(bs * m, 1)
    full_mask = jnp.concatenate([jnp.zeros((bs, 1), dtype=bool), feats_mask], axis=1)
    feat_bias = jnp.where(full_mask, NEG, 0.0).astype(jnp.float32).reshape(bs * (n + 1), 1)

    # 3) fused: LN + CLS MHA (cross & feat paths) + consistency encoder + cosine sim
    feats_consist2d, sim_col, feat_aggr = aggregate(
        feats_enc2d, kv_feat2d, cross_enc2d, cross_bias, feat_bias, params,
        bs=bs, n=n, m=m, num_head=num_head)
    sim_matrix = sim_col.reshape(bs, n)
    feats_consist = feats_consist2d.reshape(bs, n, feats_consist2d.shape[1])

    # 4) top-k patch index selection (jnp.where reproduces both branches of the
    #    reference `if feats_mask.sum() > 0`)
    sim_score = jnp.where(feats_mask, -1.0, sim_matrix)
    unsim_score = jnp.where(feats_mask, 2.0, sim_matrix)
    sim_index = jax.lax.top_k(sim_score, tok_num)[1].astype(jnp.int32)
    unsim_index = jax.lax.top_k(-unsim_score, tok_num)[1].astype(jnp.int32)

    # 5) fused: in-kernel patch gather + MHA + MLP + residual (x2)
    feat_aggr = refine(feat_aggr, feats_enc2d, sim_index, unsim_index, params,
                       bs=bs, n=n, tok=tok_num)

    return feat_aggr.reshape(bs, 1, d), sim_matrix, feats_consist


if __name__ == "__main__":
    key = jax.random.PRNGKey(0)
    bs, n_tok, n_cross, d = 2, 8, 8, 32
    num_head, tok_num = 4, 4

    kp, kf, kg, kc = jax.random.split(key, 4)
    params = init_params(kp, d)

    feats = jax.random.normal(kf, (bs, n_tok, d), jnp.float32)
    gloabl_feature = jax.random.normal(kg, (bs, 1, d), jnp.float32)
    cross_feat = jax.random.normal(kc, (bs, n_cross, d), jnp.float32)
    feats_mask = jnp.zeros((bs, n_tok), dtype=bool).at[:, -2:].set(True)
    cross_mask = jnp.zeros((bs, n_cross), dtype=bool).at[:, -1:].set(True)

    feat_aggr, sim_matrix, feats_consist = extra_modal_modeling_forward(
        params, feats, gloabl_feature, cross_feat, feats_mask, cross_mask,
        num_head=num_head, tok_num=tok_num)

    jax.block_until_ready((feat_aggr, sim_matrix, feats_consist))
    assert feat_aggr.shape == (bs, 1, d)
    assert sim_matrix.shape == (bs, n_tok)
    assert feats_consist.shape == (bs, n_tok, 64)
    print("KERNEL_OK")
</pallas_src>

<mosaic_0001>
module attributes {stable_mosaic.version = 11 : i64} {
  func.func @_mlp3_kernel(%arg0: i32, %arg1: memref<16x32xf32, #tpu.memory_space<vmem>>, %arg2: memref<32x64xbf16, #tpu.memory_space<vmem>>, %arg3: memref<1x64xf32, #tpu.memory_space<vmem>>, %arg4: memref<1x64xf32, #tpu.memory_space<vmem>>, %arg5: memref<1x64xf32, #tpu.memory_space<vmem>>, %arg6: memref<64x64xbf16, #tpu.memory_space<vmem>>, %arg7: memref<1x64xf32, #tpu.memory_space<vmem>>, %arg8: memref<1x64xf32, #tpu.memory_space<vmem>>, %arg9: memref<1x64xf32, #tpu.memory_space<vmem>>, %arg10: memref<64x32xbf16, #tpu.memory_space<vmem>>, %arg11: memref<1x32xf32, #tpu.memory_space<vmem>>, %arg12: memref<16x32xf32, #tpu.memory_space<vmem>>) attributes {dimension_semantics = [#tpu.dimension_semantics<parallel>], iteration_bounds = array<i64: 1>, scalar_prefetch = 0 : i64, scratch_operands = 0 : i64, tpu.core_type = #tpu.core_type<tc>, window_params = [{transform_indices = @transform_0, window_bounds = array<i64: 16, 32>}, {pipeline_mode = #tpu.pipeline_mode<synchronous>, transform_indices = @transform_1, window_bounds = array<i64: 32, 64>}, {pipeline_mode = #tpu.pipeline_mode<synchronous>, transform_indices = @transform_2, window_bounds = array<i64: 1, 64>}, {pipeline_mode = #tpu.pipeline_mode<synchronous>, transform_indices = @transform_3, window_bounds = array<i64: 1, 64>}, {pipeline_mode = #tpu.pipeline_mode<synchronous>, transform_indices = @transform_4, window_bounds = array<i64: 1, 64>}, {pipeline_mode = #tpu.pipeline_mode<synchronous>, transform_indices = @transform_5, window_bounds = array<i64: 64, 64>}, {pipeline_mode = #tpu.pipeline_mode<synchronous>, transform_indices = @transform_6, window_bounds = array<i64: 1, 64>}, {pipeline_mode = #tpu.pipeline_mode<synchronous>, transform_indices = @transform_7, window_bounds = array<i64: 1, 64>}, {pipeline_mode = #tpu.pipeline_mode<synchronous>, transform_indices = @transform_8, window_bounds = array<i64: 1, 64>}, {pipeline_mode = #tpu.pipeline_mode<synchronous>, transform_indices = @transform_9, window_bounds = array<i64: 64, 32>}, {pipeline_mode = #tpu.pipeline_mode<synchronous>, transform_indices = @transform_10, window_bounds = array<i64: 1, 32>}, {transform_indices = @transform_11, window_bounds = array<i64: 16, 32>}]} {
    %c0 = arith.constant 0 : index
    %c0_0 = arith.constant 0 : index
    %0 = vector.load %arg1[%c0, %c0_0] : memref<16x32xf32, #tpu.memory_space<vmem>>, vector<16x32xf32>
    %c0_1 = arith.constant 0 : index
    %c0_2 = arith.constant 0 : index
    %1 = vector.load %arg2[%c0_1, %c0_2] : memref<32x64xbf16, #tpu.memory_space<vmem>>, vector<32x64xbf16>
    %c0_3 = arith.constant 0 : index
    %c0_4 = arith.constant 0 : index
    %2 = vector.load %arg3[%c0_3, %c0_4] : memref<1x64xf32, #tpu.memory_space<vmem>>, vector<1x64xf32>
    %c0_5 = arith.constant 0 : index
    %c0_6 = arith.constant 0 : index
    %3 = vector.load %arg4[%c0_5, %c0_6] : memref<1x64xf32, #tpu.memory_space<vmem>>, vector<1x64xf32>
    %c0_7 = arith.constant 0 : index
    %c0_8 = arith.constant 0 : index
    %4 = vector.load %arg5[%c0_7, %c0_8] : memref<1x64xf32, #tpu.memory_space<vmem>>, vector<1x64xf32>
    %c0_9 = arith.constant 0 : index
    %c0_10 = arith.constant 0 : index
    %5 = vector.load %arg6[%c0_9, %c0_10] : memref<64x64xbf16, #tpu.memory_space<vmem>>, vector<64x64xbf16>
    %c0_11 = arith.constant 0 : index
    %c0_12 = arith.constant 0 : index
    %6 = vector.load %arg7[%c0_11, %c0_12] : memref<1x64xf32, #tpu.memory_space<vmem>>, vector<1x64xf32>
    %c0_13 = arith.constant 0 : index
    %c0_14 = arith.constant 0 : index
    %7 = vector.load %arg8[%c0_13, %c0_14] : memref<1x64xf32, #tpu.memory_space<vmem>>, vector<1x64xf32>
    %c0_15 = arith.constant 0 : index
    %c0_16 = arith.constant 0 : index
    %8 = vector.load %arg9[%c0_15, %c0_16] : memref<1x64xf32, #tpu.memory_space<vmem>>, vector<1x64xf32>
    %c0_17 = arith.constant 0 : index
    %c0_18 = arith.constant 0 : index
    %9 = vector.load %arg10[%c0_17, %c0_18] : memref<64x32xbf16, #tpu.memory_space<vmem>>, vector<64x32xbf16>
    %c0_19 = arith.constant 0 : index
    %c0_20 = arith.constant 0 : index
    %10 = vector.load %arg11[%c0_19, %c0_20] : memref<1x32xf32, #tpu.memory_space<vmem>>, vector<1x32xf32>
    %11 = arith.truncf %0 : vector<16x32xf32> to vector<16x32xbf16>
    %cst = arith.constant dense<0.000000e+00> : vector<16x64xf32>
    %12 = tpu.matmul %11, %1, %cst {dimension_numbers = #tpu.dot_dimension_numbers<[1], [0], [0], [1], [0, 0, 1, 1], [], []>} : vector<16x32xbf16>, vector<32x64xbf16>, vector<16x64xf32> -> vector<16x64xf32>
    %13 = vector.broadcast %2 : vector<1x64xf32> to vector<16x64xf32>
    %14 = arith.addf %12, %13 : vector<16x64xf32>
    %cst_21 = arith.constant dense<0.000000e+00> : vector<16xf32>
    %15 = vector.multi_reduction <add>, %14, %cst_21 [1] : vector<16x64xf32> to vector<16xf32>
    %16 = vector.shape_cast %15 : vector<16xf32> to vector<16x1xf32>
    %cst_22 = arith.constant 6.400000e+01 : f32
    %17 = vector.broadcast %cst_22 : f32 to vector<16x1xf32>
    %18 = arith.divf %16, %17 : vector<16x1xf32>
    %19 = vector.broadcast %18 : vector<16x1xf32> to vector<16x64xf32>
    %20 = arith.subf %14, %19 : vector<16x64xf32>
    %21 = arith.mulf %20, %20 : vector<16x64xf32>
    %cst_23 = arith.constant dense<0.000000e+00> : vector<16xf32>
    %22 = vector.multi_reduction <add>, %21, %cst_23 [1] : vector<16x64xf32> to vector<16xf32>
    %23 = vector.shape_cast %22 : vector<16xf32> to vector<16x1xf32>
    %cst_24 = arith.constant 6.400000e+01 : f32
    %24 = vector.broadcast %cst_24 : f32 to vector<16x1xf32>
    %25 = arith.divf %23, %24 : vector<16x1xf32>
    %cst_25 = arith.constant 9.99999974E-6 : f32
    %26 = vector.broadcast %cst_25 : f32 to vector<16x1xf32>
    %27 = arith.addf %25, %26 : vector<16x1xf32>
    %28 = math.rsqrt %27 : vector<16x1xf32>
    %29 = vector.broadcast %28 : vector<16x1xf32> to vector<16x64xf32>
    %30 = arith.mulf %20, %29 : vector<16x64xf32>
    %31 = vector.broadcast %3 : vector<1x64xf32> to vector<16x64xf32>
    %32 = arith.mulf %30, %31 : vector<16x64xf32>
    %33 = vector.broadcast %4 : vector<1x64xf32> to vector<16x64xf32>
    %34 = arith.addf %32, %33 : vector<16x64xf32>
    %35 = arith.mulf %34, %34 : vector<16x64xf32>
    %36 = arith.mulf %34, %35 : vector<16x64xf32>
    %cst_26 = arith.constant 4.471500e-02 : f32
    %37 = vector.broadcast %cst_26 : f32 to vector<16x64xf32>
    %38 = arith.mulf %37, %36 : vector<16x64xf32>
    %39 = arith.addf %34, %38 : vector<16x64xf32>
    %cst_27 = arith.constant 0.797884583 : f32
    %40 = vector.broadcast %cst_27 : f32 to vector<16x64xf32>
    %41 = arith.mulf %40, %39 : vector<16x64xf32>
    %42 = math.tanh %41 : vector<16x64xf32>
    %cst_28 = arith.constant 1.000000e+00 : f32
    %43 = vector.broadcast %cst_28 : f32 to vector<16x64xf32>
    %44 = arith.addf %43, %42 : vector<16x64xf32>
    %cst_29 = arith.constant 5.000000e-01 : f32
    %45 = vector.broadcast %cst_29 : f32 to vector<16x64xf32>
    %46 = arith.mulf %45, %44 : vector<16x64xf32>
    %47 = arith.mulf %34, %46 : vector<16x64xf32>
    %48 = arith.truncf %47 : vector<16x64xf32> to vector<16x64xbf16>
    %cst_30 = arith.constant dense<0.000000e+00> : vector<16x64xf32>
    %49 = tpu.matmul %48, %5, %cst_30 {dimension_numbers = #tpu.dot_dimension_numbers<[1], [0], [0], [1], [0, 0, 1, 1], [], []>} : vector<16x64xbf16>, vector<64x64xbf16>, vector<16x64xf32> -> vector<16x64xf32>
    %50 = vector.broadcast %6 : vector<1x64xf32> to vector<16x64xf32>
    %51 = arith.addf %49, %50 : vector<16x64xf32>
    %cst_31 = arith.constant dense<0.000000e+00> : vector<16xf32>
    %52 = vector.multi_reduction <add>, %51, %cst_31 [1] : vector<16x64xf32> to vector<16xf32>
    %53 = vector.shape_cast %52 : vector<16xf32> to vector<16x1xf32>
    %cst_32 = arith.constant 6.400000e+01 : f32
    %54 = vector.broadcast %cst_32 : f32 to vector<16x1xf32>
    %55 = arith.divf %53, %54 : vector<16x1xf32>
    %56 = vector.broadcast %55 : vector<16x1xf32> to vector<16x64xf32>
    %57 = arith.subf %51, %56 : vector<16x64xf32>
    %58 = arith.mulf %57, %57 : vector<16x64xf32>
    %cst_33 = arith.constant dense<0.000000e+00> : vector<16xf32>
    %59 = vector.multi_reduction <add>, %58, %cst_33 [1] : vector<16x64xf32> to vector<16xf32>
    %60 = vector.shape_cast %59 : vector<16xf32> to vector<16x1xf32>
    %cst_34 = arith.constant 6.400000e+01 : f32
    %61 = vector.broadcast %cst_34 : f32 to vector<16x1xf32>
    %62 = arith.divf %60, %61 : vector<16x1xf32>
    %cst_35 = arith.constant 9.99999974E-6 : f32
    %63 = vector.broadcast %cst_35 : f32 to vector<16x1xf32>
    %64 = arith.addf %62, %63 : vector<16x1xf32>
    %65 = math.rsqrt %64 : vector<16x1xf32>
    %66 = vector.broadcast %65 : vector<16x1xf32> to vector<16x64xf32>
    %67 = arith.mulf %57, %66 : vector<16x64xf32>
    %68 = vector.broadcast %7 : vector<1x64xf32> to vector<16x64xf32>
    %69 = arith.mulf %67, %68 : vector<16x64xf32>
    %70 = vector.broadcast %8 : vector<1x64xf32> to vector<16x64xf32>
    %71 = arith.addf %69, %70 : vector<16x64xf32>
    %72 = arith.mulf %71, %71 : vector<16x64xf32>
    %73 = arith.mulf %71, %72 : vector<16x64xf32>
    %cst_36 = arith.constant 4.471500e-02 : f32
    %74 = vector.broadcast %cst_36 : f32 to vector<16x64xf32>
    %75 = arith.mulf %74, %73 : vector<16x64xf32>
    %76 = arith.addf %71, %75 : vector<16x64xf32>
    %cst_37 = arith.constant 0.797884583 : f32
    %77 = vector.broadcast %cst_37 : f32 to vector<16x64xf32>
    %78 = arith.mulf %77, %76 : vector<16x64xf32>
    %79 = math.tanh %78 : vector<16x64xf32>
    %cst_38 = arith.constant 1.000000e+00 : f32
    %80 = vector.broadcast %cst_38 : f32 to vector<16x64xf32>
    %81 = arith.addf %80, %79 : vector<16x64xf32>
    %cst_39 = arith.constant 5.000000e-01 : f32
    %82 = vector.broadcast %cst_39 : f32 to vector<16x64xf32>
    %83 = arith.mulf %82, %81 : vector<16x64xf32>
    %84 = arith.mulf %71, %83 : vector<16x64xf32>
    %85 = arith.truncf %84 : vector<16x64xf32> to vector<16x64xbf16>
    %cst_40 = arith.constant dense<0.000000e+00> : vector<16x32xf32>
    %86 = tpu.matmul %85, %9, %cst_40 {dimension_numbers = #tpu.dot_dimension_numbers<[1], [0], [0], [1], [0, 0, 1, 1], [], []>} : vector<16x64xbf16>, vector<64x32xbf16>, vector<16x32xf32> -> vector<16x32xf32>
    %87 = vector.broadcast %10 : vector<1x32xf32> to vector<16x32xf32>
    %88 = arith.addf %86, %87 : vector<16x32xf32>
    %c0_41 = arith.constant 0 : index
    %c0_42 = arith.constant 0 : index
    %89 = vector.load %arg12[%c0_41, %c0_42] : memref<16x32xf32, #tpu.memory_space<vmem>>, vector<16x32xf32>
    tpu.vector_store %arg12[%c0_41, %c0_42], %88 {strides = array<i32>} : memref<16x32xf32, #tpu.memory_space<vmem>>, vector<16x32xf32>,
    return
  }
  func.func @transform_0(%arg0: i32) -> (i32, i32) {
    %c0_i32 = arith.constant 0 : i32
    %c0_i32_0 = arith.constant 0 : i32
    return %arg0, %c0_i32 : i32, i32
  }
  func.func @transform_1(%arg0: i32) -> (i32, i32) {
    %c0_i32 = arith.constant 0 : i32
    %c0_i32_0 = arith.constant 0 : i32
    %c0_i32_1 = arith.constant 0 : i32
    return %c0_i32, %c0_i32_0 : i32, i32
  }
  func.func @transform_2(%arg0: i32) -> (i32, i32) {
    %c0_i32 = arith.constant 0 : i32
    %c0_i32_0 = arith.constant 0 : i32
    %c0_i32_1 = arith.constant 0 : i32
    return %c0_i32, %c0_i32_0 : i32, i32
  }
  func.func @transform_3(%arg0: i32) -> (i32, i32) {
    %c0_i32 = arith.constant 0 : i32
    %c0_i32_0 = arith.constant 0 : i32
    %c0_i32_1 = arith.constant 0 : i32
    return %c0_i32, %c0_i32_0 : i32, i32
  }
  func.func @transform_4(%arg0: i32) -> (i32, i32) {
    %c0_i32 = arith.constant 0 : i32
    %c0_i32_0 = arith.constant 0 : i32
    %c0_i32_1 = arith.constant 0 : i32
    return %c0_i32, %c0_i32_0 : i32, i32
  }
  func.func @transform_5(%arg0: i32) -> (i32, i32) {
    %c0_i32 = arith.constant 0 : i32
    %c0_i32_0 = arith.constant 0 : i32
    %c0_i32_1 = arith.constant 0 : i32
    return %c0_i32, %c0_i32_0 : i32, i32
  }
  func.func @transform_6(%arg0: i32) -> (i32, i32) {
    %c0_i32 = arith.constant 0 : i32
    %c0_i32_0 = arith.constant 0 : i32
    %c0_i32_1 = arith.constant 0 : i32
    return %c0_i32, %c0_i32_0 : i32, i32
  }
  func.func @transform_7(%arg0: i32) -> (i32, i32) {
    %c0_i32 = arith.constant 0 : i32
    %c0_i32_0 = arith.constant 0 : i32
    %c0_i32_1 = arith.constant 0 : i32
    return %c0_i32, %c0_i32_0 : i32, i32
  }
  func.func @transform_8(%arg0: i32) -> (i32, i32) {
    %c0_i32 = arith.constant 0 : i32
    %c0_i32_0 = arith.constant 0 : i32
    %c0_i32_1 = arith.constant 0 : i32
    return %c0_i32, %c0_i32_0 : i32, i32
  }
  func.func @transform_9(%arg0: i32) -> (i32, i32) {
    %c0_i32 = arith.constant 0 : i32
    %c0_i32_0 = arith.constant 0 : i32
    %c0_i32_1 = arith.constant 0 : i32
    return %c0_i32, %c0_i32_0 : i32, i32
  }
  func.func @transform_10(%arg0: i32) -> (i32, i32) {
    %c0_i32 = arith.constant 0 : i32
    %c0_i32_0 = arith.constant 0 : i32
    %c0_i32_1 = arith.constant 0 : i32
    return %c0_i32, %c0_i32_0 : i32, i32
  }
  func.func @transform_11(%arg0: i32) -> (i32, i32) {
    %c0_i32 = arith.constant 0 : i32
    %c0_i32_0 = arith.constant 0 : i32
    return %arg0, %c0_i32 : i32, i32
  }
}

module attributes {stable_mosaic.version = 11 : i64} {
  func.func @kernel(%arg0: memref<16x32xf32, #tpu.memory_space<vmem>>, %arg1: memref<18x32xf32, #tpu.memory_space<vmem>>, %arg2: memref<16x32xf32, #tpu.memory_space<vmem>>, %arg3: memref<16x1xf32, #tpu.memory_space<vmem>>, %arg4: memref<18x1xf32, #tpu.memory_space<vmem>>, %arg5: memref<1x32xf32, #tpu.memory_space<vmem>>, %arg6: memref<1x32xf32, #tpu.memory_space<vmem>>, %arg7: memref<1x32xf32, #tpu.memory_space<vmem>>, %arg8: memref<1x32xf32, #tpu.memory_space<vmem>>, %arg9: memref<1x32xf32, #tpu.memory_space<vmem>>, %arg10: memref<1x32xf32, #tpu.memory_space<vmem>>, %arg11: memref<32x32xbf16, #tpu.memory_space<vmem>>, %arg12: memref<1x32xf32, #tpu.memory_space<vmem>>, %arg13: memref<32x64xbf16, #tpu.memory_space<vmem>>, %arg14: memref<1x64xf32, #tpu.memory_space<vmem>>, %arg15: memref<32x32xbf16, #tpu.memory_space<vmem>>, %arg16: memref<1x32xf32, #tpu.memory_space<vmem>>, %arg17: memref<32x32xbf16, #tpu.memory_space<vmem>>, %arg18: memref<1x32xf32, #tpu.memory_space<vmem>>, %arg19: memref<32x64xbf16, #tpu.memory_space<vmem>>, %arg20: memref<1x64xf32, #tpu.memory_space<vmem>>, %arg21: memref<32x32xbf16, #tpu.memory_space<vmem>>, %arg22: memref<1x32xf32, #tpu.memory_space<vmem>>, %arg23: memref<32x256xbf16, #tpu.memory_space<vmem>>, %arg24: memref<1x256xf32, #tpu.memory_space<vmem>>, %arg25: memref<1x256xf32, #tpu.memory_space<vmem>>, %arg26: memref<1x256xf32, #tpu.memory_space<vmem>>, %arg27: memref<256x128xbf16, #tpu.memory_space<vmem>>, %arg28: memref<1x128xf32, #tpu.memory_space<vmem>>, %arg29: memref<1x128xf32, #tpu.memory_space<vmem>>, %arg30: memref<1x128xf32, #tpu.memory_space<vmem>>, %arg31: memref<128x64xbf16, #tpu.memory_space<vmem>>, %arg32: memref<1x64xf32, #tpu.memory_space<vmem>>, %arg33: memref<16x64xf32, #tpu.memory_space<vmem>>, %arg34: memref<16x1xf32, #tpu.memory_space<vmem>>, %arg35: memref<2x32xf32, #tpu.memory_space<vmem>>) attributes {dimension_semantics = [], scalar_prefetch = 0 : i64, scratch_operands = 0 : i64, tpu.core_type = #tpu.core_type<tc>} {
    %c0 = arith.constant 0 : index
    %c0_0 = arith.constant 0 : index
    %0 = vector.load %arg0[%c0, %c0_0] : memref<16x32xf32, #tpu.memory_space<vmem>>, vector<16x32xf32>
    %c0_1 = arith.constant 0 : index
    %c0_2 = arith.constant 0 : index
    %1 = vector.load %arg5[%c0_1, %c0_2] : memref<1x32xf32, #tpu.memory_space<vmem>>, vector<1x32xf32>
    %c0_3 = arith.constant 0 : index
    %c0_4 = arith.constant 0 : index
    %2 = vector.load %arg7[%c0_3, %c0_4] : memref<1x32xf32, #tpu.memory_space<vmem>>, vector<1x32xf32>
    %c0_5 = arith.constant 0 : index
    %c0_6 = arith.constant 0 : index
    %3 = vector.load %arg8[%c0_5, %c0_6] : memref<1x32xf32, #tpu.memory_space<vmem>>, vector<1x32xf32>
    %cst = arith.constant dense<0.000000e+00> : vector<1xf32>
    %4 = vector.multi_reduction <add>, %1, %cst [1] : vector<1x32xf32> to vector<1xf32>
    %5 = vector.shape_cast %4 : vector<1xf32> to vector<1x1xf32>
    %cst_7 = arith.constant 3.200000e+01 : f32
    %6 = vector.broadcast %cst_7 : f32 to vector<1x1xf32>
    %7 = arith.divf %5, %6 : vector<1x1xf32>
    %8 = vector.broadcast %7 : vector<1x1xf32> to vector<1x32xf32>
    %9 = arith.subf %1, %8 : vector<1x32xf32>
    %10 = arith.mulf %9, %9 : vector<1x32xf32>
    %cst_8 = arith.constant dense<0.000000e+00> : vector<1xf32>
    %11 = vector.multi_reduction <add>, %10, %cst_8 [1] : vector<1x32xf32> to vector<1xf32>
    %12 = vector.shape_cast %11 : vector<1xf32> to vector<1x1xf32>
    %cst_9 = arith.constant 3.200000e+01 : f32
    %13 = vector.broadcast %cst_9 : f32 to vector<1x1xf32>
    %14 = arith.divf %12, %13 : vector<1x1xf32>
    %cst_10 = arith.constant 9.99999974E-6 : f32
    %15 = vector.broadcast %cst_10 : f32 to vector<1x1xf32>
    %16 = arith.addf %14, %15 : vector<1x1xf32>
    %17 = math.rsqrt %16 : vector<1x1xf32>
    %18 = vector.broadcast %17 : vector<1x1xf32> to vector<1x32xf32>
    %19 = arith.mulf %9, %18 : vector<1x32xf32>
    %20 = arith.mulf %19, %2 : vector<1x32xf32>
    %21 = arith.addf %20, %3 : vector<1x32xf32>
    %22 = vector.shape_cast %21 : vector<1x32xf32> to vector<1x32xf32>
    %23 = vector.broadcast %22 : vector<1x32xf32> to vector<2x32xf32>
    %c0_11 = arith.constant 0 : index
    %c0_12 = arith.constant 0 : index
    %24 = vector.load %arg2[%c0_11, %c0_12] : memref<16x32xf32, #tpu.memory_space<vmem>>, vector<16x32xf32>
    %c0_13 = arith.constant 0 : index
    %c0_14 = arith.constant 0 : index
    %25 = vector.load %arg7[%c0_13, %c0_14] : memref<1x32xf32, #tpu.memory_space<vmem>>, vector<1x32xf32>
    %c0_15 = arith.constant 0 : index
    %c0_16 = arith.constant 0 : index
    %26 = vector.load %arg8[%c0_15, %c0_16] : memref<1x32xf32, #tpu.memory_space<vmem>>, vector<1x32xf32>
    %cst_17 = arith.constant dense<0.000000e+00> : vector<16xf32>
    %27 = vector.multi_reduction <add>, %24, %cst_17 [1] : vector<16x32xf32> to vector<16xf32>
    %28 = vector.shape_cast %27 : vector<16xf32> to vector<16x1xf32>
    %cst_18 = arith.constant 3.200000e+01 : f32
    %29 = vector.broadcast %cst_18 : f32 to vector<16x1xf32>
    %30 = arith.divf %28, %29 : vector<16x1xf32>
    %31 = vector.broadcast %30 : vector<16x1xf32> to vector<16x32xf32>
    %32 = arith.subf %24, %31 : vector<16x32xf32>
    %33 = arith.mulf %32, %32 : vector<16x32xf32>
    %cst_19 = arith.constant dense<0.000000e+00> : vector<16xf32>
    %34 = vector.multi_reduction <add>, %33, %cst_19 [1] : vector<16x32xf32> to vector<16xf32>
    %35 = vector.shape_cast %34 : vector<16xf32> to vector<16x1xf32>
    %cst_20 = arith.constant 3.200000e+01 : f32
    %36 = vector.broadcast %cst_20 : f32 to vector<16x1xf32>
    %37 = arith.divf %35, %36 : vector<16x1xf32>
    %cst_21 = arith.constant 9.99999974E-6 : f32
    %38 = vector.broadcast %cst_21 : f32 to vector<16x1xf32>
    %39 = arith.addf %37, %38 : vector<16x1xf32>
    %40 = math.rsqrt %39 : vector<16x1xf32>
    %41 = vector.broadcast %40 : vector<16x1xf32> to vector<16x32xf32>
    %42 = arith.mulf %32, %41 : vector<16x32xf32>
    %43 = vector.broadcast %25 : vector<1x32xf32> to vector<16x32xf32>
    %44 = arith.mulf %42, %43 : vector<16x32xf32>
    %45 = vector.broadcast %26 : vector<1x32xf32> to vector<16x32xf32>
    %46 = arith.addf %44, %45 : vector<16x32xf32>
    %c0_22 = arith.constant 0 : index
    %c0_23 = arith.constant 0 : index
    %47 = vector.load %arg3[%c0_22, %c0_23] : memref<16x1xf32, #tpu.memory_space<vmem>>, vector<16x1xf32>
    %c0_24 = arith.constant 0 : index
    %c0_25 = arith.constant 0 : index
    %48 = vector.load %arg11[%c0_24, %c0_25] : memref<32x32xbf16, #tpu.memory_space<vmem>>, vector<32x32xbf16>
    %c0_26 = arith.constant 0 : index
    %c0_27 = arith.constant 0 : index
    %49 = vector.load %arg12[%c0_26, %c0_27] : memref<1x32xf32, #tpu.memory_space<vmem>>, vector<1x32xf32>
    %c0_28 = arith.constant 0 : index
    %c0_29 = arith.constant 0 : index
    %50 = vector.load %arg13[%c0_28, %c0_29] : memref<32x64xbf16, #tpu.memory_space<vmem>>, vector<32x64xbf16>
    %c0_30 = arith.constant 0 : index
    %c0_31 = arith.constant 0 : index
    %51 = vector.load %arg14[%c0_30, %c0_31] : memref<1x64xf32, #tpu.memory_space<vmem>>, vector<1x64xf32>
    %c0_32 = arith.constant 0 : index
    %c0_33 = arith.constant 0 : index
    %52 = vector.load %arg15[%c0_32, %c0_33] : memref<32x32xbf16, #tpu.memory_space<vmem>>, vector<32x32xbf16>
    %c0_34 = arith.constant 0 : index
    %c0_35 = arith.constant 0 : index
    %53 = vector.load %arg16[%c0_34, %c0_35] : memref<1x32xf32, #tpu.memory_space<vmem>>, vector<1x32xf32>
    %54 = tpu.iota {dimensions = array<i32: 0>} : vector<32x4xi32>
    %55 = tpu.iota {dimensions = array<i32: 1>} : vector<32x4xi32>
    %c8_i32 = arith.constant 8 : i32
    %56 = vector.broadcast %c8_i32 : i32 to vector<32x4xi32>
    %57 = arith.muli %55, %56 : vector<32x4xi32>
    %58 = arith.cmpi sge, %54, %57 : vector<32x4xi32>
    %c1_i32 = arith.constant 1 : i32
    %59 = vector.broadcast %c1_i32 : i32 to vector<32x4xi32>
    %60 = arith.addi %55, %59 : vector<32x4xi32>
    %c8_i32_36 = arith.constant 8 : i32
    %61 = vector.broadcast %c8_i32_36 : i32 to vector<32x4xi32>
    %62 = arith.muli %60, %61 : vector<32x4xi32>
    %63 = arith.cmpi slt, %54, %62 : vector<32x4xi32>
    %64 = arith.andi %58, %63 : vector<32x4xi1>
    %65 = arith.extui %64 : vector<32x4xi1> to vector<32x4xi32>
    %66 = arith.sitofp %65 : vector<32x4xi32> to vector<32x4xf32>
    %67 = tpu.iota {dimensions = array<i32: 0>} : vector<4x32xi32>
    %68 = tpu.iota {dimensions = array<i32: 1>} : vector<4x32xi32>
    %c8_i32_37 = arith.constant 8 : i32
    %69 = vector.broadcast %c8_i32_37 : i32 to vector<4x32xi32>
    %70 = arith.muli %67, %69 : vector<4x32xi32>
    %71 = arith.cmpi sge, %68, %70 : vector<4x32xi32>
    %c1_i32_38 = arith.constant 1 : i32
    %72 = vector.broadcast %c1_i32_38 : i32 to vector<4x32xi32>
    %73 = arith.addi %67, %72 : vector<4x32xi32>
    %c8_i32_39 = arith.constant 8 : i32
    %74 = vector.broadcast %c8_i32_39 : i32 to vector<4x32xi32>
    %75 = arith.muli %73, %74 : vector<4x32xi32>
    %76 = arith.cmpi slt, %68, %75 : vector<4x32xi32>
    %77 = arith.andi %71, %76 : vector<4x32xi1>
    %78 = arith.extui %77 : vector<4x32xi1> to vector<4x32xi32>
    %79 = arith.sitofp %78 : vector<4x32xi32> to vector<4x32xf32>
    %80 = arith.truncf %23 : vector<2x32xf32> to vector<2x32xbf16>
    %cst_40 = arith.constant dense<0.000000e+00> : vector<2x32xf32>
    %81 = tpu.matmul %80, %48, %cst_40 {dimension_numbers = #tpu.dot_dimension_numbers<[1], [0], [0], [1], [0, 0, 1, 1], [], []>} : vector<2x32xbf16>, vector<32x32xbf16>, vector<2x32xf32> -> vector<2x32xf32>
    %82 = vector.broadcast %49 : vector<1x32xf32> to vector<2x32xf32>
    %83 = arith.addf %81, %82 : vector<2x32xf32>
    %84 = arith.truncf %46 : vector<16x32xf32> to vector<16x32xbf16>
    %cst_41 = arith.constant dense<0.000000e+00> : vector<16x64xf32>
    %85 = tpu.matmul %84, %50, %cst_41 {dimension_numbers = #tpu.dot_dimension_numbers<[1], [0], [0], [1], [0, 0, 1, 1], [], []>} : vector<16x32xbf16>, vector<32x64xbf16>, vector<16x64xf32> -> vector<16x64xf32>
    %86 = vector.broadcast %51 : vector<1x64xf32> to vector<16x64xf32>
    %87 = arith.addf %85, %86 : vector<16x64xf32>
    %88 = vector.extract_strided_slice %87 {offsets = [0, 0], sizes = [16, 32], strides = [1, 1]} : vector<16x64xf32> to vector<16x32xf32>
    %89 = vector.extract_strided_slice %87 {offsets = [0, 32], sizes = [16, 32], strides = [1, 1]} : vector<16x64xf32> to vector<16x32xf32>
    %90 = vector.extract_strided_slice %88 {offsets = [0, 0], sizes = [8, 32], strides = [1, 1]} : vector<16x32xf32> to vector<8x32xf32>
    %91 = vector.extract_strided_slice %89 {offsets = [0, 0], sizes = [8, 32], strides = [1, 1]} : vector<16x32xf32> to vector<8x32xf32>
    %92 = vector.extract_strided_slice %83 {offsets = [0, 0], sizes = [1, 32], strides = [1, 1]} : vector<2x32xf32> to vector<1x32xf32>
    %93 = vector.broadcast %92 : vector<1x32xf32> to vector<8x32xf32>
    %94 = arith.mulf %93, %90 : vector<8x32xf32>
    %cst_42 = arith.constant dense<0.000000e+00> : vector<8x4xf32>
    %95 = tpu.matmul %94, %66, %cst_42 {dimension_numbers = #tpu.dot_dimension_numbers<[1], [0], [0], [1], [0, 0, 1, 1], [], []>} : vector<8x32xf32>, vector<32x4xf32>, vector<8x4xf32> -> vector<8x4xf32>
    %cst_43 = arith.constant 0.353553385 : f32
    %96 = vector.broadcast %cst_43 : f32 to vector<8x4xf32>
    %97 = arith.mulf %95, %96 : vector<8x4xf32>
    %98 = vector.extract_strided_slice %47 {offsets = [0, 0], sizes = [8, 1], strides = [1, 1]} : vector<16x1xf32> to vector<8x1xf32>
    %99 = vector.broadcast %98 : vector<8x1xf32> to vector<8x4xf32>
    %100 = arith.addf %97, %99 : vector<8x4xf32>
    %cst_44 = arith.constant dense<0xFF800000> : vector<4xf32>
    %101 = vector.multi_reduction <maximumf>, %100, %cst_44 [0] : vector<8x4xf32> to vector<4xf32>
    %102 = vector.shape_cast %101 : vector<4xf32> to vector<1x4xf32>
    %103 = vector.broadcast %102 : vector<1x4xf32> to vector<8x4xf32>
    %104 = arith.subf %100, %103 : vector<8x4xf32>
    %105 = math.exp %104 : vector<8x4xf32>
    %cst_45 = arith.constant dense<0.000000e+00> : vector<4xf32>
    %106 = vector.multi_reduction <add>, %105, %cst_45 [0] : vector<8x4xf32> to vector<4xf32>
    %107 = vector.shape_cast %106 : vector<4xf32> to vector<1x4xf32>
    %108 = tpu.reciprocal %107 {approx = true} : vector<1x4xf32> -> vector<1x4xf32>
    %109 = vector.broadcast %108 : vector<1x4xf32> to vector<8x4xf32>
    %110 = arith.mulf %105, %109 : vector<8x4xf32>
    %cst_46 = arith.constant dense<0.000000e+00> : vector<8x32xf32>
    %111 = tpu.matmul %110, %79, %cst_46 {dimension_numbers = #tpu.dot_dimension_numbers<[1], [0], [0], [1], [0, 0, 1, 1], [], []>} : vector<8x4xf32>, vector<4x32xf32>, vector<8x32xf32> -> vector<8x32xf32>
    %112 = arith.mulf %111, %91 : vector<8x32xf32>
    %cst_47 = arith.constant dense<0.000000e+00> : vector<32xf32>
    %113 = vector.multi_reduction <add>, %112, %cst_47 [0] : vector<8x32xf32> to vector<32xf32>
    %114 = vector.shape_cast %113 : vector<32xf32> to vector<1x32xf32>
    %115 = vector.extract_strided_slice %88 {offsets = [8, 0], sizes = [8, 32], strides = [1, 1]} : vector<16x32xf32> to vector<8x32xf32>
    %116 = vector.extract_strided_slice %89 {offsets = [8, 0], sizes = [8, 32], strides = [1, 1]} : vector<16x32xf32> to vector<8x32xf32>
    %117 = vector.extract_strided_slice %83 {offsets = [1, 0], sizes = [1, 32], strides = [1, 1]} : vector<2x32xf32> to vector<1x32xf32>
    %118 = vector.broadcast %117 : vector<1x32xf32> to vector<8x32xf32>
    %119 = arith.mulf %118, %115 : vector<8x32xf32>
    %cst_48 = arith.constant dense<0.000000e+00> : vector<8x4xf32>
    %120 = tpu.matmul %119, %66, %cst_48 {dimension_numbers = #tpu.dot_dimension_numbers<[1], [0], [0], [1], [0, 0, 1, 1], [], []>} : vector<8x32xf32>, vector<32x4xf32>, vector<8x4xf32> -> vector<8x4xf32>
    %cst_49 = arith.constant 0.353553385 : f32
    %121 = vector.broadcast %cst_49 : f32 to vector<8x4xf32>
    %122 = arith.mulf %120, %121 : vector<8x4xf32>
    %123 = vector.extract_strided_slice %47 {offsets = [8, 0], sizes = [8, 1], strides = [1, 1]} : vector<16x1xf32> to vector<8x1xf32>
    %124 = vector.broadcast %123 : vector<8x1xf32> to vector<8x4xf32>
    %125 = arith.addf %122, %124 : vector<8x4xf32>
    %cst_50 = arith.constant dense<0xFF800000> : vector<4xf32>
    %126 = vector.multi_reduction <maximumf>, %125, %cst_50 [0] : vector<8x4xf32> to vector<4xf32>
    %127 = vector.shape_cast %126 : vector<4xf32> to vector<1x4xf32>
    %128 = vector.broadcast %127 : vector<1x4xf32> to vector<8x4xf32>
    %129 = arith.subf %125, %128 : vector<8x4xf32>
    %130 = math.exp %129 : vector<8x4xf32>
    %cst_51 = arith.constant dense<0.000000e+00> : vector<4xf32>
    %131 = vector.multi_reduction <add>, %130, %cst_51 [0] : vector<8x4xf32> to vector<4xf32>
    %132 = vector.shape_cast %131 : vector<4xf32> to vector<1x4xf32>
    %133 = tpu.reciprocal %132 {approx = true} : vector<1x4xf32> -> vector<1x4xf32>
    %134 = vector.broadcast %133 : vector<1x4xf32> to vector<8x4xf32>
    %135 = arith.mulf %130, %134 : vector<8x4xf32>
    %cst_52 = arith.constant dense<0.000000e+00> : vector<8x32xf32>
    %136 = tpu.matmul %135, %79, %cst_52 {dimension_numbers = #tpu.dot_dimension_numbers<[1], [0], [0], [1], [0, 0, 1, 1], [], []>} : vector<8x4xf32>, vector<4x32xf32>, vector<8x32xf32> -> vector<8x32xf32>
    %137 = arith.mulf %136, %116 : vector<8x32xf32>
    %cst_53 = arith.constant dense<0.000000e+00> : vector<32xf32>
    %138 = vector.multi_reduction <add>, %137, %cst_53 [0] : vector<8x32xf32> to vector<32xf32>
    %139 = vector.shape_cast %138 : vector<32xf32> to vector<1x32xf32>
    %140 = tpu.concatenate %114, %139 in 0 : vector<1x32xf32>, vector<1x32xf32> -> vector<2x32xf32>
    %141 = arith.truncf %140 : vector<2x32xf32> to vector<2x32xbf16>
    %cst_54 = arith.constant dense<0.000000e+00> : vector<2x32xf32>
    %142 = tpu.matmul %141, %52, %cst_54 {dimension_numbers = #tpu.dot_dimension_numbers<[1], [0], [0], [1], [0, 0, 1, 1], [], []>} : vector<2x32xbf16>, vector<32x32xbf16>, vector<2x32xf32> -> vector<2x32xf32>
    %143 = vector.broadcast %53 : vector<1x32xf32> to vector<2x32xf32>
    %144 = arith.addf %142, %143 : vector<2x32xf32>
    %c0_55 = arith.constant 0 : index
    %c0_56 = arith.constant 0 : index
    %145 = vector.load %arg6[%c0_55, %c0_56] : memref<1x32xf32, #tpu.memory_space<vmem>>, vector<1x32xf32>
    %c0_57 = arith.constant 0 : index
    %c0_58 = arith.constant 0 : index
    %146 = vector.load %arg9[%c0_57, %c0_58] : memref<1x32xf32, #tpu.memory_space<vmem>>, vector<1x32xf32>
    %c0_59 = arith.constant 0 : index
    %c0_60 = arith.constant 0 : index
    %147 = vector.load %arg10[%c0_59, %c0_60] : memref<1x32xf32, #tpu.memory_space<vmem>>, vector<1x32xf32>
    %cst_61 = arith.constant dense<0.000000e+00> : vector<1xf32>
    %148 = vector.multi_reduction <add>, %145, %cst_61 [1] : vector<1x32xf32> to vector<1xf32>
    %149 = vector.shape_cast %148 : vector<1xf32> to vector<1x1xf32>
    %cst_62 = arith.constant 3.200000e+01 : f32
    %150 = vector.broadcast %cst_62 : f32 to vector<1x1xf32>
    %151 = arith.divf %149, %150 : vector<1x1xf32>
    %152 = vector.broadcast %151 : vector<1x1xf32> to vector<1x32xf32>
    %153 = arith.subf %145, %152 : vector<1x32xf32>
    %154 = arith.mulf %153, %153 : vector<1x32xf32>
    %cst_63 = arith.constant dense<0.000000e+00> : vector<1xf32>
    %155 = vector.multi_reduction <add>, %154, %cst_63 [1] : vector<1x32xf32> to vector<1xf32>
    %156 = vector.shape_cast %155 : vector<1xf32> to vector<1x1xf32>
    %cst_64 = arith.constant 3.200000e+01 : f32
    %157 = vector.broadcast %cst_64 : f32 to vector<1x1xf32>
    %158 = arith.divf %156, %157 : vector<1x1xf32>
    %cst_65 = arith.constant 9.99999974E-6 : f32
    %159 = vector.broadcast %cst_65 : f32 to vector<1x1xf32>
    %160 = arith.addf %158, %159 : vector<1x1xf32>
    %161 = math.rsqrt %160 : vector<1x1xf32>
    %162 = vector.broadcast %161 : vector<1x1xf32> to vector<1x32xf32>
    %163 = arith.mulf %153, %162 : vector<1x32xf32>
    %164 = arith.mulf %163, %146 : vector<1x32xf32>
    %165 = arith.addf %164, %147 : vector<1x32xf32>
    %166 = vector.shape_cast %165 : vector<1x32xf32> to vector<1x32xf32>
    %167 = vector.broadcast %166 : vector<1x32xf32> to vector<2x32xf32>
    %c0_66 = arith.constant 0 : index
    %c0_67 = arith.constant 0 : index
    %168 = vector.load %arg1[%c0_66, %c0_67] : memref<18x32xf32, #tpu.memory_space<vmem>>, vector<18x32xf32>
    %c0_68 = arith.constant 0 : index
    %c0_69 = arith.constant 0 : index
    %169 = vector.load %arg9[%c0_68, %c0_69] : memref<1x32xf32, #tpu.memory_space<vmem>>, vector<1x32xf32>
    %c0_70 = arith.constant 0 : index
    %c0_71 = arith.constant 0 : index
    %170 = vector.load %arg10[%c0_70, %c0_71] : memref<1x32xf32, #tpu.memory_space<vmem>>, vector<1x32xf32>
    %cst_72 = arith.constant dense<0.000000e+00> : vector<18xf32>
    %171 = vector.multi_reduction <add>, %168, %cst_72 [1] : vector<18x32xf32> to vector<18xf32>
    %172 = vector.shape_cast %171 : vector<18xf32> to vector<18x1xf32>
    %cst_73 = arith.constant 3.200000e+01 : f32
    %173 = vector.broadcast %cst_73 : f32 to vector<18x1xf32>
    %174 = arith.divf %172, %173 : vector<18x1xf32>
    %175 = vector.broadcast %174 : vector<18x1xf32> to vector<18x32xf32>
    %176 = arith.subf %168, %175 : vector<18x32xf32>
    %177 = arith.mulf %176, %176 : vector<18x32xf32>
    %cst_74 = arith.constant dense<0.000000e+00> : vector<18xf32>
    %178 = vector.multi_reduction <add>, %177, %cst_74 [1] : vector<18x32xf32> to vector<18xf32>
    %179 = vector.shape_cast %178 : vector<18xf32> to vector<18x1xf32>
    %cst_75 = arith.constant 3.200000e+01 : f32
    %180 = vector.broadcast %cst_75 : f32 to vector<18x1xf32>
    %181 = arith.divf %179, %180 : vector<18x1xf32>
    %cst_76 = arith.constant 9.99999974E-6 : f32
    %182 = vector.broadcast %cst_76 : f32 to vector<18x1xf32>
    %183 = arith.addf %181, %182 : vector<18x1xf32>
    %184 = math.rsqrt %183 : vector<18x1xf32>
    %185 = vector.broadcast %184 : vector<18x1xf32> to vector<18x32xf32>
    %186 = arith.mulf %176, %185 : vector<18x32xf32>
    %187 = vector.broadcast %169 : vector<1x32xf32> to vector<18x32xf32>
    %188 = arith.mulf %186, %187 : vector<18x32xf32>
    %189 = vector.broadcast %170 : vector<1x32xf32> to vector<18x32xf32>
    %190 = arith.addf %188, %189 : vector<18x32xf32>
    %c0_77 = arith.constant 0 : index
    %c0_78 = arith.constant 0 : index
    %191 = vector.load %arg4[%c0_77, %c0_78] : memref<18x1xf32, #tpu.memory_space<vmem>>, vector<18x1xf32>
    %c0_79 = arith.constant 0 : index
    %c0_80 = arith.constant 0 : index
    %192 = vector.load %arg17[%c0_79, %c0_80] : memref<32x32xbf16, #tpu.memory_space<vmem>>, vector<32x32xbf16>
    %c0_81 = arith.constant 0 : index
    %c0_82 = arith.constant 0 : index
    %193 = vector.load %arg18[%c0_81, %c0_82] : memref<1x32xf32, #tpu.memory_space<vmem>>, vector<1x32xf32>
    %c0_83 = arith.constant 0 : index
    %c0_84 = arith.constant 0 : index
    %194 = vector.load %arg19[%c0_83, %c0_84] : memref<32x64xbf16, #tpu.memory_space<vmem>>, vector<32x64xbf16>
    %c0_85 = arith.constant 0 : index
    %c0_86 = arith.constant 0 : index
    %195 = vector.load %arg20[%c0_85, %c0_86] : memref<1x64xf32, #tpu.memory_space<vmem>>, vector<1x64xf32>
    %c0_87 = arith.constant 0 : index
    %c0_88 = arith.constant 0 : index
    %196 = vector.load %arg21[%c0_87, %c0_88] : memref<32x32xbf16, #tpu.memory_space<vmem>>, vector<32x32xbf16>
    %c0_89 = arith.constant 0 : index
    %c0_90 = arith.constant 0 : index
    %197 = vector.load %arg22[%c0_89, %c0_90] : memref<1x32xf32, #tpu.memory_space<vmem>>, vector<1x32xf32>
    %198 = tpu.iota {dimensions = array<i32: 0>} : vector<32x4xi32>
    %199 = tpu.iota {dimensions = array<i32: 1>} : vector<32x4xi32>
    %c8_i32_91 = arith.constant 8 : i32
    %200 = vector.broadcast %c8_i32_91 : i32 to vector<32x4xi32>
    %201 = arith.muli %199, %200 : vector<32x4xi32>
    %202 = arith.cmpi sge, %198, %201 : vector<32x4xi32>
    %c1_i32_92 = arith.constant 1 : i32
    %203 = vector.broadcast %c1_i32_92 : i32 to vector<32x4xi32>
    %204 = arith.addi %199, %203 : vector<32x4xi32>
    %c8_i32_93 = arith.constant 8 : i32
    %205 = vector.broadcast %c8_i32_93 : i32 to vector<32x4xi32>
    %206 = arith.muli %204, %205 : vector<32x4xi32>
    %207 = arith.cmpi slt, %198, %206 : vector<32x4xi32>
    %208 = arith.andi %202, %207 : vector<32x4xi1>
    %209 = arith.extui %208 : vector<32x4xi1> to vector<32x4xi32>
    %210 = arith.sitofp %209 : vector<32x4xi32> to vector<32x4xf32>
    %211 = tpu.iota {dimensions = array<i32: 0>} : vector<4x32xi32>
    %212 = tpu.iota {dimensions = array<i32: 1>} : vector<4x32xi32>
    %c8_i32_94 = arith.constant 8 : i32
    %213 = vector.broadcast %c8_i32_94 : i32 to vector<4x32xi32>
    %214 = arith.muli %211, %213 : vector<4x32xi32>
    %215 = arith.cmpi sge, %212, %214 : vector<4x32xi32>
    %c1_i32_95 = arith.constant 1 : i32
    %216 = vector.broadcast %c1_i32_95 : i32 to vector<4x32xi32>
    %217 = arith.addi %211, %216 : vector<4x32xi32>
    %c8_i32_96 = arith.constant 8 : i32
    %218 = vector.broadcast %c8_i32_96 : i32 to vector<4x32xi32>
    %219 = arith.muli %217, %218 : vector<4x32xi32>
    %220 = arith.cmpi slt, %212, %219 : vector<4x32xi32>
    %221 = arith.andi %215, %220 : vector<4x32xi1>
    %222 = arith.extui %221 : vector<4x32xi1> to vector<4x32xi32>
    %223 = arith.sitofp %222 : vector<4x32xi32> to vector<4x32xf32>
    %224 = arith.truncf %167 : vector<2x32xf32> to vector<2x32xbf16>
    %cst_97 = arith.constant dense<0.000000e+00> : vector<2x32xf32>
    %225 = tpu.matmul %224, %192, %cst_97 {dimension_numbers = #tpu.dot_dimension_numbers<[1], [0], [0], [1], [0, 0, 1, 1], [], []>} : vector<2x32xbf16>, vector<32x32xbf16>, vector<2x32xf32> -> vector<2x32xf32>
    %226 = vector.broadcast %193 : vector<1x32xf32> to vector<2x32xf32>
    %227 = arith.addf %225, %226 : vector<2x32xf32>
    %228 = arith.truncf %190 : vector<18x32xf32> to vector<18x32xbf16>
    %cst_98 = arith.constant dense<0.000000e+00> : vector<18x64xf32>
    %229 = tpu.matmul %228, %194, %cst_98 {dimension_numbers = #tpu.dot_dimension_numbers<[1], [0], [0], [1], [0, 0, 1, 1], [], []>} : vector<18x32xbf16>, vector<32x64xbf16>, vector<18x64xf32> -> vector<18x64xf32>
    %230 = vector.broadcast %195 : vector<1x64xf32> to vector<18x64xf32>
    %231 = arith.addf %229, %230 : vector<18x64xf32>
    %232 = vector.extract_strided_slice %231 {offsets = [0, 0], sizes = [18, 32], strides = [1, 1]} : vector<18x64xf32> to vector<18x32xf32>
    %233 = vector.extract_strided_slice %231 {offsets = [0, 32], sizes = [18, 32], strides = [1, 1]} : vector<18x64xf32> to vector<18x32xf32>
    %234 = vector.extract_strided_slice %232 {offsets = [0, 0], sizes = [9, 32], strides = [1, 1]} : vector<18x32xf32> to vector<9x32xf32>
    %235 = vector.extract_strided_slice %233 {offsets = [0, 0], sizes = [9, 32], strides = [1, 1]} : vector<18x32xf32> to vector<9x32xf32>
    %236 = vector.extract_strided_slice %227 {offsets = [0, 0], sizes = [1, 32], strides = [1, 1]} : vector<2x32xf32> to vector<1x32xf32>
    %237 = vector.broadcast %236 : vector<1x32xf32> to vector<9x32xf32>
    %238 = arith.mulf %237, %234 : vector<9x32xf32>
    %cst_99 = arith.constant dense<0.000000e+00> : vector<9x4xf32>
    %239 = tpu.matmul %238, %210, %cst_99 {dimension_numbers = #tpu.dot_dimension_numbers<[1], [0], [0], [1], [0, 0, 1, 1], [], []>} : vector<9x32xf32>, vector<32x4xf32>, vector<9x4xf32> -> vector<9x4xf32>
    %cst_100 = arith.constant 0.353553385 : f32
    %240 = vector.broadcast %cst_100 : f32 to vector<9x4xf32>
    %241 = arith.mulf %239, %240 : vector<9x4xf32>
    %242 = vector.extract_strided_slice %191 {offsets = [0, 0], sizes = [9, 1], strides = [1, 1]} : vector<18x1xf32> to vector<9x1xf32>
    %243 = vector.broadcast %242 : vector<9x1xf32> to vector<9x4xf32>
    %244 = arith.addf %241, %243 : vector<9x4xf32>
    %cst_101 = arith.constant dense<0xFF800000> : vector<4xf32>
    %245 = vector.multi_reduction <maximumf>, %244, %cst_101 [0] : vector<9x4xf32> to vector<4xf32>
    %246 = vector.shape_cast %245 : vector<4xf32> to vector<1x4xf32>
    %247 = vector.broadcast %246 : vector<1x4xf32> to vector<9x4xf32>
    %248 = arith.subf %244, %247 : vector<9x4xf32>
    %249 = math.exp %248 : vector<9x4xf32>
    %cst_102 = arith.constant dense<0.000000e+00> : vector<4xf32>
    %250 = vector.multi_reduction <add>, %249, %cst_102 [0] : vector<9x4xf32> to vector<4xf32>
    %251 = vector.shape_cast %250 : vector<4xf32> to vector<1x4xf32>
    %252 = tpu.reciprocal %251 {approx = true} : vector<1x4xf32> -> vector<1x4xf32>
    %253 = vector.broadcast %252 : vector<1x4xf32> to vector<9x4xf32>
    %254 = arith.mulf %249, %253 : vector<9x4xf32>
    %cst_103 = arith.constant dense<0.000000e+00> : vector<9x32xf32>
    %255 = tpu.matmul %254, %223, %cst_103 {dimension_numbers = #tpu.dot_dimension_numbers<[1], [0], [0], [1], [0, 0, 1, 1], [], []>} : vector<9x4xf32>, vector<4x32xf32>, vector<9x32xf32> -> vector<9x32xf32>
    %256 = arith.mulf %255, %235 : vector<9x32xf32>
    %cst_104 = arith.constant dense<0.000000e+00> : vector<32xf32>
    %257 = vector.multi_reduction <add>, %256, %cst_104 [0] : vector<9x32xf32> to vector<32xf32>
    %258 = vector.shape_cast %257 : vector<32xf32> to vector<1x32xf32>
    %259 = vector.extract_strided_slice %232 {offsets = [9, 0], sizes = [9, 32], strides = [1, 1]} : vector<18x32xf32> to vector<9x32xf32>
    %260 = vector.extract_strided_slice %233 {offsets = [9, 0], sizes = [9, 32], strides = [1, 1]} : vector<18x32xf32> to vector<9x32xf32>
    %261 = vector.extract_strided_slice %227 {offsets = [1, 0], sizes = [1, 32], strides = [1, 1]} : vector<2x32xf32> to vector<1x32xf32>
    %262 = vector.broadcast %261 : vector<1x32xf32> to vector<9x32xf32>
    %263 = arith.mulf %262, %259 : vector<9x32xf32>
    %cst_105 = arith.constant dense<0.000000e+00> : vector<9x4xf32>
    %264 = tpu.matmul %263, %210, %cst_105 {dimension_numbers = #tpu.dot_dimension_numbers<[1], [0], [0], [1], [0, 0, 1, 1], [], []>} : vector<9x32xf32>, vector<32x4xf32>, vector<9x4xf32> -> vector<9x4xf32>
    %cst_106 = arith.constant 0.353553385 : f32
    %265 = vector.broadcast %cst_106 : f32 to vector<9x4xf32>
    %266 = arith.mulf %264, %265 : vector<9x4xf32>
    %267 = vector.extract_strided_slice %191 {offsets = [9, 0], sizes = [9, 1], strides = [1, 1]} : vector<18x1xf32> to vector<9x1xf32>
    %268 = vector.broadcast %267 : vector<9x1xf32> to vector<9x4xf32>
    %269 = arith.addf %266, %268 : vector<9x4xf32>
    %cst_107 = arith.constant dense<0xFF800000> : vector<4xf32>
    %270 = vector.multi_reduction <maximumf>, %269, %cst_107 [0] : vector<9x4xf32> to vector<4xf32>
    %271 = vector.shape_cast %270 : vector<4xf32> to vector<1x4xf32>
    %272 = vector.broadcast %271 : vector<1x4xf32> to vector<9x4xf32>
    %273 = arith.subf %269, %272 : vector<9x4xf32>
    %274 = math.exp %273 : vector<9x4xf32>
    %cst_108 = arith.constant dense<0.000000e+00> : vector<4xf32>
    %275 = vector.multi_reduction <add>, %274, %cst_108 [0] : vector<9x4xf32> to vector<4xf32>
    %276 = vector.shape_cast %275 : vector<4xf32> to vector<1x4xf32>
    %277 = tpu.reciprocal %276 {approx = true} : vector<1x4xf32> -> vector<1x4xf32>
    %278 = vector.broadcast %277 : vector<1x4xf32> to vector<9x4xf32>
    %279 = arith.mulf %274, %278 : vector<9x4xf32>
    %cst_109 = arith.constant dense<0.000000e+00> : vector<9x32xf32>
    %280 = tpu.matmul %279, %223, %cst_109 {dimension_numbers = #tpu.dot_dimension_numbers<[1], [0], [0], [1], [0, 0, 1, 1], [], []>} : vector<9x4xf32>, vector<4x32xf32>, vector<9x32xf32> -> vector<9x32xf32>
    %281 = arith.mulf %280, %260 : vector<9x32xf32>
    %cst_110 = arith.constant dense<0.000000e+00> : vector<32xf32>
    %282 = vector.multi_reduction <add>, %281, %cst_110 [0] : vector<9x32xf32> to vector<32xf32>
    %283 = vector.shape_cast %282 : vector<32xf32> to vector<1x32xf32>
    %284 = tpu.concatenate %258, %283 in 0 : vector<1x32xf32>, vector<1x32xf32> -> vector<2x32xf32>
    %285 = arith.truncf %284 : vector<2x32xf32> to vector<2x32xbf16>
    %cst_111 = arith.constant dense<0.000000e+00> : vector<2x32xf32>
    %286 = tpu.matmul %285, %196, %cst_111 {dimension_numbers = #tpu.dot_dimension_numbers<[1], [0], [0], [1], [0, 0, 1, 1], [], []>} : vector<2x32xbf16>, vector<32x32xbf16>, vector<2x32xf32> -> vector<2x32xf32>
    %287 = vector.broadcast %197 : vector<1x32xf32> to vector<2x32xf32>
    %288 = arith.addf %286, %287 : vector<2x32xf32>
    %c0_112 = arith.constant 0 : index
    %c0_113 = arith.constant 0 : index
    %289 = vector.load %arg35[%c0_112, %c0_113] : memref<2x32xf32, #tpu.memory_space<vmem>>, vector<2x32xf32>
    tpu.vector_store %arg35[%c0_112, %c0_113], %288 {strides = array<i32>} : memref<2x32xf32, #tpu.memory_space<vmem>>, vector<2x32xf32>,
    %c0_114 = arith.constant 0 : index
    %c0_115 = arith.constant 0 : index
    %290 = vector.load %arg23[%c0_114, %c0_115] : memref<32x256xbf16, #tpu.memory_space<vmem>>, vector<32x256xbf16>
    %c0_116 = arith.constant 0 : index
    %c0_117 = arith.constant 0 : index
    %291 = vector.load %arg24[%c0_116, %c0_117] : memref<1x256xf32, #tpu.memory_space<vmem>>, vector<1x256xf32>
    %c0_118 = arith.constant 0 : index
    %c0_119 = arith.constant 0 : index
    %292 = vector.load %arg25[%c0_118, %c0_119] : memref<1x256xf32, #tpu.memory_space<vmem>>, vector<1x256xf32>
    %c0_120 = arith.constant 0 : index
    %c0_121 = arith.constant 0 : index
    %293 = vector.load %arg26[%c0_120, %c0_121] : memref<1x256xf32, #tpu.memory_space<vmem>>, vector<1x256xf32>
    %c0_122 = arith.constant 0 : index
    %c0_123 = arith.constant 0 : index
    %294 = vector.load %arg27[%c0_122, %c0_123] : memref<256x128xbf16, #tpu.memory_space<vmem>>, vector<256x128xbf16>
    %c0_124 = arith.constant 0 : index
    %c0_125 = arith.constant 0 : index
    %295 = vector.load %arg28[%c0_124, %c0_125] : memref<1x128xf32, #tpu.memory_space<vmem>>, vector<1x128xf32>
    %c0_126 = arith.constant 0 : index
    %c0_127 = arith.constant 0 : index
    %296 = vector.load %arg29[%c0_126, %c0_127] : memref<1x128xf32, #tpu.memory_space<vmem>>, vector<1x128xf32>
    %c0_128 = arith.constant 0 : index
    %c0_129 = arith.constant 0 : index
    %297 = vector.load %arg30[%c0_128, %c0_129] : memref<1x128xf32, #tpu.memory_space<vmem>>, vector<1x128xf32>
    %c0_130 = arith.constant 0 : index
    %c0_131 = arith.constant 0 : index
    %298 = vector.load %arg31[%c0_130, %c0_131] : memref<128x64xbf16, #tpu.memory_space<vmem>>, vector<128x64xbf16>
    %c0_132 = arith.constant 0 : index
    %c0_133 = arith.constant 0 : index
    %299 = vector.load %arg32[%c0_132, %c0_133] : memref<1x64xf32, #tpu.memory_space<vmem>>, vector<1x64xf32>
    %300 = arith.truncf %0 : vector<16x32xf32> to vector<16x32xbf16>
    %cst_134 = arith.constant dense<0.000000e+00> : vector<16x256xf32>
    %301 = tpu.matmul %300, %290, %cst_134 {dimension_numbers = #tpu.dot_dimension_numbers<[1], [0], [0], [1], [0, 0, 1, 1], [], []>} : vector<16x32xbf16>, vector<32x256xbf16>, vector<16x256xf32> -> vector<16x256xf32>
    %302 = vector.broadcast %291 : vector<1x256xf32> to vector<16x256xf32>
    %303 = arith.addf %301, %302 : vector<16x256xf32>
    %cst_135 = arith.constant dense<0.000000e+00> : vector<16xf32>
    %304 = vector.multi_reduction <add>, %303, %cst_135 [1] : vector<16x256xf32> to vector<16xf32>
    %305 = vector.shape_cast %304 : vector<16xf32> to vector<16x1xf32>
    %cst_136 = arith.constant 2.560000e+02 : f32
    %306 = vector.broadcast %cst_136 : f32 to vector<16x1xf32>
    %307 = arith.divf %305, %306 : vector<16x1xf32>
    %308 = vector.broadcast %307 : vector<16x1xf32> to vector<16x256xf32>
    %309 = arith.subf %303, %308 : vector<16x256xf32>
    %310 = arith.mulf %309, %309 : vector<16x256xf32>
    %cst_137 = arith.constant dense<0.000000e+00> : vector<16xf32>
    %311 = vector.multi_reduction <add>, %310, %cst_137 [1] : vector<16x256xf32> to vector<16xf32>
    %312 = vector.shape_cast %311 : vector<16xf32> to vector<16x1xf32>
    %cst_138 = arith.constant 2.560000e+02 : f32
    %313 = vector.broadcast %cst_138 : f32 to vector<16x1xf32>
    %314 = arith.divf %312, %313 : vector<16x1xf32>
    %cst_139 = arith.constant 9.99999974E-6 : f32
    %315 = vector.broadcast %cst_139 : f32 to vector<16x1xf32>
    %316 = arith.addf %314, %315 : vector<16x1xf32>
    %317 = math.rsqrt %316 : vector<16x1xf32>
    %318 = vector.broadcast %317 : vector<16x1xf32> to vector<16x256xf32>
    %319 = arith.mulf %309, %318 : vector<16x256xf32>
    %320 = vector.broadcast %292 : vector<1x256xf32> to vector<16x256xf32>
    %321 = arith.mulf %319, %320 : vector<16x256xf32>
    %322 = vector.broadcast %293 : vector<1x256xf32> to vector<16x256xf32>
    %323 = arith.addf %321, %322 : vector<16x256xf32>
    %324 = arith.mulf %323, %323 : vector<16x256xf32>
    %325 = arith.mulf %323, %324 : vector<16x256xf32>
    %cst_140 = arith.constant 4.471500e-02 : f32
    %326 = vector.broadcast %cst_140 : f32 to vector<16x256xf32>
    %327 = arith.mulf %326, %325 : vector<16x256xf32>
    %328 = arith.addf %323, %327 : vector<16x256xf32>
    %cst_141 = arith.constant 0.797884583 : f32
    %329 = vector.broadcast %cst_141 : f32 to vector<16x256xf32>
    %330 = arith.mulf %329, %328 : vector<16x256xf32>
    %331 = math.tanh %330 : vector<16x256xf32>
    %cst_142 = arith.constant 1.000000e+00 : f32
    %332 = vector.broadcast %cst_142 : f32 to vector<16x256xf32>
    %333 = arith.addf %332, %331 : vector<16x256xf32>
    %cst_143 = arith.constant 5.000000e-01 : f32
    %334 = vector.broadcast %cst_143 : f32 to vector<16x256xf32>
    %335 = arith.mulf %334, %333 : vector<16x256xf32>
    %336 = arith.mulf %323, %335 : vector<16x256xf32>
    %337 = arith.truncf %336 : vector<16x256xf32> to vector<16x256xbf16>
    %cst_144 = arith.constant dense<0.000000e+00> : vector<16x128xf32>
    %338 = tpu.matmul %337, %294, %cst_144 {dimension_numbers = #tpu.dot_dimension_numbers<[1], [0], [0], [1], [0, 0, 1, 1], [], []>} : vector<16x256xbf16>, vector<256x128xbf16>, vector<16x128xf32> -> vector<16x128xf32>
    %339 = vector.broadcast %295 : vector<1x128xf32> to vector<16x128xf32>
    %340 = arith.addf %338, %339 : vector<16x128xf32>
    %cst_145 = arith.constant dense<0.000000e+00> : vector<16xf32>
    %341 = vector.multi_reduction <add>, %340, %cst_145 [1] : vector<16x128xf32> to vector<16xf32>
    %342 = vector.shape_cast %341 : vector<16xf32> to vector<16x1xf32>
    %cst_146 = arith.constant 1.280000e+02 : f32
    %343 = vector.broadcast %cst_146 : f32 to vector<16x1xf32>
    %344 = arith.divf %342, %343 : vector<16x1xf32>
    %345 = vector.broadcast %344 : vector<16x1xf32> to vector<16x128xf32>
    %346 = arith.subf %340, %345 : vector<16x128xf32>
    %347 = arith.mulf %346, %346 : vector<16x128xf32>
    %cst_147 = arith.constant dense<0.000000e+00> : vector<16xf32>
    %348 = vector.multi_reduction <add>, %347, %cst_147 [1] : vector<16x128xf32> to vector<16xf32>
    %349 = vector.shape_cast %348 : vector<16xf32> to vector<16x1xf32>
    %cst_148 = arith.constant 1.280000e+02 : f32
    %350 = vector.broadcast %cst_148 : f32 to vector<16x1xf32>
    %351 = arith.divf %349, %350 : vector<16x1xf32>
    %cst_149 = arith.constant 9.99999974E-6 : f32
    %352 = vector.broadcast %cst_149 : f32 to vector<16x1xf32>
    %353 = arith.addf %351, %352 : vector<16x1xf32>
    %354 = math.rsqrt %353 : vector<16x1xf32>
    %355 = vector.broadcast %354 : vector<16x1xf32> to vector<16x128xf32>
    %356 = arith.mulf %346, %355 : vector<16x128xf32>
    %357 = vector.broadcast %296 : vector<1x128xf32> to vector<16x128xf32>
    %358 = arith.mulf %356, %357 : vector<16x128xf32>
    %359 = vector.broadcast %297 : vector<1x128xf32> to vector<16x128xf32>
    %360 = arith.addf %358, %359 : vector<16x128xf32>
    %361 = arith.mulf %360, %360 : vector<16x128xf32>
    %362 = arith.mulf %360, %361 : vector<16x128xf32>
    %cst_150 = arith.constant 4.471500e-02 : f32
    %363 = vector.broadcast %cst_150 : f32 to vector<16x128xf32>
    %364 = arith.mulf %363, %362 : vector<16x128xf32>
    %365 = arith.addf %360, %364 : vector<16x128xf32>
    %cst_151 = arith.constant 0.797884583 : f32
    %366 = vector.broadcast %cst_151 : f32 to vector<16x128xf32>
    %367 = arith.mulf %366, %365 : vector<16x128xf32>
    %368 = math.tanh %367 : vector<16x128xf32>
    %cst_152 = arith.constant 1.000000e+00 : f32
    %369 = vector.broadcast %cst_152 : f32 to vector<16x128xf32>
    %370 = arith.addf %369, %368 : vector<16x128xf32>
    %cst_153 = arith.constant 5.000000e-01 : f32
    %371 = vector.broadcast %cst_153 : f32 to vector<16x128xf32>
    %372 = arith.mulf %371, %370 : vector<16x128xf32>
    %373 = arith.mulf %360, %372 : vector<16x128xf32>
    %374 = arith.truncf %373 : vector<16x128xf32> to vector<16x128xbf16>
    %cst_154 = arith.constant dense<0.000000e+00> : vector<16x64xf32>
    %375 = tpu.matmul %374, %298, %cst_154 {dimension_numbers = #tpu.dot_dimension_numbers<[1], [0], [0], [1], [0, 0, 1, 1], [], []>} : vector<16x128xbf16>, vector<128x64xbf16>, vector<16x64xf32> -> vector<16x64xf32>
    %376 = vector.broadcast %299 : vector<1x64xf32> to vector<16x64xf32>
    %377 = arith.addf %375, %376 : vector<16x64xf32>
    %378 = arith.truncf %144 : vector<2x32xf32> to vector<2x32xbf16>
    %cst_155 = arith.constant dense<0.000000e+00> : vector<2x256xf32>
    %379 = tpu.matmul %378, %290, %cst_155 {dimension_numbers = #tpu.dot_dimension_numbers<[1], [0], [0], [1], [0, 0, 1, 1], [], []>} : vector<2x32xbf16>, vector<32x256xbf16>, vector<2x256xf32> -> vector<2x256xf32>
    %380 = vector.broadcast %291 : vector<1x256xf32> to vector<2x256xf32>
    %381 = arith.addf %379, %380 : vector<2x256xf32>
    %cst_156 = arith.constant dense<0.000000e+00> : vector<2xf32>
    %382 = vector.multi_reduction <add>, %381, %cst_156 [1] : vector<2x256xf32> to vector<2xf32>
    %383 = vector.shape_cast %382 : vector<2xf32> to vector<2x1xf32>
    %cst_157 = arith.constant 2.560000e+02 : f32
    %384 = vector.broadcast %cst_157 : f32 to vector<2x1xf32>
    %385 = arith.divf %383, %384 : vector<2x1xf32>
    %386 = vector.broadcast %385 : vector<2x1xf32> to vector<2x256xf32>
    %387 = arith.subf %381, %386 : vector<2x256xf32>
    %388 = arith.mulf %387, %387 : vector<2x256xf32>
    %cst_158 = arith.constant dense<0.000000e+00> : vector<2xf32>
    %389 = vector.multi_reduction <add>, %388, %cst_158 [1] : vector<2x256xf32> to vector<2xf32>
    %390 = vector.shape_cast %389 : vector<2xf32> to vector<2x1xf32>
    %cst_159 = arith.constant 2.560000e+02 : f32
    %391 = vector.broadcast %cst_159 : f32 to vector<2x1xf32>
    %392 = arith.divf %390, %391 : vector<2x1xf32>
    %cst_160 = arith.constant 9.99999974E-6 : f32
    %393 = vector.broadcast %cst_160 : f32 to vector<2x1xf32>
    %394 = arith.addf %392, %393 : vector<2x1xf32>
    %395 = math.rsqrt %394 : vector<2x1xf32>
    %396 = vector.broadcast %395 : vector<2x1xf32> to vector<2x256xf32>
    %397 = arith.mulf %387, %396 : vector<2x256xf32>
    %398 = vector.broadcast %292 : vector<1x256xf32> to vector<2x256xf32>
    %399 = arith.mulf %397, %398 : vector<2x256xf32>
    %400 = vector.broadcast %293 : vector<1x256xf32> to vector<2x256xf32>
    %401 = arith.addf %399, %400 : vector<2x256xf32>
    %402 = arith.mulf %401, %401 : vector<2x256xf32>
    %403 = arith.mulf %401, %402 : vector<2x256xf32>
    %cst_161 = arith.constant 4.471500e-02 : f32
    %404 = vector.broadcast %cst_161 : f32 to vector<2x256xf32>
    %405 = arith.mulf %404, %403 : vector<2x256xf32>
    %406 = arith.addf %401, %405 : vector<2x256xf32>
    %cst_162 = arith.constant 0.797884583 : f32
    %407 = vector.broadcast %cst_162 : f32 to vector<2x256xf32>
    %408 = arith.mulf %407, %406 : vector<2x256xf32>
    %409 = math.tanh %408 : vector<2x256xf32>
    %cst_163 = arith.constant 1.000000e+00 : f32
    %410 = vector.broadcast %cst_163 : f32 to vector<2x256xf32>
    %411 = arith.addf %410, %409 : vector<2x256xf32>
    %cst_164 = arith.constant 5.000000e-01 : f32
    %412 = vector.broadcast %cst_164 : f32 to vector<2x256xf32>
    %413 = arith.mulf %412, %411 : vector<2x256xf32>
    %414 = arith.mulf %401, %413 : vector<2x256xf32>
    %415 = arith.truncf %414 : vector<2x256xf32> to vector<2x256xbf16>
    %cst_165 = arith.constant dense<0.000000e+00> : vector<2x128xf32>
    %416 = tpu.matmul %415, %294, %cst_165 {dimension_numbers = #tpu.dot_dimension_numbers<[1], [0], [0], [1], [0, 0, 1, 1], [], []>} : vector<2x256xbf16>, vector<256x128xbf16>, vector<2x128xf32> -> vector<2x128xf32>
    %417 = vector.broadcast %295 : vector<1x128xf32> to vector<2x128xf32>
    %418 = arith.addf %416, %417 : vector<2x128xf32>
    %cst_166 = arith.constant dense<0.000000e+00> : vector<2xf32>
    %419 = vector.multi_reduction <add>, %418, %cst_166 [1] : vector<2x128xf32> to vector<2xf32>
    %420 = vector.shape_cast %419 : vector<2xf32> to vector<2x1xf32>
    %cst_167 = arith.constant 1.280000e+02 : f32
    %421 = vector.broadcast %cst_167 : f32 to vector<2x1xf32>
    %422 = arith.divf %420, %421 : vector<2x1xf32>
    %423 = vector.broadcast %422 : vector<2x1xf32> to vector<2x128xf32>
    %424 = arith.subf %418, %423 : vector<2x128xf32>
    %425 = arith.mulf %424, %424 : vector<2x128xf32>
    %cst_168 = arith.constant dense<0.000000e+00> : vector<2xf32>
    %426 = vector.multi_reduction <add>, %425, %cst_168 [1] : vector<2x128xf32> to vector<2xf32>
    %427 = vector.shape_cast %426 : vector<2xf32> to vector<2x1xf32>
    %cst_169 = arith.constant 1.280000e+02 : f32
    %428 = vector.broadcast %cst_169 : f32 to vector<2x1xf32>
    %429 = arith.divf %427, %428 : vector<2x1xf32>
    %cst_170 = arith.constant 9.99999974E-6 : f32
    %430 = vector.broadcast %cst_170 : f32 to vector<2x1xf32>
    %431 = arith.addf %429, %430 : vector<2x1xf32>
    %432 = math.rsqrt %431 : vector<2x1xf32>
    %433 = vector.broadcast %432 : vector<2x1xf32> to vector<2x128xf32>
    %434 = arith.mulf %424, %433 : vector<2x128xf32>
    %435 = vector.broadcast %296 : vector<1x128xf32> to vector<2x128xf32>
    %436 = arith.mulf %434, %435 : vector<2x128xf32>
    %437 = vector.broadcast %297 : vector<1x128xf32> to vector<2x128xf32>
    %438 = arith.addf %436, %437 : vector<2x128xf32>
    %439 = arith.mulf %438, %438 : vector<2x128xf32>
    %440 = arith.mulf %438, %439 : vector<2x128xf32>
    %cst_171 = arith.constant 4.471500e-02 : f32
    %441 = vector.broadcast %cst_171 : f32 to vector<2x128xf32>
    %442 = arith.mulf %441, %440 : vector<2x128xf32>
    %443 = arith.addf %438, %442 : vector<2x128xf32>
    %cst_172 = arith.constant 0.797884583 : f32
    %444 = vector.broadcast %cst_172 : f32 to vector<2x128xf32>
    %445 = arith.mulf %444, %443 : vector<2x128xf32>
    %446 = math.tanh %445 : vector<2x128xf32>
    %cst_173 = arith.constant 1.000000e+00 : f32
    %447 = vector.broadcast %cst_173 : f32 to vector<2x128xf32>
    %448 = arith.addf %447, %446 : vector<2x128xf32>
    %cst_174 = arith.constant 5.000000e-01 : f32
    %449 = vector.broadcast %cst_174 : f32 to vector<2x128xf32>
    %450 = arith.mulf %449, %448 : vector<2x128xf32>
    %451 = arith.mulf %438, %450 : vector<2x128xf32>
    %452 = arith.truncf %451 : vector<2x128xf32> to vector<2x128xbf16>
    %cst_175 = arith.constant dense<0.000000e+00> : vector<2x64xf32>
    %453 = tpu.matmul %452, %298, %cst_175 {dimension_numbers = #tpu.dot_dimension_numbers<[1], [0], [0], [1], [0, 0, 1, 1], [], []>} : vector<2x128xbf16>, vector<128x64xbf16>, vector<2x64xf32> -> vector<2x64xf32>
    %454 = vector.broadcast %299 : vector<1x64xf32> to vector<2x64xf32>
    %455 = arith.addf %453, %454 : vector<2x64xf32>
    %c0_176 = arith.constant 0 : index
    %c0_177 = arith.constant 0 : index
    %456 = vector.load %arg33[%c0_176, %c0_177] : memref<16x64xf32, #tpu.memory_space<vmem>>, vector<16x64xf32>
    tpu.vector_store %arg33[%c0_176, %c0_177], %377 {strides = array<i32>} : memref<16x64xf32, #tpu.memory_space<vmem>>, vector<16x64xf32>,
    %457 = vector.extract_strided_slice %455 {offsets = [0, 0], sizes = [1, 64], strides = [1, 1]} : vector<2x64xf32> to vector<1x64xf32>
    %458 = vector.shape_cast %457 : vector<1x64xf32> to vector<1x64xf32>
    %459 = vector.broadcast %458 : vector<1x64xf32> to vector<8x64xf32>
    %460 = vector.extract_strided_slice %455 {offsets = [1, 0], sizes = [1, 64], strides = [1, 1]} : vector<2x64xf32> to vector<1x64xf32>
    %461 = vector.shape_cast %460 : vector<1x64xf32> to vector<1x64xf32>
    %462 = vector.broadcast %461 : vector<1x64xf32> to vector<8x64xf32>
    %463 = tpu.concatenate %459, %462 in 0 : vector<8x64xf32>, vector<8x64xf32> -> vector<16x64xf32>
    %464 = arith.mulf %377, %377 : vector<16x64xf32>
    %cst_178 = arith.constant dense<0.000000e+00> : vector<16xf32>
    %465 = vector.multi_reduction <add>, %464, %cst_178 [1] : vector<16x64xf32> to vector<16xf32>
    %466 = vector.shape_cast %465 : vector<16xf32> to vector<16x1xf32>
    %467 = math.sqrt %466 : vector<16x1xf32>
    %468 = arith.mulf %463, %463 : vector<16x64xf32>
    %cst_179 = arith.constant dense<0.000000e+00> : vector<16xf32>
    %469 = vector.multi_reduction <add>, %468, %cst_179 [1] : vector<16x64xf32> to vector<16xf32>
    %470 = vector.shape_cast %469 : vector<16xf32> to vector<16x1xf32>
    %471 = math.sqrt %470 : vector<16x1xf32>
    %472 = arith.mulf %467, %471 : vector<16x1xf32>
    %cst_180 = arith.constant 9.99999996E-13 : f32
    %473 = vector.broadcast %cst_180 : f32 to vector<16x1xf32>
    %474 = arith.maximumf %472, %473 : vector<16x1xf32>
    %475 = tpu.reciprocal %474 {approx = true} : vector<16x1xf32> -> vector<16x1xf32>
    %476 = arith.mulf %377, %463 : vector<16x64xf32>
    %cst_181 = arith.constant dense<0.000000e+00> : vector<16xf32>
    %477 = vector.multi_reduction <add>, %476, %cst_181 [1] : vector<16x64xf32> to vector<16xf32>
    %478 = vector.shape_cast %477 : vector<16xf32> to vector<16x1xf32>
    %479 = arith.mulf %478, %475 : vector<16x1xf32>
    %cst_182 = arith.constant 1.000000e+00 : f32
    %480 = vector.broadcast %cst_182 : f32 to vector<16x1xf32>
    %481 = arith.addf %479, %480 : vector<16x1xf32>
    %cst_183 = arith.constant 5.000000e-01 : f32
    %482 = vector.broadcast %cst_183 : f32 to vector<16x1xf32>
    %483 = arith.mulf %481, %482 : vector<16x1xf32>
    %cst_184 = arith.constant 0.000000e+00 : f32
    %cst_185 = arith.constant 1.000000e+00 : f32
    %484 = vector.broadcast %cst_184 : f32 to vector<16x1xf32>
    %485 = arith.maximumf %484, %483 : vector<16x1xf32>
    %486 = vector.broadcast %cst_185 : f32 to vector<16x1xf32>
    %487 = arith.minimumf %486, %485 : vector<16x1xf32>
    %c0_186 = arith.constant 0 : index
    %c0_187 = arith.constant 0 : index
    %488 = vector.load %arg34[%c0_186, %c0_187] : memref<16x1xf32, #tpu.memory_space<vmem>>, vector<16x1xf32>
    tpu.vector_store %arg34[%c0_186, %c0_187], %487 {strides = array<i32>} : memref<16x1xf32, #tpu.memory_space<vmem>>, vector<16x1xf32>,
    return
  }
}

module attributes {stable_mosaic.version = 11 : i64} {
  func.func @kernel(%arg0: memref<2x4xi32, #tpu.memory_space<smem>>, %arg1: memref<2x4xi32, #tpu.memory_space<smem>>, %arg2: memref<2x32xf32, #tpu.memory_space<vmem>>, %arg3: memref<16x32xf32, #tpu.memory_space<vmem>>, %arg4: memref<32x32xbf16, #tpu.memory_space<vmem>>, %arg5: memref<1x32xf32, #tpu.memory_space<vmem>>, %arg6: memref<32x64xbf16, #tpu.memory_space<vmem>>, %arg7: memref<1x64xf32, #tpu.memory_space<vmem>>, %arg8: memref<32x32xbf16, #tpu.memory_space<vmem>>, %arg9: memref<1x32xf32, #tpu.memory_space<vmem>>, %arg10: memref<32x64xbf16, #tpu.memory_space<vmem>>, %arg11: memref<1x64xf32, #tpu.memory_space<vmem>>, %arg12: memref<1x64xf32, #tpu.memory_space<vmem>>, %arg13: memref<1x64xf32, #tpu.memory_space<vmem>>, %arg14: memref<64x64xbf16, #tpu.memory_space<vmem>>, %arg15: memref<1x64xf32, #tpu.memory_space<vmem>>, %arg16: memref<1x64xf32, #tpu.memory_space<vmem>>, %arg17: memref<1x64xf32, #tpu.memory_space<vmem>>, %arg18: memref<64x32xbf16, #tpu.memory_space<vmem>>, %arg19: memref<1x32xf32, #tpu.memory_space<vmem>>, %arg20: memref<32x32xbf16, #tpu.memory_space<vmem>>, %arg21: memref<1x32xf32, #tpu.memory_space<vmem>>, %arg22: memref<32x64xbf16, #tpu.memory_space<vmem>>, %arg23: memref<1x64xf32, #tpu.memory_space<vmem>>, %arg24: memref<32x32xbf16, #tpu.memory_space<vmem>>, %arg25: memref<1x32xf32, #tpu.memory_space<vmem>>, %arg26: memref<32x64xbf16, #tpu.memory_space<vmem>>, %arg27: memref<1x64xf32, #tpu.memory_space<vmem>>, %arg28: memref<1x64xf32, #tpu.memory_space<vmem>>, %arg29: memref<1x64xf32, #tpu.memory_space<vmem>>, %arg30: memref<64x64xbf16, #tpu.memory_space<vmem>>, %arg31: memref<1x64xf32, #tpu.memory_space<vmem>>, %arg32: memref<1x64xf32, #tpu.memory_space<vmem>>, %arg33: memref<1x64xf32, #tpu.memory_space<vmem>>, %arg34: memref<64x32xbf16, #tpu.memory_space<vmem>>, %arg35: memref<1x32xf32, #tpu.memory_space<vmem>>, %arg36: memref<2x32xf32, #tpu.memory_space<vmem>>) attributes {dimension_semantics = [], scalar_prefetch = 0 : i64, scratch_operands = 0 : i64, tpu.core_type = #tpu.core_type<tc>} {
    %c0 = arith.constant 0 : index
    %c0_0 = arith.constant 0 : index
    %0 = vector.load %arg3[%c0, %c0_0] : memref<16x32xf32, #tpu.memory_space<vmem>>, vector<16x32xf32>
    %c0_1 = arith.constant 0 : index
    %c0_2 = arith.constant 0 : index
    %1 = vector.load %arg2[%c0_1, %c0_2] : memref<2x32xf32, #tpu.memory_space<vmem>>, vector<2x32xf32>
    %2 = vector.extract_strided_slice %0 {offsets = [0, 0], sizes = [8, 32], strides = [1, 1]} : vector<16x32xf32> to vector<8x32xf32>
    %c0_3 = arith.constant 0 : index
    %c0_4 = arith.constant 0 : index
    %3 = memref.load %arg0[%c0_3, %c0_4] : memref<2x4xi32, #tpu.memory_space<smem>>
    %4 = tpu.iota {dimensions = array<i32: 1>} : vector<1x8xi32>
    %5 = vector.broadcast %3 : i32 to vector<1x8xi32>
    %6 = arith.cmpi eq, %4, %5 : vector<1x8xi32>
    %7 = arith.extui %6 : vector<1x8xi1> to vector<1x8xi32>
    %8 = arith.sitofp %7 : vector<1x8xi32> to vector<1x8xf32>
    %c0_5 = arith.constant 0 : index
    %c1 = arith.constant 1 : index
    %9 = memref.load %arg0[%c0_5, %c1] : memref<2x4xi32, #tpu.memory_space<smem>>
    %10 = tpu.iota {dimensions = array<i32: 1>} : vector<1x8xi32>
    %11 = vector.broadcast %9 : i32 to vector<1x8xi32>
    %12 = arith.cmpi eq, %10, %11 : vector<1x8xi32>
    %13 = arith.extui %12 : vector<1x8xi1> to vector<1x8xi32>
    %14 = arith.sitofp %13 : vector<1x8xi32> to vector<1x8xf32>
    %c0_6 = arith.constant 0 : index
    %c2 = arith.constant 2 : index
    %15 = memref.load %arg0[%c0_6, %c2] : memref<2x4xi32, #tpu.memory_space<smem>>
    %16 = tpu.iota {dimensions = array<i32: 1>} : vector<1x8xi32>
    %17 = vector.broadcast %15 : i32 to vector<1x8xi32>
    %18 = arith.cmpi eq, %16, %17 : vector<1x8xi32>
    %19 = arith.extui %18 : vector<1x8xi1> to vector<1x8xi32>
    %20 = arith.sitofp %19 : vector<1x8xi32> to vector<1x8xf32>
    %c0_7 = arith.constant 0 : index
    %c3 = arith.constant 3 : index
    %21 = memref.load %arg0[%c0_7, %c3] : memref<2x4xi32, #tpu.memory_space<smem>>
    %22 = tpu.iota {dimensions = array<i32: 1>} : vector<1x8xi32>
    %23 = vector.broadcast %21 : i32 to vector<1x8xi32>
    %24 = arith.cmpi eq, %22, %23 : vector<1x8xi32>
    %25 = arith.extui %24 : vector<1x8xi1> to vector<1x8xi32>
    %26 = arith.sitofp %25 : vector<1x8xi32> to vector<1x8xf32>
    %27 = tpu.concatenate %8, %14, %20, %26 in 0 : vector<1x8xf32>, vector<1x8xf32>, vector<1x8xf32>, vector<1x8xf32> -> vector<4x8xf32>
    %cst = arith.constant dense<0.000000e+00> : vector<4x32xf32>
    %28 = tpu.matmul %27, %2, %cst {dimension_numbers = #tpu.dot_dimension_numbers<[1], [0], [0], [1], [0, 0, 1, 1], [], []>} : vector<4x8xf32>, vector<8x32xf32>, vector<4x32xf32> -> vector<4x32xf32>
    %29 = vector.extract_strided_slice %0 {offsets = [8, 0], sizes = [8, 32], strides = [1, 1]} : vector<16x32xf32> to vector<8x32xf32>
    %c1_8 = arith.constant 1 : index
    %c0_9 = arith.constant 0 : index
    %30 = memref.load %arg0[%c1_8, %c0_9] : memref<2x4xi32, #tpu.memory_space<smem>>
    %31 = tpu.iota {dimensions = array<i32: 1>} : vector<1x8xi32>
    %32 = vector.broadcast %30 : i32 to vector<1x8xi32>
    %33 = arith.cmpi eq, %31, %32 : vector<1x8xi32>
    %34 = arith.extui %33 : vector<1x8xi1> to vector<1x8xi32>
    %35 = arith.sitofp %34 : vector<1x8xi32> to vector<1x8xf32>
    %c1_10 = arith.constant 1 : index
    %c1_11 = arith.constant 1 : index
    %36 = memref.load %arg0[%c1_10, %c1_11] : memref<2x4xi32, #tpu.memory_space<smem>>
    %37 = tpu.iota {dimensions = array<i32: 1>} : vector<1x8xi32>
    %38 = vector.broadcast %36 : i32 to vector<1x8xi32>
    %39 = arith.cmpi eq, %37, %38 : vector<1x8xi32>
    %40 = arith.extui %39 : vector<1x8xi1> to vector<1x8xi32>
    %41 = arith.sitofp %40 : vector<1x8xi32> to vector<1x8xf32>
    %c1_12 = arith.constant 1 : index
    %c2_13 = arith.constant 2 : index
    %42 = memref.load %arg0[%c1_12, %c2_13] : memref<2x4xi32, #tpu.memory_space<smem>>
    %43 = tpu.iota {dimensions = array<i32: 1>} : vector<1x8xi32>
    %44 = vector.broadcast %42 : i32 to vector<1x8xi32>
    %45 = arith.cmpi eq, %43, %44 : vector<1x8xi32>
    %46 = arith.extui %45 : vector<1x8xi1> to vector<1x8xi32>
    %47 = arith.sitofp %46 : vector<1x8xi32> to vector<1x8xf32>
    %c1_14 = arith.constant 1 : index
    %c3_15 = arith.constant 3 : index
    %48 = memref.load %arg0[%c1_14, %c3_15] : memref<2x4xi32, #tpu.memory_space<smem>>
    %49 = tpu.iota {dimensions = array<i32: 1>} : vector<1x8xi32>
    %50 = vector.broadcast %48 : i32 to vector<1x8xi32>
    %51 = arith.cmpi eq, %49, %50 : vector<1x8xi32>
    %52 = arith.extui %51 : vector<1x8xi1> to vector<1x8xi32>
    %53 = arith.sitofp %52 : vector<1x8xi32> to vector<1x8xf32>
    %54 = tpu.concatenate %35, %41, %47, %53 in 0 : vector<1x8xf32>, vector<1x8xf32>, vector<1x8xf32>, vector<1x8xf32> -> vector<4x8xf32>
    %cst_16 = arith.constant dense<0.000000e+00> : vector<4x32xf32>
    %55 = tpu.matmul %54, %29, %cst_16 {dimension_numbers = #tpu.dot_dimension_numbers<[1], [0], [0], [1], [0, 0, 1, 1], [], []>} : vector<4x8xf32>, vector<8x32xf32>, vector<4x32xf32> -> vector<4x32xf32>
    %56 = tpu.concatenate %28, %55 in 0 : vector<4x32xf32>, vector<4x32xf32> -> vector<8x32xf32>
    %57 = vector.extract_strided_slice %0 {offsets = [0, 0], sizes = [8, 32], strides = [1, 1]} : vector<16x32xf32> to vector<8x32xf32>
    %c0_17 = arith.constant 0 : index
    %c0_18 = arith.constant 0 : index
    %58 = memref.load %arg1[%c0_17, %c0_18] : memref<2x4xi32, #tpu.memory_space<smem>>
    %59 = tpu.iota {dimensions = array<i32: 1>} : vector<1x8xi32>
    %60 = vector.broadcast %58 : i32 to vector<1x8xi32>
    %61 = arith.cmpi eq, %59, %60 : vector<1x8xi32>
    %62 = arith.extui %61 : vector<1x8xi1> to vector<1x8xi32>
    %63 = arith.sitofp %62 : vector<1x8xi32> to vector<1x8xf32>
    %c0_19 = arith.constant 0 : index
    %c1_20 = arith.constant 1 : index
    %64 = memref.load %arg1[%c0_19, %c1_20] : memref<2x4xi32, #tpu.memory_space<smem>>
    %65 = tpu.iota {dimensions = array<i32: 1>} : vector<1x8xi32>
    %66 = vector.broadcast %64 : i32 to vector<1x8xi32>
    %67 = arith.cmpi eq, %65, %66 : vector<1x8xi32>
    %68 = arith.extui %67 : vector<1x8xi1> to vector<1x8xi32>
    %69 = arith.sitofp %68 : vector<1x8xi32> to vector<1x8xf32>
    %c0_21 = arith.constant 0 : index
    %c2_22 = arith.constant 2 : index
    %70 = memref.load %arg1[%c0_21, %c2_22] : memref<2x4xi32, #tpu.memory_space<smem>>
    %71 = tpu.iota {dimensions = array<i32: 1>} : vector<1x8xi32>
    %72 = vector.broadcast %70 : i32 to vector<1x8xi32>
    %73 = arith.cmpi eq, %71, %72 : vector<1x8xi32>
    %74 = arith.extui %73 : vector<1x8xi1> to vector<1x8xi32>
    %75 = arith.sitofp %74 : vector<1x8xi32> to vector<1x8xf32>
    %c0_23 = arith.constant 0 : index
    %c3_24 = arith.constant 3 : index
    %76 = memref.load %arg1[%c0_23, %c3_24] : memref<2x4xi32, #tpu.memory_space<smem>>
    %77 = tpu.iota {dimensions = array<i32: 1>} : vector<1x8xi32>
    %78 = vector.broadcast %76 : i32 to vector<1x8xi32>
    %79 = arith.cmpi eq, %77, %78 : vector<1x8xi32>
    %80 = arith.extui %79 : vector<1x8xi1> to vector<1x8xi32>
    %81 = arith.sitofp %80 : vector<1x8xi32> to vector<1x8xf32>
    %82 = tpu.concatenate %63, %69, %75, %81 in 0 : vector<1x8xf32>, vector<1x8xf32>, vector<1x8xf32>, vector<1x8xf32> -> vector<4x8xf32>
    %cst_25 = arith.constant dense<0.000000e+00> : vector<4x32xf32>
    %83 = tpu.matmul %82, %57, %cst_25 {dimension_numbers = #tpu.dot_dimension_numbers<[1], [0], [0], [1], [0, 0, 1, 1], [], []>} : vector<4x8xf32>, vector<8x32xf32>, vector<4x32xf32> -> vector<4x32xf32>
    %84 = vector.extract_strided_slice %0 {offsets = [8, 0], sizes = [8, 32], strides = [1, 1]} : vector<16x32xf32> to vector<8x32xf32>
    %c1_26 = arith.constant 1 : index
    %c0_27 = arith.constant 0 : index
    %85 = memref.load %arg1[%c1_26, %c0_27] : memref<2x4xi32, #tpu.memory_space<smem>>
    %86 = tpu.iota {dimensions = array<i32: 1>} : vector<1x8xi32>
    %87 = vector.broadcast %85 : i32 to vector<1x8xi32>
    %88 = arith.cmpi eq, %86, %87 : vector<1x8xi32>
    %89 = arith.extui %88 : vector<1x8xi1> to vector<1x8xi32>
    %90 = arith.sitofp %89 : vector<1x8xi32> to vector<1x8xf32>
    %c1_28 = arith.constant 1 : index
    %c1_29 = arith.constant 1 : index
    %91 = memref.load %arg1[%c1_28, %c1_29] : memref<2x4xi32, #tpu.memory_space<smem>>
    %92 = tpu.iota {dimensions = array<i32: 1>} : vector<1x8xi32>
    %93 = vector.broadcast %91 : i32 to vector<1x8xi32>
    %94 = arith.cmpi eq, %92, %93 : vector<1x8xi32>
    %95 = arith.extui %94 : vector<1x8xi1> to vector<1x8xi32>
    %96 = arith.sitofp %95 : vector<1x8xi32> to vector<1x8xf32>
    %c1_30 = arith.constant 1 : index
    %c2_31 = arith.constant 2 : index
    %97 = memref.load %arg1[%c1_30, %c2_31] : memref<2x4xi32, #tpu.memory_space<smem>>
    %98 = tpu.iota {dimensions = array<i32: 1>} : vector<1x8xi32>
    %99 = vector.broadcast %97 : i32 to vector<1x8xi32>
    %100 = arith.cmpi eq, %98, %99 : vector<1x8xi32>
    %101 = arith.extui %100 : vector<1x8xi1> to vector<1x8xi32>
    %102 = arith.sitofp %101 : vector<1x8xi32> to vector<1x8xf32>
    %c1_32 = arith.constant 1 : index
    %c3_33 = arith.constant 3 : index
    %103 = memref.load %arg1[%c1_32, %c3_33] : memref<2x4xi32, #tpu.memory_space<smem>>
    %104 = tpu.iota {dimensions = array<i32: 1>} : vector<1x8xi32>
    %105 = vector.broadcast %103 : i32 to vector<1x8xi32>
    %106 = arith.cmpi eq, %104, %105 : vector<1x8xi32>
    %107 = arith.extui %106 : vector<1x8xi1> to vector<1x8xi32>
    %108 = arith.sitofp %107 : vector<1x8xi32> to vector<1x8xf32>
    %109 = tpu.concatenate %90, %96, %102, %108 in 0 : vector<1x8xf32>, vector<1x8xf32>, vector<1x8xf32>, vector<1x8xf32> -> vector<4x8xf32>
    %cst_34 = arith.constant dense<0.000000e+00> : vector<4x32xf32>
    %110 = tpu.matmul %109, %84, %cst_34 {dimension_numbers = #tpu.dot_dimension_numbers<[1], [0], [0], [1], [0, 0, 1, 1], [], []>} : vector<4x8xf32>, vector<8x32xf32>, vector<4x32xf32> -> vector<4x32xf32>
    %111 = tpu.concatenate %83, %110 in 0 : vector<4x32xf32>, vector<4x32xf32> -> vector<8x32xf32>
    %c0_35 = arith.constant 0 : index
    %c0_36 = arith.constant 0 : index
    %112 = vector.load %arg4[%c0_35, %c0_36] : memref<32x32xbf16, #tpu.memory_space<vmem>>, vector<32x32xbf16>
    %c0_37 = arith.constant 0 : index
    %c0_38 = arith.constant 0 : index
    %113 = vector.load %arg5[%c0_37, %c0_38] : memref<1x32xf32, #tpu.memory_space<vmem>>, vector<1x32xf32>
    %c0_39 = arith.constant 0 : index
    %c0_40 = arith.constant 0 : index
    %114 = vector.load %arg6[%c0_39, %c0_40] : memref<32x64xbf16, #tpu.memory_space<vmem>>, vector<32x64xbf16>
    %c0_41 = arith.constant 0 : index
    %c0_42 = arith.constant 0 : index
    %115 = vector.load %arg7[%c0_41, %c0_42] : memref<1x64xf32, #tpu.memory_space<vmem>>, vector<1x64xf32>
    %c0_43 = arith.constant 0 : index
    %c0_44 = arith.constant 0 : index
    %116 = vector.load %arg8[%c0_43, %c0_44] : memref<32x32xbf16, #tpu.memory_space<vmem>>, vector<32x32xbf16>
    %c0_45 = arith.constant 0 : index
    %c0_46 = arith.constant 0 : index
    %117 = vector.load %arg9[%c0_45, %c0_46] : memref<1x32xf32, #tpu.memory_space<vmem>>, vector<1x32xf32>
    %118 = tpu.iota {dimensions = array<i32: 0>} : vector<32x4xi32>
    %119 = tpu.iota {dimensions = array<i32: 1>} : vector<32x4xi32>
    %c8_i32 = arith.constant 8 : i32
    %120 = vector.broadcast %c8_i32 : i32 to vector<32x4xi32>
    %121 = arith.muli %119, %120 : vector<32x4xi32>
    %122 = arith.cmpi sge, %118, %121 : vector<32x4xi32>
    %c1_i32 = arith.constant 1 : i32
    %123 = vector.broadcast %c1_i32 : i32 to vector<32x4xi32>
    %124 = arith.addi %119, %123 : vector<32x4xi32>
    %c8_i32_47 = arith.constant 8 : i32
    %125 = vector.broadcast %c8_i32_47 : i32 to vector<32x4xi32>
    %126 = arith.muli %124, %125 : vector<32x4xi32>
    %127 = arith.cmpi slt, %118, %126 : vector<32x4xi32>
    %128 = arith.andi %122, %127 : vector<32x4xi1>
    %129 = arith.extui %128 : vector<32x4xi1> to vector<32x4xi32>
    %130 = arith.sitofp %129 : vector<32x4xi32> to vector<32x4xf32>
    %131 = tpu.iota {dimensions = array<i32: 0>} : vector<4x32xi32>
    %132 = tpu.iota {dimensions = array<i32: 1>} : vector<4x32xi32>
    %c8_i32_48 = arith.constant 8 : i32
    %133 = vector.broadcast %c8_i32_48 : i32 to vector<4x32xi32>
    %134 = arith.muli %131, %133 : vector<4x32xi32>
    %135 = arith.cmpi sge, %132, %134 : vector<4x32xi32>
    %c1_i32_49 = arith.constant 1 : i32
    %136 = vector.broadcast %c1_i32_49 : i32 to vector<4x32xi32>
    %137 = arith.addi %131, %136 : vector<4x32xi32>
    %c8_i32_50 = arith.constant 8 : i32
    %138 = vector.broadcast %c8_i32_50 : i32 to vector<4x32xi32>
    %139 = arith.muli %137, %138 : vector<4x32xi32>
    %140 = arith.cmpi slt, %132, %139 : vector<4x32xi32>
    %141 = arith.andi %135, %140 : vector<4x32xi1>
    %142 = arith.extui %141 : vector<4x32xi1> to vector<4x32xi32>
    %143 = arith.sitofp %142 : vector<4x32xi32> to vector<4x32xf32>
    %144 = arith.truncf %1 : vector<2x32xf32> to vector<2x32xbf16>
    %cst_51 = arith.constant dense<0.000000e+00> : vector<2x32xf32>
    %145 = tpu.matmul %144, %112, %cst_51 {dimension_numbers = #tpu.dot_dimension_numbers<[1], [0], [0], [1], [0, 0, 1, 1], [], []>} : vector<2x32xbf16>, vector<32x32xbf16>, vector<2x32xf32> -> vector<2x32xf32>
    %146 = vector.broadcast %113 : vector<1x32xf32> to vector<2x32xf32>
    %147 = arith.addf %145, %146 : vector<2x32xf32>
    %148 = arith.truncf %56 : vector<8x32xf32> to vector<8x32xbf16>
    %cst_52 = arith.constant dense<0.000000e+00> : vector<8x64xf32>
    %149 = tpu.matmul %148, %114, %cst_52 {dimension_numbers = #tpu.dot_dimension_numbers<[1], [0], [0], [1], [0, 0, 1, 1], [], []>} : vector<8x32xbf16>, vector<32x64xbf16>, vector<8x64xf32> -> vector<8x64xf32>
    %150 = vector.broadcast %115 : vector<1x64xf32> to vector<8x64xf32>
    %151 = arith.addf %149, %150 : vector<8x64xf32>
    %152 = vector.extract_strided_slice %151 {offsets = [0, 0], sizes = [8, 32], strides = [1, 1]} : vector<8x64xf32> to vector<8x32xf32>
    %153 = vector.extract_strided_slice %151 {offsets = [0, 32], sizes = [8, 32], strides = [1, 1]} : vector<8x64xf32> to vector<8x32xf32>
    %154 = vector.extract_strided_slice %152 {offsets = [0, 0], sizes = [4, 32], strides = [1, 1]} : vector<8x32xf32> to vector<4x32xf32>
    %155 = vector.extract_strided_slice %153 {offsets = [0, 0], sizes = [4, 32], strides = [1, 1]} : vector<8x32xf32> to vector<4x32xf32>
    %156 = vector.extract_strided_slice %147 {offsets = [0, 0], sizes = [1, 32], strides = [1, 1]} : vector<2x32xf32> to vector<1x32xf32>
    %157 = vector.broadcast %156 : vector<1x32xf32> to vector<4x32xf32>
    %158 = arith.mulf %157, %154 : vector<4x32xf32>
    %cst_53 = arith.constant dense<0.000000e+00> : vector<4x4xf32>
    %159 = tpu.matmul %158, %130, %cst_53 {dimension_numbers = #tpu.dot_dimension_numbers<[1], [0], [0], [1], [0, 0, 1, 1], [], []>} : vector<4x32xf32>, vector<32x4xf32>, vector<4x4xf32> -> vector<4x4xf32>
    %cst_54 = arith.constant 0.353553385 : f32
    %160 = vector.broadcast %cst_54 : f32 to vector<4x4xf32>
    %161 = arith.mulf %159, %160 : vector<4x4xf32>
    %cst_55 = arith.constant dense<0xFF800000> : vector<4xf32>
    %162 = vector.multi_reduction <maximumf>, %161, %cst_55 [0] : vector<4x4xf32> to vector<4xf32>
    %163 = vector.shape_cast %162 : vector<4xf32> to vector<1x4xf32>
    %164 = vector.broadcast %163 : vector<1x4xf32> to vector<4x4xf32>
    %165 = arith.subf %161, %164 : vector<4x4xf32>
    %166 = math.exp %165 : vector<4x4xf32>
    %cst_56 = arith.constant dense<0.000000e+00> : vector<4xf32>
    %167 = vector.multi_reduction <add>, %166, %cst_56 [0] : vector<4x4xf32> to vector<4xf32>
    %168 = vector.shape_cast %167 : vector<4xf32> to vector<1x4xf32>
    %169 = tpu.reciprocal %168 {approx = true} : vector<1x4xf32> -> vector<1x4xf32>
    %170 = vector.broadcast %169 : vector<1x4xf32> to vector<4x4xf32>
    %171 = arith.mulf %166, %170 : vector<4x4xf32>
    %cst_57 = arith.constant dense<0.000000e+00> : vector<4x32xf32>
    %172 = tpu.matmul %171, %143, %cst_57 {dimension_numbers = #tpu.dot_dimension_numbers<[1], [0], [0], [1], [0, 0, 1, 1], [], []>} : vector<4x4xf32>, vector<4x32xf32>, vector<4x32xf32> -> vector<4x32xf32>
    %173 = arith.mulf %172, %155 : vector<4x32xf32>
    %cst_58 = arith.constant dense<0.000000e+00> : vector<32xf32>
    %174 = vector.multi_reduction <add>, %173, %cst_58 [0] : vector<4x32xf32> to vector<32xf32>
    %175 = vector.shape_cast %174 : vector<32xf32> to vector<1x32xf32>
    %176 = vector.extract_strided_slice %152 {offsets = [4, 0], sizes = [4, 32], strides = [1, 1]} : vector<8x32xf32> to vector<4x32xf32>
    %177 = vector.extract_strided_slice %153 {offsets = [4, 0], sizes = [4, 32], strides = [1, 1]} : vector<8x32xf32> to vector<4x32xf32>
    %178 = vector.extract_strided_slice %147 {offsets = [1, 0], sizes = [1, 32], strides = [1, 1]} : vector<2x32xf32> to vector<1x32xf32>
    %179 = vector.broadcast %178 : vector<1x32xf32> to vector<4x32xf32>
    %180 = arith.mulf %179, %176 : vector<4x32xf32>
    %cst_59 = arith.constant dense<0.000000e+00> : vector<4x4xf32>
    %181 = tpu.matmul %180, %130, %cst_59 {dimension_numbers = #tpu.dot_dimension_numbers<[1], [0], [0], [1], [0, 0, 1, 1], [], []>} : vector<4x32xf32>, vector<32x4xf32>, vector<4x4xf32> -> vector<4x4xf32>
    %cst_60 = arith.constant 0.353553385 : f32
    %182 = vector.broadcast %cst_60 : f32 to vector<4x4xf32>
    %183 = arith.mulf %181, %182 : vector<4x4xf32>
    %cst_61 = arith.constant dense<0xFF800000> : vector<4xf32>
    %184 = vector.multi_reduction <maximumf>, %183, %cst_61 [0] : vector<4x4xf32> to vector<4xf32>
    %185 = vector.shape_cast %184 : vector<4xf32> to vector<1x4xf32>
    %186 = vector.broadcast %185 : vector<1x4xf32> to vector<4x4xf32>
    %187 = arith.subf %183, %186 : vector<4x4xf32>
    %188 = math.exp %187 : vector<4x4xf32>
    %cst_62 = arith.constant dense<0.000000e+00> : vector<4xf32>
    %189 = vector.multi_reduction <add>, %188, %cst_62 [0] : vector<4x4xf32> to vector<4xf32>
    %190 = vector.shape_cast %189 : vector<4xf32> to vector<1x4xf32>
    %191 = tpu.reciprocal %190 {approx = true} : vector<1x4xf32> -> vector<1x4xf32>
    %192 = vector.broadcast %191 : vector<1x4xf32> to vector<4x4xf32>
    %193 = arith.mulf %188, %192 : vector<4x4xf32>
    %cst_63 = arith.constant dense<0.000000e+00> : vector<4x32xf32>
    %194 = tpu.matmul %193, %143, %cst_63 {dimension_numbers = #tpu.dot_dimension_numbers<[1], [0], [0], [1], [0, 0, 1, 1], [], []>} : vector<4x4xf32>, vector<4x32xf32>, vector<4x32xf32> -> vector<4x32xf32>
    %195 = arith.mulf %194, %177 : vector<4x32xf32>
    %cst_64 = arith.constant dense<0.000000e+00> : vector<32xf32>
    %196 = vector.multi_reduction <add>, %195, %cst_64 [0] : vector<4x32xf32> to vector<32xf32>
    %197 = vector.shape_cast %196 : vector<32xf32> to vector<1x32xf32>
    %198 = tpu.concatenate %175, %197 in 0 : vector<1x32xf32>, vector<1x32xf32> -> vector<2x32xf32>
    %199 = arith.truncf %198 : vector<2x32xf32> to vector<2x32xbf16>
    %cst_65 = arith.constant dense<0.000000e+00> : vector<2x32xf32>
    %200 = tpu.matmul %199, %116, %cst_65 {dimension_numbers = #tpu.dot_dimension_numbers<[1], [0], [0], [1], [0, 0, 1, 1], [], []>} : vector<2x32xbf16>, vector<32x32xbf16>, vector<2x32xf32> -> vector<2x32xf32>
    %201 = vector.broadcast %117 : vector<1x32xf32> to vector<2x32xf32>
    %202 = arith.addf %200, %201 : vector<2x32xf32>
    %c0_66 = arith.constant 0 : index
    %c0_67 = arith.constant 0 : index
    %203 = vector.load %arg10[%c0_66, %c0_67] : memref<32x64xbf16, #tpu.memory_space<vmem>>, vector<32x64xbf16>
    %c0_68 = arith.constant 0 : index
    %c0_69 = arith.constant 0 : index
    %204 = vector.load %arg11[%c0_68, %c0_69] : memref<1x64xf32, #tpu.memory_space<vmem>>, vector<1x64xf32>
    %c0_70 = arith.constant 0 : index
    %c0_71 = arith.constant 0 : index
    %205 = vector.load %arg12[%c0_70, %c0_71] : memref<1x64xf32, #tpu.memory_space<vmem>>, vector<1x64xf32>
    %c0_72 = arith.constant 0 : index
    %c0_73 = arith.constant 0 : index
    %206 = vector.load %arg13[%c0_72, %c0_73] : memref<1x64xf32, #tpu.memory_space<vmem>>, vector<1x64xf32>
    %c0_74 = arith.constant 0 : index
    %c0_75 = arith.constant 0 : index
    %207 = vector.load %arg14[%c0_74, %c0_75] : memref<64x64xbf16, #tpu.memory_space<vmem>>, vector<64x64xbf16>
    %c0_76 = arith.constant 0 : index
    %c0_77 = arith.constant 0 : index
    %208 = vector.load %arg15[%c0_76, %c0_77] : memref<1x64xf32, #tpu.memory_space<vmem>>, vector<1x64xf32>
    %c0_78 = arith.constant 0 : index
    %c0_79 = arith.constant 0 : index
    %209 = vector.load %arg16[%c0_78, %c0_79] : memref<1x64xf32, #tpu.memory_space<vmem>>, vector<1x64xf32>
    %c0_80 = arith.constant 0 : index
    %c0_81 = arith.constant 0 : index
    %210 = vector.load %arg17[%c0_80, %c0_81] : memref<1x64xf32, #tpu.memory_space<vmem>>, vector<1x64xf32>
    %c0_82 = arith.constant 0 : index
    %c0_83 = arith.constant 0 : index
    %211 = vector.load %arg18[%c0_82, %c0_83] : memref<64x32xbf16, #tpu.memory_space<vmem>>, vector<64x32xbf16>
    %c0_84 = arith.constant 0 : index
    %c0_85 = arith.constant 0 : index
    %212 = vector.load %arg19[%c0_84, %c0_85] : memref<1x32xf32, #tpu.memory_space<vmem>>, vector<1x32xf32>
    %213 = arith.truncf %202 : vector<2x32xf32> to vector<2x32xbf16>
    %cst_86 = arith.constant dense<0.000000e+00> : vector<2x64xf32>
    %214 = tpu.matmul %213, %203, %cst_86 {dimension_numbers = #tpu.dot_dimension_numbers<[1], [0], [0], [1], [0, 0, 1, 1], [], []>} : vector<2x32xbf16>, vector<32x64xbf16>, vector<2x64xf32> -> vector<2x64xf32>
    %215 = vector.broadcast %204 : vector<1x64xf32> to vector<2x64xf32>
    %216 = arith.addf %214, %215 : vector<2x64xf32>
    %cst_87 = arith.constant dense<0.000000e+00> : vector<2xf32>
    %217 = vector.multi_reduction <add>, %216, %cst_87 [1] : vector<2x64xf32> to vector<2xf32>
    %218 = vector.shape_cast %217 : vector<2xf32> to vector<2x1xf32>
    %cst_88 = arith.constant 6.400000e+01 : f32
    %219 = vector.broadcast %cst_88 : f32 to vector<2x1xf32>
    %220 = arith.divf %218, %219 : vector<2x1xf32>
    %221 = vector.broadcast %220 : vector<2x1xf32> to vector<2x64xf32>
    %222 = arith.subf %216, %221 : vector<2x64xf32>
    %223 = arith.mulf %222, %222 : vector<2x64xf32>
    %cst_89 = arith.constant dense<0.000000e+00> : vector<2xf32>
    %224 = vector.multi_reduction <add>, %223, %cst_89 [1] : vector<2x64xf32> to vector<2xf32>
    %225 = vector.shape_cast %224 : vector<2xf32> to vector<2x1xf32>
    %cst_90 = arith.constant 6.400000e+01 : f32
    %226 = vector.broadcast %cst_90 : f32 to vector<2x1xf32>
    %227 = arith.divf %225, %226 : vector<2x1xf32>
    %cst_91 = arith.constant 9.99999974E-6 : f32
    %228 = vector.broadcast %cst_91 : f32 to vector<2x1xf32>
    %229 = arith.addf %227, %228 : vector<2x1xf32>
    %230 = math.rsqrt %229 : vector<2x1xf32>
    %231 = vector.broadcast %230 : vector<2x1xf32> to vector<2x64xf32>
    %232 = arith.mulf %222, %231 : vector<2x64xf32>
    %233 = vector.broadcast %205 : vector<1x64xf32> to vector<2x64xf32>
    %234 = arith.mulf %232, %233 : vector<2x64xf32>
    %235 = vector.broadcast %206 : vector<1x64xf32> to vector<2x64xf32>
    %236 = arith.addf %234, %235 : vector<2x64xf32>
    %237 = arith.mulf %236, %236 : vector<2x64xf32>
    %238 = arith.mulf %236, %237 : vector<2x64xf32>
    %cst_92 = arith.constant 4.471500e-02 : f32
    %239 = vector.broadcast %cst_92 : f32 to vector<2x64xf32>
    %240 = arith.mulf %239, %238 : vector<2x64xf32>
    %241 = arith.addf %236, %240 : vector<2x64xf32>
    %cst_93 = arith.constant 0.797884583 : f32
    %242 = vector.broadcast %cst_93 : f32 to vector<2x64xf32>
    %243 = arith.mulf %242, %241 : vector<2x64xf32>
    %244 = math.tanh %243 : vector<2x64xf32>
    %cst_94 = arith.constant 1.000000e+00 : f32
    %245 = vector.broadcast %cst_94 : f32 to vector<2x64xf32>
    %246 = arith.addf %245, %244 : vector<2x64xf32>
    %cst_95 = arith.constant 5.000000e-01 : f32
    %247 = vector.broadcast %cst_95 : f32 to vector<2x64xf32>
    %248 = arith.mulf %247, %246 : vector<2x64xf32>
    %249 = arith.mulf %236, %248 : vector<2x64xf32>
    %250 = arith.truncf %249 : vector<2x64xf32> to vector<2x64xbf16>
    %cst_96 = arith.constant dense<0.000000e+00> : vector<2x64xf32>
    %251 = tpu.matmul %250, %207, %cst_96 {dimension_numbers = #tpu.dot_dimension_numbers<[1], [0], [0], [1], [0, 0, 1, 1], [], []>} : vector<2x64xbf16>, vector<64x64xbf16>, vector<2x64xf32> -> vector<2x64xf32>
    %252 = vector.broadcast %208 : vector<1x64xf32> to vector<2x64xf32>
    %253 = arith.addf %251, %252 : vector<2x64xf32>
    %cst_97 = arith.constant dense<0.000000e+00> : vector<2xf32>
    %254 = vector.multi_reduction <add>, %253, %cst_97 [1] : vector<2x64xf32> to vector<2xf32>
    %255 = vector.shape_cast %254 : vector<2xf32> to vector<2x1xf32>
    %cst_98 = arith.constant 6.400000e+01 : f32
    %256 = vector.broadcast %cst_98 : f32 to vector<2x1xf32>
    %257 = arith.divf %255, %256 : vector<2x1xf32>
    %258 = vector.broadcast %257 : vector<2x1xf32> to vector<2x64xf32>
    %259 = arith.subf %253, %258 : vector<2x64xf32>
    %260 = arith.mulf %259, %259 : vector<2x64xf32>
    %cst_99 = arith.constant dense<0.000000e+00> : vector<2xf32>
    %261 = vector.multi_reduction <add>, %260, %cst_99 [1] : vector<2x64xf32> to vector<2xf32>
    %262 = vector.shape_cast %261 : vector<2xf32> to vector<2x1xf32>
    %cst_100 = arith.constant 6.400000e+01 : f32
    %263 = vector.broadcast %cst_100 : f32 to vector<2x1xf32>
    %264 = arith.divf %262, %263 : vector<2x1xf32>
    %cst_101 = arith.constant 9.99999974E-6 : f32
    %265 = vector.broadcast %cst_101 : f32 to vector<2x1xf32>
    %266 = arith.addf %264, %265 : vector<2x1xf32>
    %267 = math.rsqrt %266 : vector<2x1xf32>
    %268 = vector.broadcast %267 : vector<2x1xf32> to vector<2x64xf32>
    %269 = arith.mulf %259, %268 : vector<2x64xf32>
    %270 = vector.broadcast %209 : vector<1x64xf32> to vector<2x64xf32>
    %271 = arith.mulf %269, %270 : vector<2x64xf32>
    %272 = vector.broadcast %210 : vector<1x64xf32> to vector<2x64xf32>
    %273 = arith.addf %271, %272 : vector<2x64xf32>
    %274 = arith.mulf %273, %273 : vector<2x64xf32>
    %275 = arith.mulf %273, %274 : vector<2x64xf32>
    %cst_102 = arith.constant 4.471500e-02 : f32
    %276 = vector.broadcast %cst_102 : f32 to vector<2x64xf32>
    %277 = arith.mulf %276, %275 : vector<2x64xf32>
    %278 = arith.addf %273, %277 : vector<2x64xf32>
    %cst_103 = arith.constant 0.797884583 : f32
    %279 = vector.broadcast %cst_103 : f32 to vector<2x64xf32>
    %280 = arith.mulf %279, %278 : vector<2x64xf32>
    %281 = math.tanh %280 : vector<2x64xf32>
    %cst_104 = arith.constant 1.000000e+00 : f32
    %282 = vector.broadcast %cst_104 : f32 to vector<2x64xf32>
    %283 = arith.addf %282, %281 : vector<2x64xf32>
    %cst_105 = arith.constant 5.000000e-01 : f32
    %284 = vector.broadcast %cst_105 : f32 to vector<2x64xf32>
    %285 = arith.mulf %284, %283 : vector<2x64xf32>
    %286 = arith.mulf %273, %285 : vector<2x64xf32>
    %287 = arith.truncf %286 : vector<2x64xf32> to vector<2x64xbf16>
    %cst_106 = arith.constant dense<0.000000e+00> : vector<2x32xf32>
    %288 = tpu.matmul %287, %211, %cst_106 {dimension_numbers = #tpu.dot_dimension_numbers<[1], [0], [0], [1], [0, 0, 1, 1], [], []>} : vector<2x64xbf16>, vector<64x32xbf16>, vector<2x32xf32> -> vector<2x32xf32>
    %289 = vector.broadcast %212 : vector<1x32xf32> to vector<2x32xf32>
    %290 = arith.addf %288, %289 : vector<2x32xf32>
    %291 = arith.addf %1, %290 : vector<2x32xf32>
    %c0_107 = arith.constant 0 : index
    %c0_108 = arith.constant 0 : index
    %292 = vector.load %arg20[%c0_107, %c0_108] : memref<32x32xbf16, #tpu.memory_space<vmem>>, vector<32x32xbf16>
    %c0_109 = arith.constant 0 : index
    %c0_110 = arith.constant 0 : index
    %293 = vector.load %arg21[%c0_109, %c0_110] : memref<1x32xf32, #tpu.memory_space<vmem>>, vector<1x32xf32>
    %c0_111 = arith.constant 0 : index
    %c0_112 = arith.constant 0 : index
    %294 = vector.load %arg22[%c0_111, %c0_112] : memref<32x64xbf16, #tpu.memory_space<vmem>>, vector<32x64xbf16>
    %c0_113 = arith.constant 0 : index
    %c0_114 = arith.constant 0 : index
    %295 = vector.load %arg23[%c0_113, %c0_114] : memref<1x64xf32, #tpu.memory_space<vmem>>, vector<1x64xf32>
    %c0_115 = arith.constant 0 : index
    %c0_116 = arith.constant 0 : index
    %296 = vector.load %arg24[%c0_115, %c0_116] : memref<32x32xbf16, #tpu.memory_space<vmem>>, vector<32x32xbf16>
    %c0_117 = arith.constant 0 : index
    %c0_118 = arith.constant 0 : index
    %297 = vector.load %arg25[%c0_117, %c0_118] : memref<1x32xf32, #tpu.memory_space<vmem>>, vector<1x32xf32>
    %298 = tpu.iota {dimensions = array<i32: 0>} : vector<32x4xi32>
    %299 = tpu.iota {dimensions = array<i32: 1>} : vector<32x4xi32>
    %c8_i32_119 = arith.constant 8 : i32
    %300 = vector.broadcast %c8_i32_119 : i32 to vector<32x4xi32>
    %301 = arith.muli %299, %300 : vector<32x4xi32>
    %302 = arith.cmpi sge, %298, %301 : vector<32x4xi32>
    %c1_i32_120 = arith.constant 1 : i32
    %303 = vector.broadcast %c1_i32_120 : i32 to vector<32x4xi32>
    %304 = arith.addi %299, %303 : vector<32x4xi32>
    %c8_i32_121 = arith.constant 8 : i32
    %305 = vector.broadcast %c8_i32_121 : i32 to vector<32x4xi32>
    %306 = arith.muli %304, %305 : vector<32x4xi32>
    %307 = arith.cmpi slt, %298, %306 : vector<32x4xi32>
    %308 = arith.andi %302, %307 : vector<32x4xi1>
    %309 = arith.extui %308 : vector<32x4xi1> to vector<32x4xi32>
    %310 = arith.sitofp %309 : vector<32x4xi32> to vector<32x4xf32>
    %311 = tpu.iota {dimensions = array<i32: 0>} : vector<4x32xi32>
    %312 = tpu.iota {dimensions = array<i32: 1>} : vector<4x32xi32>
    %c8_i32_122 = arith.constant 8 : i32
    %313 = vector.broadcast %c8_i32_122 : i32 to vector<4x32xi32>
    %314 = arith.muli %311, %313 : vector<4x32xi32>
    %315 = arith.cmpi sge, %312, %314 : vector<4x32xi32>
    %c1_i32_123 = arith.constant 1 : i32
    %316 = vector.broadcast %c1_i32_123 : i32 to vector<4x32xi32>
    %317 = arith.addi %311, %316 : vector<4x32xi32>
    %c8_i32_124 = arith.constant 8 : i32
    %318 = vector.broadcast %c8_i32_124 : i32 to vector<4x32xi32>
    %319 = arith.muli %317, %318 : vector<4x32xi32>
    %320 = arith.cmpi slt, %312, %319 : vector<4x32xi32>
    %321 = arith.andi %315, %320 : vector<4x32xi1>
    %322 = arith.extui %321 : vector<4x32xi1> to vector<4x32xi32>
    %323 = arith.sitofp %322 : vector<4x32xi32> to vector<4x32xf32>
    %324 = arith.truncf %291 : vector<2x32xf32> to vector<2x32xbf16>
    %cst_125 = arith.constant dense<0.000000e+00> : vector<2x32xf32>
    %325 = tpu.matmul %324, %292, %cst_125 {dimension_numbers = #tpu.dot_dimension_numbers<[1], [0], [0], [1], [0, 0, 1, 1], [], []>} : vector<2x32xbf16>, vector<32x32xbf16>, vector<2x32xf32> -> vector<2x32xf32>
    %326 = vector.broadcast %293 : vector<1x32xf32> to vector<2x32xf32>
    %327 = arith.addf %325, %326 : vector<2x32xf32>
    %328 = arith.truncf %111 : vector<8x32xf32> to vector<8x32xbf16>
    %cst_126 = arith.constant dense<0.000000e+00> : vector<8x64xf32>
    %329 = tpu.matmul %328, %294, %cst_126 {dimension_numbers = #tpu.dot_dimension_numbers<[1], [0], [0], [1], [0, 0, 1, 1], [], []>} : vector<8x32xbf16>, vector<32x64xbf16>, vector<8x64xf32> -> vector<8x64xf32>
    %330 = vector.broadcast %295 : vector<1x64xf32> to vector<8x64xf32>
    %331 = arith.addf %329, %330 : vector<8x64xf32>
    %332 = vector.extract_strided_slice %331 {offsets = [0, 0], sizes = [8, 32], strides = [1, 1]} : vector<8x64xf32> to vector<8x32xf32>
    %333 = vector.extract_strided_slice %331 {offsets = [0, 32], sizes = [8, 32], strides = [1, 1]} : vector<8x64xf32> to vector<8x32xf32>
    %334 = vector.extract_strided_slice %332 {offsets = [0, 0], sizes = [4, 32], strides = [1, 1]} : vector<8x32xf32> to vector<4x32xf32>
    %335 = vector.extract_strided_slice %333 {offsets = [0, 0], sizes = [4, 32], strides = [1, 1]} : vector<8x32xf32> to vector<4x32xf32>
    %336 = vector.extract_strided_slice %327 {offsets = [0, 0], sizes = [1, 32], strides = [1, 1]} : vector<2x32xf32> to vector<1x32xf32>
    %337 = vector.broadcast %336 : vector<1x32xf32> to vector<4x32xf32>
    %338 = arith.mulf %337, %334 : vector<4x32xf32>
    %cst_127 = arith.constant dense<0.000000e+00> : vector<4x4xf32>
    %339 = tpu.matmul %338, %310, %cst_127 {dimension_numbers = #tpu.dot_dimension_numbers<[1], [0], [0], [1], [0, 0, 1, 1], [], []>} : vector<4x32xf32>, vector<32x4xf32>, vector<4x4xf32> -> vector<4x4xf32>
    %cst_128 = arith.constant 0.353553385 : f32
    %340 = vector.broadcast %cst_128 : f32 to vector<4x4xf32>
    %341 = arith.mulf %339, %340 : vector<4x4xf32>
    %cst_129 = arith.constant dense<0xFF800000> : vector<4xf32>
    %342 = vector.multi_reduction <maximumf>, %341, %cst_129 [0] : vector<4x4xf32> to vector<4xf32>
    %343 = vector.shape_cast %342 : vector<4xf32> to vector<1x4xf32>
    %344 = vector.broadcast %343 : vector<1x4xf32> to vector<4x4xf32>
    %345 = arith.subf %341, %344 : vector<4x4xf32>
    %346 = math.exp %345 : vector<4x4xf32>
    %cst_130 = arith.constant dense<0.000000e+00> : vector<4xf32>
    %347 = vector.multi_reduction <add>, %346, %cst_130 [0] : vector<4x4xf32> to vector<4xf32>
    %348 = vector.shape_cast %347 : vector<4xf32> to vector<1x4xf32>
    %349 = tpu.reciprocal %348 {approx = true} : vector<1x4xf32> -> vector<1x4xf32>
    %350 = vector.broadcast %349 : vector<1x4xf32> to vector<4x4xf32>
    %351 = arith.mulf %346, %350 : vector<4x4xf32>
    %cst_131 = arith.constant dense<0.000000e+00> : vector<4x32xf32>
    %352 = tpu.matmul %351, %323, %cst_131 {dimension_numbers = #tpu.dot_dimension_numbers<[1], [0], [0], [1], [0, 0, 1, 1], [], []>} : vector<4x4xf32>, vector<4x32xf32>, vector<4x32xf32> -> vector<4x32xf32>
    %353 = arith.mulf %352, %335 : vector<4x32xf32>
    %cst_132 = arith.constant dense<0.000000e+00> : vector<32xf32>
    %354 = vector.multi_reduction <add>, %353, %cst_132 [0] : vector<4x32xf32> to vector<32xf32>
    %355 = vector.shape_cast %354 : vector<32xf32> to vector<1x32xf32>
    %356 = vector.extract_strided_slice %332 {offsets = [4, 0], sizes = [4, 32], strides = [1, 1]} : vector<8x32xf32> to vector<4x32xf32>
    %357 = vector.extract_strided_slice %333 {offsets = [4, 0], sizes = [4, 32], strides = [1, 1]} : vector<8x32xf32> to vector<4x32xf32>
    %358 = vector.extract_strided_slice %327 {offsets = [1, 0], sizes = [1, 32], strides = [1, 1]} : vector<2x32xf32> to vector<1x32xf32>
    %359 = vector.broadcast %358 : vector<1x32xf32> to vector<4x32xf32>
    %360 = arith.mulf %359, %356 : vector<4x32xf32>
    %cst_133 = arith.constant dense<0.000000e+00> : vector<4x4xf32>
    %361 = tpu.matmul %360, %310, %cst_133 {dimension_numbers = #tpu.dot_dimension_numbers<[1], [0], [0], [1], [0, 0, 1, 1], [], []>} : vector<4x32xf32>, vector<32x4xf32>, vector<4x4xf32> -> vector<4x4xf32>
    %cst_134 = arith.constant 0.353553385 : f32
    %362 = vector.broadcast %cst_134 : f32 to vector<4x4xf32>
    %363 = arith.mulf %361, %362 : vector<4x4xf32>
    %cst_135 = arith.constant dense<0xFF800000> : vector<4xf32>
    %364 = vector.multi_reduction <maximumf>, %363, %cst_135 [0] : vector<4x4xf32> to vector<4xf32>
    %365 = vector.shape_cast %364 : vector<4xf32> to vector<1x4xf32>
    %366 = vector.broadcast %365 : vector<1x4xf32> to vector<4x4xf32>
    %367 = arith.subf %363, %366 : vector<4x4xf32>
    %368 = math.exp %367 : vector<4x4xf32>
    %cst_136 = arith.constant dense<0.000000e+00> : vector<4xf32>
    %369 = vector.multi_reduction <add>, %368, %cst_136 [0] : vector<4x4xf32> to vector<4xf32>
    %370 = vector.shape_cast %369 : vector<4xf32> to vector<1x4xf32>
    %371 = tpu.reciprocal %370 {approx = true} : vector<1x4xf32> -> vector<1x4xf32>
    %372 = vector.broadcast %371 : vector<1x4xf32> to vector<4x4xf32>
    %373 = arith.mulf %368, %372 : vector<4x4xf32>
    %cst_137 = arith.constant dense<0.000000e+00> : vector<4x32xf32>
    %374 = tpu.matmul %373, %323, %cst_137 {dimension_numbers = #tpu.dot_dimension_numbers<[1], [0], [0], [1], [0, 0, 1, 1], [], []>} : vector<4x4xf32>, vector<4x32xf32>, vector<4x32xf32> -> vector<4x32xf32>
    %375 = arith.mulf %374, %357 : vector<4x32xf32>
    %cst_138 = arith.constant dense<0.000000e+00> : vector<32xf32>
    %376 = vector.multi_reduction <add>, %375, %cst_138 [0] : vector<4x32xf32> to vector<32xf32>
    %377 = vector.shape_cast %376 : vector<32xf32> to vector<1x32xf32>
    %378 = tpu.concatenate %355, %377 in 0 : vector<1x32xf32>, vector<1x32xf32> -> vector<2x32xf32>
    %379 = arith.truncf %378 : vector<2x32xf32> to vector<2x32xbf16>
    %cst_139 = arith.constant dense<0.000000e+00> : vector<2x32xf32>
    %380 = tpu.matmul %379, %296, %cst_139 {dimension_numbers = #tpu.dot_dimension_numbers<[1], [0], [0], [1], [0, 0, 1, 1], [], []>} : vector<2x32xbf16>, vector<32x32xbf16>, vector<2x32xf32> -> vector<2x32xf32>
    %381 = vector.broadcast %297 : vector<1x32xf32> to vector<2x32xf32>
    %382 = arith.addf %380, %381 : vector<2x32xf32>
    %c0_140 = arith.constant 0 : index
    %c0_141 = arith.constant 0 : index
    %383 = vector.load %arg26[%c0_140, %c0_141] : memref<32x64xbf16, #tpu.memory_space<vmem>>, vector<32x64xbf16>
    %c0_142 = arith.constant 0 : index
    %c0_143 = arith.constant 0 : index
    %384 = vector.load %arg27[%c0_142, %c0_143] : memref<1x64xf32, #tpu.memory_space<vmem>>, vector<1x64xf32>
    %c0_144 = arith.constant 0 : index
    %c0_145 = arith.constant 0 : index
    %385 = vector.load %arg28[%c0_144, %c0_145] : memref<1x64xf32, #tpu.memory_space<vmem>>, vector<1x64xf32>
    %c0_146 = arith.constant 0 : index
    %c0_147 = arith.constant 0 : index
    %386 = vector.load %arg29[%c0_146, %c0_147] : memref<1x64xf32, #tpu.memory_space<vmem>>, vector<1x64xf32>
    %c0_148 = arith.constant 0 : index
    %c0_149 = arith.constant 0 : index
    %387 = vector.load %arg30[%c0_148, %c0_149] : memref<64x64xbf16, #tpu.memory_space<vmem>>, vector<64x64xbf16>
    %c0_150 = arith.constant 0 : index
    %c0_151 = arith.constant 0 : index
    %388 = vector.load %arg31[%c0_150, %c0_151] : memref<1x64xf32, #tpu.memory_space<vmem>>, vector<1x64xf32>
    %c0_152 = arith.constant 0 : index
    %c0_153 = arith.constant 0 : index
    %389 = vector.load %arg32[%c0_152, %c0_153] : memref<1x64xf32, #tpu.memory_space<vmem>>, vector<1x64xf32>
    %c0_154 = arith.constant 0 : index
    %c0_155 = arith.constant 0 : index
    %390 = vector.load %arg33[%c0_154, %c0_155] : memref<1x64xf32, #tpu.memory_space<vmem>>, vector<1x64xf32>
    %c0_156 = arith.constant 0 : index
    %c0_157 = arith.constant 0 : index
    %391 = vector.load %arg34[%c0_156, %c0_157] : memref<64x32xbf16, #tpu.memory_space<vmem>>, vector<64x32xbf16>
    %c0_158 = arith.constant 0 : index
    %c0_159 = arith.constant 0 : index
    %392 = vector.load %arg35[%c0_158, %c0_159] : memref<1x32xf32, #tpu.memory_space<vmem>>, vector<1x32xf32>
    %393 = arith.truncf %382 : vector<2x32xf32> to vector<2x32xbf16>
    %cst_160 = arith.constant dense<0.000000e+00> : vector<2x64xf32>
    %394 = tpu.matmul %393, %383, %cst_160 {dimension_numbers = #tpu.dot_dimension_numbers<[1], [0], [0], [1], [0, 0, 1, 1], [], []>} : vector<2x32xbf16>, vector<32x64xbf16>, vector<2x64xf32> -> vector<2x64xf32>
    %395 = vector.broadcast %384 : vector<1x64xf32> to vector<2x64xf32>
    %396 = arith.addf %394, %395 : vector<2x64xf32>
    %cst_161 = arith.constant dense<0.000000e+00> : vector<2xf32>
    %397 = vector.multi_reduction <add>, %396, %cst_161 [1] : vector<2x64xf32> to vector<2xf32>
    %398 = vector.shape_cast %397 : vector<2xf32> to vector<2x1xf32>
    %cst_162 = arith.constant 6.400000e+01 : f32
    %399 = vector.broadcast %cst_162 : f32 to vector<2x1xf32>
    %400 = arith.divf %398, %399 : vector<2x1xf32>
    %401 = vector.broadcast %400 : vector<2x1xf32> to vector<2x64xf32>
    %402 = arith.subf %396, %401 : vector<2x64xf32>
    %403 = arith.mulf %402, %402 : vector<2x64xf32>
    %cst_163 = arith.constant dense<0.000000e+00> : vector<2xf32>
    %404 = vector.multi_reduction <add>, %403, %cst_163 [1] : vector<2x64xf32> to vector<2xf32>
    %405 = vector.shape_cast %404 : vector<2xf32> to vector<2x1xf32>
    %cst_164 = arith.constant 6.400000e+01 : f32
    %406 = vector.broadcast %cst_164 : f32 to vector<2x1xf32>
    %407 = arith.divf %405, %406 : vector<2x1xf32>
    %cst_165 = arith.constant 9.99999974E-6 : f32
    %408 = vector.broadcast %cst_165 : f32 to vector<2x1xf32>
    %409 = arith.addf %407, %408 : vector<2x1xf32>
    %410 = math.rsqrt %409 : vector<2x1xf32>
    %411 = vector.broadcast %410 : vector<2x1xf32> to vector<2x64xf32>
    %412 = arith.mulf %402, %411 : vector<2x64xf32>
    %413 = vector.broadcast %385 : vector<1x64xf32> to vector<2x64xf32>
    %414 = arith.mulf %412, %413 : vector<2x64xf32>
    %415 = vector.broadcast %386 : vector<1x64xf32> to vector<2x64xf32>
    %416 = arith.addf %414, %415 : vector<2x64xf32>
    %417 = arith.mulf %416, %416 : vector<2x64xf32>
    %418 = arith.mulf %416, %417 : vector<2x64xf32>
    %cst_166 = arith.constant 4.471500e-02 : f32
    %419 = vector.broadcast %cst_166 : f32 to vector<2x64xf32>
    %420 = arith.mulf %419, %418 : vector<2x64xf32>
    %421 = arith.addf %416, %420 : vector<2x64xf32>
    %cst_167 = arith.constant 0.797884583 : f32
    %422 = vector.broadcast %cst_167 : f32 to vector<2x64xf32>
    %423 = arith.mulf %422, %421 : vector<2x64xf32>
    %424 = math.tanh %423 : vector<2x64xf32>
    %cst_168 = arith.constant 1.000000e+00 : f32
    %425 = vector.broadcast %cst_168 : f32 to vector<2x64xf32>
    %426 = arith.addf %425, %424 : vector<2x64xf32>
    %cst_169 = arith.constant 5.000000e-01 : f32
    %427 = vector.broadcast %cst_169 : f32 to vector<2x64xf32>
    %428 = arith.mulf %427, %426 : vector<2x64xf32>
    %429 = arith.mulf %416, %428 : vector<2x64xf32>
    %430 = arith.truncf %429 : vector<2x64xf32> to vector<2x64xbf16>
    %cst_170 = arith.constant dense<0.000000e+00> : vector<2x64xf32>
    %431 = tpu.matmul %430, %387, %cst_170 {dimension_numbers = #tpu.dot_dimension_numbers<[1], [0], [0], [1], [0, 0, 1, 1], [], []>} : vector<2x64xbf16>, vector<64x64xbf16>, vector<2x64xf32> -> vector<2x64xf32>
    %432 = vector.broadcast %388 : vector<1x64xf32> to vector<2x64xf32>
    %433 = arith.addf %431, %432 : vector<2x64xf32>
    %cst_171 = arith.constant dense<0.000000e+00> : vector<2xf32>
    %434 = vector.multi_reduction <add>, %433, %cst_171 [1] : vector<2x64xf32> to vector<2xf32>
    %435 = vector.shape_cast %434 : vector<2xf32> to vector<2x1xf32>
    %cst_172 = arith.constant 6.400000e+01 : f32
    %436 = vector.broadcast %cst_172 : f32 to vector<2x1xf32>
    %437 = arith.divf %435, %436 : vector<2x1xf32>
    %438 = vector.broadcast %437 : vector<2x1xf32> to vector<2x64xf32>
    %439 = arith.subf %433, %438 : vector<2x64xf32>
    %440 = arith.mulf %439, %439 : vector<2x64xf32>
    %cst_173 = arith.constant dense<0.000000e+00> : vector<2xf32>
    %441 = vector.multi_reduction <add>, %440, %cst_173 [1] : vector<2x64xf32> to vector<2xf32>
    %442 = vector.shape_cast %441 : vector<2xf32> to vector<2x1xf32>
    %cst_174 = arith.constant 6.400000e+01 : f32
    %443 = vector.broadcast %cst_174 : f32 to vector<2x1xf32>
    %444 = arith.divf %442, %443 : vector<2x1xf32>
    %cst_175 = arith.constant 9.99999974E-6 : f32
    %445 = vector.broadcast %cst_175 : f32 to vector<2x1xf32>
    %446 = arith.addf %444, %445 : vector<2x1xf32>
    %447 = math.rsqrt %446 : vector<2x1xf32>
    %448 = vector.broadcast %447 : vector<2x1xf32> to vector<2x64xf32>
    %449 = arith.mulf %439, %448 : vector<2x64xf32>
    %450 = vector.broadcast %389 : vector<1x64xf32> to vector<2x64xf32>
    %451 = arith.mulf %449, %450 : vector<2x64xf32>
    %452 = vector.broadcast %390 : vector<1x64xf32> to vector<2x64xf32>
    %453 = arith.addf %451, %452 : vector<2x64xf32>
    %454 = arith.mulf %453, %453 : vector<2x64xf32>
    %455 = arith.mulf %453, %454 : vector<2x64xf32>
    %cst_176 = arith.constant 4.471500e-02 : f32
    %456 = vector.broadcast %cst_176 : f32 to vector<2x64xf32>
    %457 = arith.mulf %456, %455 : vector<2x64xf32>
    %458 = arith.addf %453, %457 : vector<2x64xf32>
    %cst_177 = arith.constant 0.797884583 : f32
    %459 = vector.broadcast %cst_177 : f32 to vector<2x64xf32>
    %460 = arith.mulf %459, %458 : vector<2x64xf32>
    %461 = math.tanh %460 : vector<2x64xf32>
    %cst_178 = arith.constant 1.000000e+00 : f32
    %462 = vector.broadcast %cst_178 : f32 to vector<2x64xf32>
    %463 = arith.addf %462, %461 : vector<2x64xf32>
    %cst_179 = arith.constant 5.000000e-01 : f32
    %464 = vector.broadcast %cst_179 : f32 to vector<2x64xf32>
    %465 = arith.mulf %464, %463 : vector<2x64xf32>
    %466 = arith.mulf %453, %465 : vector<2x64xf32>
    %467 = arith.truncf %466 : vector<2x64xf32> to vector<2x64xbf16>
    %cst_180 = arith.constant dense<0.000000e+00> : vector<2x32xf32>
    %468 = tpu.matmul %467, %391, %cst_180 {dimension_numbers = #tpu.dot_dimension_numbers<[1], [0], [0], [1], [0, 0, 1, 1], [], []>} : vector<2x64xbf16>, vector<64x32xbf16>, vector<2x32xf32> -> vector<2x32xf32>
    %469 = vector.broadcast %392 : vector<1x32xf32> to vector<2x32xf32>
    %470 = arith.addf %468, %469 : vector<2x32xf32>
    %471 = arith.addf %291, %470 : vector<2x32xf32>
    %c0_181 = arith.constant 0 : index
    %c0_182 = arith.constant 0 : index
    %472 = vector.load %arg36[%c0_181, %c0_182] : memref<2x32xf32, #tpu.memory_space<vmem>>, vector<2x32xf32>
    tpu.vector_store %arg36[%c0_181, %c0_182], %471 {strides = array<i32>} : memref<2x32xf32, #tpu.memory_space<vmem>>, vector<2x32xf32>,
    return
  }
}

</mosaic_0001>

<bundles_post_ra>
// kernel: extra_modal_modeling_forward.4
= control target key start
LH: loop header
LB: loop body
LE: loop exit
PB: predicated region body
PF: predicated region fallthrough
CT: control target
= control target key end

     0   :  { %v503_v0 = vmov 0.0   ;;  %vm504_vm0 = vmmov 0   ;;  %vm87_vm1 = vcmask 261120   ;;  %vm132_vm2 = vcmask 523264   ;;  %s654_s1 = inlined_call_operand.vmem [shape: bf16[32,64], index: 1, kind: input, shape index: {}]   ;;  %s655_s0 = inlined_call_operand.vmem [shape: f32[16,32], index: 0, kind: input, shape index: {}]   ;;  %s656_s2 = inlined_call_operand.vmem [shape: f32[1,64], index: 2, kind: input, shape index: {}]   ;;  %s657_s5 = inlined_call_operand.vmem [shape: bf16[64,64], index: 5, kind: input, shape index: {}]   ;;  %s658_s3 = inlined_call_operand.vmem [shape: f32[1,64], index: 3, kind: input, shape index: {}]   ;;  %s659_s4 = inlined_call_operand.vmem [shape: f32[1,64], index: 4, kind: input, shape index: {}]   ;;  %s660_s6 = inlined_call_operand.vmem [shape: f32[1,64], index: 6, kind: input, shape index: {}]   ;;  %s661_s9 = inlined_call_operand.vmem [shape: bf16[64,32], index: 9, kind: input, shape index: {}]   ;;  %s662_s7 = inlined_call_operand.vmem [shape: f32[1,64], index: 7, kind: input, shape index: {}]   ;;  %s663_s8 = inlined_call_operand.vmem [shape: f32[1,64], index: 8, kind: input, shape index: {}]   ;;  %s664_s10 = inlined_call_operand.vmem [shape: f32[1,32], index: 10, kind: input, shape index: {}]   ;;  %s665_s11 = inlined_call_operand.vmem [shape: f32[16,32], index: 11, kind: output, shape index: {}]  }
   0x1   :  { %443 = vmatprep.subr.bf16.mxu0 %v503_v0  ;;  %v477_v1 = vld [vmem:[%s654_s1] sm:$0xff]   ;;  %447 = vmatprep.mubr.msk.bf16.mxu0 %vm504_vm0, %v503_v0  ;;  %v478_v2 = vld [vmem:[%s654_s1 + $0x8] sm:$0xff]   ;;  %v481_v27 = vld [vmem:[%s657_s5 + $0x10] sm:$0xff]  }
   0x2   :  { %451 = vmatprep.subr.bf16.mxu1 %v503_v0  ;;  %459 = vmatprep.mubr.msk.bf16.mxu1 %vm504_vm0, %v503_v0  ;;  %v39_v3 = vld [vmem:[%s655_s0] sm:$0xff]  ;;  %v40_v4 = vld [vmem:[%s655_s0 + $0x8] sm:$0xff]  ;;  %v482_v28 = vld [vmem:[%s657_s5 + $0x18] sm:$0xff]  }
   0x3   :  { %444 = vmatpush3.bf16.msra.mxu0 %v477_v1  ;;  %v68_v5 = vpack.c.bf16 %v40_v4, %v39_v3  ;;  %v410_v6 = vld [vmem:[%s656_s2] ss:$0 sm:$0xff]  ;;  %v480_v26 = vld [vmem:[%s657_s5 + $0x8] sm:$0xff]  }
   0x4   :  { %445 = vmatprep.subr.bf16.mxu0 %v503_v0  ;;  %v479_v25 = vld [vmem:[%s657_s5] sm:$0xff]  }
   0x5   :  { %452 = vmatpush3.bf16.msra.mxu1 %v479_v25  ;;  %v414_v36 = vld [vmem:[%s658_s3] ss:$0 sm:$0xff] }
   0x6   :  { %453 = vmatprep.subr.bf16.mxu1 %v503_v0  ;;  %v415_v38 = vld [vmem:[%s659_s4] ss:$0 sm:$0xff] }
   0x7   :  { %446 = vmatpush3.bf16.msra.mxu0 %v478_v2  ;;  %v416_v1 = vld [vmem:[%s660_s6] ss:$0 sm:$0xff] }
   0x8   :  { %463 = vmatprep.subr.bf16.mxu0 %v503_v0 }
   0x9   :  { %454 = vmatpush3.bf16.msra.mxu1 %v480_v26 }
   0xa   :  { %448 = vmatmul.mubr.msk.bf16.vlgmr.msra.gmra.mrb[0].mxu0 %vm87_vm1, %v68_v5  ;;  %455 = vmatprep.subr.bf16.mxu1 %v503_v0 }
   0xb   :  { %471 = vmatprep.mubr.msk.bf16.mxu0 %vm504_vm0, %v503_v0 }
   0xd   :  { %456 = vmatpush3.bf16.msra.mxu1 %v481_v27 }
   0xe   :  { %457 = vmatprep.subr.bf16.mxu1 %v503_v0 }
  0x11   :  { %458 = vmatpush3.bf16.msra.mxu1 %v482_v28 }
  0xdd   :  { %v125_v7 = vpop.f32.mrb[0].mxu0 }
  0xde   :  { %v126_v8 = vadd.f32 %v410_v6, %v125_v7  ;;  %v449_v9 = vpop.f32.mrb[1].mxu0 }
  0xdf   :  { %v128_v10 = vpop.f32.mrb[2].mxu0 }
  0xe0   :  { %v129_v11 = vadd.f32 %v410_v6, %v128_v10  ;;  %v450_v12 = vpop.f32.mrb[3].mxu0  ;;  %v133_v13 = vsel %vm132_vm2, %v126_v8, 0.0 }
  0xe1   :  { %134 = vadd.xlane.f32.xlu0 %v133_v13 }
  0xe2   :  { %v136_v14 = vsel %vm132_vm2, %v129_v11, 0.0 }
  0xe5   :  { %137 = vadd.xlane.f32.xlu0 %v136_v14 }
 0x16e   :  { %v135_v15 = vpop.xlane.xlu0 %134 }
 0x16f   :  { %v140_v16 = vmul.f32 0.015625, %v135_v15 }
 0x171   :  { %v142_v17 = vsub.f32 %v126_v8, %v140_v16 }
 0x172   :  { %v138_v18 = vpop.xlane.xlu0 %137 }
 0x173   :  { %v141_v19 = vmul.f32 0.015625, %v138_v18  ;;  %v144_v20 = vmul.f32 %v142_v17, %v142_v17 }
 0x175   :  { %v143_v21 = vsub.f32 %v129_v11, %v141_v19  ;;  %v146_v22 = vsel %vm132_vm2, %v144_v20, 0.0  ;;  %v483_v20 = vld [vmem:[%s661_s9] sm:$0xff]  }
 0x176   :  { %147 = vadd.xlane.f32.xlu1 %v146_v22  ;;  %464 = vmatpush3.bf16.msra.mxu0 %v483_v20  ;;  %v485_v22 = vld [vmem:[%s661_s9 + $0x10] sm:$0xff]  }
 0x177   :  { %v145_v23 = vmul.f32 %v143_v21, %v143_v21  ;;  %465 = vmatprep.subr.bf16.mxu0 %v503_v0 }
 0x179   :  { %v149_v24 = vsel %vm132_vm2, %v145_v23, 0.0  ;;  %v486_v23 = vld [vmem:[%s661_s9 + $0x18] sm:$0xff]  }
 0x17a   :  { %150 = vadd.xlane.f32.xlu1 %v149_v24 }
 0x203   :  { %v148_v29 = vpop.xlane.xlu1 %147 }
 0x204   :  { %v152_v30 = vmul.f32 0.015625, %v148_v29 }
 0x206   :  { %v154_v31 = vadd.f32 1e-05, %v152_v30 }
 0x207   :  { %v151_v32 = vpop.xlane.xlu1 %150 }
 0x208   :  { %487 = vrsqrt.f32 %v154_v31  ;;  %v153_v33 = vmul.f32 0.015625, %v151_v32  ;;  %v422_v31 = vld [vmem:[%s662_s7] ss:$0 sm:$0xff] }
 0x20a   :  { %v155_v34 = vadd.f32 1e-05, %v153_v33 }
 0x20c   :  { %489 = vrsqrt.f32 %v155_v34 }
 0x212   :  { %v488_v35 = vpop.eup %487 }
 0x213   :  { %v158_v37 = vmul.f32 %v488_v35, %v142_v17 }
 0x215   :  { %v166_v39 = vmul.f32 %v414_v36, %v158_v37 }
 0x216   :  { %v490_v40 = vpop.eup %489 }
 0x217   :  { %v174_v41 = vadd.f32 %v415_v38, %v166_v39  ;;  %v159_v42 = vmul.f32 %v490_v40, %v143_v21  ;;  %v484_v21 = vld [vmem:[%s661_s9 + $0x8] sm:$0xff]  }
 0x218   :  { %466 = vmatpush3.bf16.msra.mxu0 %v484_v21 }
 0x219   :  { %v167_v43 = vmul.f32 %v414_v36, %v159_v42  ;;  %v176_v44 = vmul.f32 %v174_v41, %v174_v41  ;;  %467 = vmatprep.subr.bf16.mxu0 %v503_v0 }
 0x21b   :  { %v175_v45 = vadd.f32 %v415_v38, %v167_v43  ;;  %v178_v46 = vmul.f32 %v176_v44, %v174_v41 }
 0x21c   :  { %468 = vmatpush3.bf16.msra.mxu0 %v485_v22 }
 0x21d   :  { %v177_v47 = vmul.f32 %v175_v45, %v175_v45  ;;  %v180_v48 = vmul.f32 0.044715, %v178_v46  ;;  %469 = vmatprep.subr.bf16.mxu0 %v503_v0  ;;  %v423_v0 = vld [vmem:[%s663_s8] ss:$0 sm:$0xff] }
 0x21f   :  { %v179_v49 = vmul.f32 %v177_v47, %v175_v45  ;;  %v182_v50 = vadd.f32 %v180_v48, %v174_v41 }
 0x220   :  { %470 = vmatpush3.bf16.msra.mxu0 %v486_v23 }
 0x221   :  { %v181_v51 = vmul.f32 0.044715, %v179_v49  ;;  %v184_v52 = vmul.f32 0.7978846, %v182_v50 }
 0x223   :  { %v183_v53 = vadd.f32 %v181_v51, %v175_v45  ;;  %491 = vtanh.f32 %v184_v52 }
 0x225   :  { %v185_v54 = vmul.f32 0.7978846, %v183_v53 }
 0x227   :  { %493 = vtanh.f32 %v185_v54 }
 0x22d   :  { %v492_v55 = vpop.eup %491 }
 0x22e   :  { %v188_v56 = vadd.f32 1.0, %v492_v55 }
 0x230   :  { %v190_v59 = vmul.f32 0.5, %v188_v56 }
 0x231   :  { %v494_v57 = vpop.eup %493 }
 0x232   :  { %v189_v58 = vadd.f32 1.0, %v494_v57  ;;  %v192_v61 = vmul.f32 %v190_v59, %v174_v41 }
 0x234   :  { %v191_v60 = vmul.f32 0.5, %v189_v58  ;;  %v424_v58 = vld [vmem:[%s664_s10] ss:$0 sm:$0xff] }
 0x236   :  { %v193_v62 = vmul.f32 %v191_v60, %v175_v45 }
 0x238   :  { %v194_v63 = vpack.c.bf16 %v193_v62, %v192_v61 }
 0x23a   :  { %460 = vmatmul.mubr.msk.bf16.vlgmr.msra.gmra.mrb[0].mxu1 %vm132_vm2, %v194_v63 }
 0x30d   :  { %v262_v2 = vpop.f32.mrb[0].mxu1 }
 0x30e   :  { %v263_v3 = vadd.f32 %v416_v1, %v262_v2  ;;  %v461_v4 = vpop.f32.mrb[1].mxu1 }
 0x30f   :  { %v265_v5 = vpop.f32.mrb[2].mxu1 }
 0x310   :  { %v266_v6 = vadd.f32 %v416_v1, %v265_v5  ;;  %v462_v7 = vpop.f32.mrb[3].mxu1  ;;  %v269_v8 = vsel %vm132_vm2, %v263_v3, 0.0 }
 0x311   :  { %270 = vadd.xlane.f32.xlu0 %v269_v8 }
 0x312   :  { %v272_v9 = vsel %vm132_vm2, %v266_v6, 0.0 }
 0x313   :  { %273 = vadd.xlane.f32.xlu1 %v272_v9 }
 0x39e   :  { %v271_v10 = vpop.xlane.xlu0 %270 }
 0x39f   :  { %v275_v11 = vmul.f32 0.015625, %v271_v10 }
 0x3a0   :  { %v274_v12 = vpop.xlane.xlu1 %273 }
 0x3a1   :  { %v277_v13 = vsub.f32 %v263_v3, %v275_v11  ;;  %v276_v14 = vmul.f32 0.015625, %v274_v12 }
 0x3a3   :  { %v278_v15 = vsub.f32 %v266_v6, %v276_v14  ;;  %v279_v16 = vmul.f32 %v277_v13, %v277_v13 }
 0x3a5   :  { %v281_v17 = vsel %vm132_vm2, %v279_v16, 0.0  ;;  %v280_v18 = vmul.f32 %v278_v15, %v278_v15 }
 0x3a6   :  { %282 = vadd.xlane.f32.xlu0 %v281_v17 }
 0x3a7   :  { %v284_v19 = vsel %vm132_vm2, %v280_v18, 0.0 }
 0x3a8   :  { %285 = vadd.xlane.f32.xlu1 %v284_v19 }
 0x433   :  { %v283_v24 = vpop.xlane.xlu0 %282 }
 0x434   :  { %v287_v25 = vmul.f32 0.015625, %v283_v24 }
 0x435   :  { %v286_v26 = vpop.xlane.xlu1 %285 }
 0x436   :  { %v289_v27 = vadd.f32 1e-05, %v287_v25  ;;  %v288_v28 = vmul.f32 0.015625, %v286_v26 }
 0x438   :  { %495 = vrsqrt.f32 %v289_v27  ;;  %v290_v29 = vadd.f32 1e-05, %v288_v28 }
 0x43a   :  { %497 = vrsqrt.f32 %v290_v29 }
 0x442   :  { %v496_v30 = vpop.eup %495 }
 0x443   :  { %v293_v32 = vmul.f32 %v496_v30, %v277_v13 }
 0x444   :  { %v498_v33 = vpop.eup %497 }
 0x445   :  { %v301_v34 = vmul.f32 %v422_v31, %v293_v32  ;;  %v294_v35 = vmul.f32 %v498_v33, %v278_v15 }
 0x447   :  { %v309_v36 = vadd.f32 %v423_v0, %v301_v34  ;;  %v302_v37 = vmul.f32 %v422_v31, %v294_v35 }
 0x449   :  { %v311_v38 = vmul.f32 %v309_v36, %v309_v36  ;;  %v310_v39 = vadd.f32 %v423_v0, %v302_v37 }
 0x44b   :  { %v312_v40 = vmul.f32 %v310_v39, %v310_v39  ;;  %v313_v41 = vmul.f32 %v311_v38, %v309_v36 }
 0x44d   :  { %v314_v42 = vmul.f32 %v312_v40, %v310_v39  ;;  %v315_v43 = vmul.f32 0.044715, %v313_v41 }
 0x44f   :  { %v316_v44 = vmul.f32 0.044715, %v314_v42  ;;  %v317_v45 = vadd.f32 %v315_v43, %v309_v36 }
 0x451   :  { %v318_v46 = vadd.f32 %v316_v44, %v310_v39  ;;  %v319_v47 = vmul.f32 0.7978846, %v317_v45 }
 0x453   :  { %v320_v48 = vmul.f32 0.7978846, %v318_v46  ;;  %499 = vtanh.f32 %v319_v47 }
 0x455   :  { %501 = vtanh.f32 %v320_v48 }
 0x45d   :  { %v500_v49 = vpop.eup %499 }
 0x45e   :  { %v323_v50 = vadd.f32 1.0, %v500_v49 }
 0x45f   :  { %v502_v51 = vpop.eup %501 }
 0x460   :  { %v324_v52 = vadd.f32 1.0, %v502_v51  ;;  %v325_v53 = vmul.f32 0.5, %v323_v50 }
 0x462   :  { %v326_v54 = vmul.f32 0.5, %v324_v52  ;;  %v327_v55 = vmul.f32 %v325_v53, %v309_v36 }
 0x464   :  { %v328_v56 = vmul.f32 %v326_v54, %v310_v39 }
 0x466   :  { %v329_v57 = vpack.c.bf16 %v328_v56, %v327_v55 }
 0x468   :  { %472 = vmatmul.mubr.msk.bf16.vlgmr.msra.gmra.mrb[4].mxu0 %vm132_vm2, %v329_v57 }
 0x53b   :  { %v397_v59 = vpop.f32.mrb[4].mxu0 }
 0x53c   :  { %v398_v60 = vadd.f32 %v424_v58, %v397_v59  ;;  %v473_v61 = vpop.f32.mrb[5].mxu0 }
 0x53d   :  { %v400_v62 = vpop.f32.mrb[6].mxu0 }
 0x53e   :  { %404 = vst.msk [vmem:[%s665_s11] sm:$0xff] %vm87_vm1, %v398_v60  ;;  %v401_v63 = vadd.f32 %v424_v58, %v400_v62  ;;  %v474_v1 = vpop.f32.mrb[7].mxu0 }
 0x540   :  { %405 = vst.msk [vmem:[%s665_s11 + $0x8] sm:$0xff] %vm87_vm1, %v401_v63 }

// kernel: extra_modal_modeling_forward.6
= control target key start
LH: loop header
LB: loop body
LE: loop exit
PB: predicated region body
PF: predicated region fallthrough
CT: control target
= control target key end

     0   :  { %s3057_s6 = smov 1   ;;  %s3058_s10 = smov 2   ;;  %s3869_s0 = inlined_call_operand.smem [shape: u32[36], index: -1, kind: input, shape index: {}] }
   0x1   :  { %s3109_s5 = sld [smem:[%s3869_s0]]   ;;  %s3059_s14 = smov 3  }
   0x2   :  { %s3114_s9 = sld [smem:[%s3869_s0 + %s3057_s6]]   ;;  %s3060_s18 = smov 4  }
   0x3   :  { %s3119_s13 = sld [smem:[%s3869_s0 + %s3058_s10]]   ;;  %s3061_s22 = smov 5  }
   0x4   :  { %s3124_s17 = sld [smem:[%s3869_s0 + %s3059_s14]]   ;;  %s3062_s26 = smov 6  }
   0x5   :  { %s3129_s21 = sld [smem:[%s3869_s0 + %s3060_s18]]   ;;  %s3063_s30 = smov 7  }
   0x6   :  { %s3134_s25 = sld [smem:[%s3869_s0 + %s3061_s22]]   ;;  %s3064_s4 = smov 8  }
   0x7   :  { %3877 = sst [smem:[#allocation5_spill]] %s3109_s5  ;;  %s3065_s10 = smov 9  }
   0x8   :  { %s3139_s29 = sld [smem:[%s3869_s0 + %s3062_s26]]   ;;  %s3066_s15 = smov 10  }
   0x9   :  { %s3144_s3 = sld [smem:[%s3869_s0 + %s3063_s30]]   ;;  %s3067_s20 = smov 11  }
   0xa   :  { %s3149_s8 = sld [smem:[%s3869_s0 + %s3064_s4]]   ;;  %s3068_s26 = smov 12  }
   0xb   :  { %s3154_s14 = sld [smem:[%s3869_s0 + %s3065_s10]]   ;;  %s3069_s1 = smov 13  }
   0xc   :  { %s3159_s19 = sld [smem:[%s3869_s0 + %s3066_s15]]   ;;  %s3070_s7 = smov 14  }
   0xd   :  { %s3164_s24 = sld [smem:[%s3869_s0 + %s3067_s20]]   ;;  %s3071_s15 = smov 15  }
   0xe   :  { %s3169_s30 = sld [smem:[%s3869_s0 + %s3068_s26]]   ;;  %s3072_s22 = smov 16  }
   0xf   :  { %s3174_s6 = sld [smem:[%s3869_s0 + %s3069_s1]]   ;;  %s3073_s28 = smov 17  }
  0x10   :  { %s3179_s12 = sld [smem:[%s3869_s0 + %s3070_s7]]   ;;  %s3074_s7 = smov 18  }
  0x11   :  { %s3184_s20 = sld [smem:[%s3869_s0 + %s3071_s15]]   ;;  %s3075_s15 = smov 19  }
  0x12   :  { %3878 = sst [smem:[#allocation6_spill]] %s3159_s19 }
  0x13   :  { %s3189_s27 = sld [smem:[%s3869_s0 + %s3072_s22]]   ;;  %s3076_s22 = smov 20  }
  0x14   :  { %s3194_s4 = sld [smem:[%s3869_s0 + %s3073_s28]]   ;;  %s3077_s28 = smov 21  }
  0x15   :  { %s3199_s5 = sld [smem:[%s3869_s0 + %s3074_s7]]   ;;  %s3078_s7 = smov 22  }
  0x16   :  { %s3214_s19 = sld [smem:[%s3869_s0 + %s3077_s28]]   ;;  %s3081_s28 = smov 25  }
  0x17   :  { %3879 = sst [smem:[#allocation7_spill]] %s3184_s20 }
  0x18   :  { %s3204_s20 = sld [smem:[%s3869_s0 + %s3075_s15]]   ;;  %s3079_s15 = smov 23  }
  0x19   :  { %3880 = sst [smem:[#allocation8_spill]] %s3189_s27 }
  0x1a   :  { %s3209_s27 = sld [smem:[%s3869_s0 + %s3076_s22]]   ;;  %s3080_s22 = smov 24  }
  0x1b   :  { %3881 = sst [smem:[#allocation9_spill]] %s3199_s5 }
  0x1c   :  { %3884 = sst [smem:[#allocation12_spill]] %s3214_s19 }
  0x1d   :  { %s3219_s5 = sld [smem:[%s3869_s0 + %s3078_s7]]   ;;  %s3082_s7 = smov 26  }
  0x1e   :  { %3882 = sst [smem:[#allocation10_spill]] %s3204_s20 }
  0x1f   :  { %s3224_s20 = sld [smem:[%s3869_s0 + %s3079_s15]]   ;;  %s3083_s15 = smov 27  }
  0x20   :  { %3883 = sst [smem:[#allocation11_spill]] %s3209_s27 }
  0x21   :  { %s3229_s27 = sld [smem:[%s3869_s0 + %s3080_s22]]   ;;  %s3084_s22 = smov 28  }
  0x22   :  { %s3234_s19 = sld [smem:[%s3869_s0 + %s3081_s28]]   ;;  %s3085_s28 = smov 29  }
  0x23   :  { %3885 = sst [smem:[#allocation13_spill]] %s3219_s5 }
  0x24   :  { %s3239_s5 = sld [smem:[%s3869_s0 + %s3082_s7]]   ;;  %s3086_s7 = smov 30  }
  0x25   :  { %3886 = sst [smem:[#allocation14_spill]] %s3224_s20 }
  0x26   :  { %s3244_s20 = sld [smem:[%s3869_s0 + %s3083_s15]]   ;;  %s3087_s15 = smov 31  }
  0x27   :  { %3887 = sst [smem:[#allocation15_spill]] %s3229_s27 }
  0x28   :  { %3888 = sst [smem:[#allocation16_spill]] %s3234_s19 }
  0x29   :  { %s3249_s27 = sld [smem:[%s3869_s0 + %s3084_s22]]   ;;  %s3088_s22 = smov 32  }
  0x2a   :  { %3889 = sst [smem:[#allocation17_spill]] %s3239_s5 }
  0x2b   :  { %s3254_s19 = sld [smem:[%s3869_s0 + %s3085_s28]]   ;;  %s3089_s28 = smov 33  }
  0x2c   :  { %3890 = sst [smem:[#allocation18_spill]] %s3244_s20 }
  0x2d   :  { %s3259_s5 = sld [smem:[%s3869_s0 + %s3086_s7]]   ;;  %s3090_s7 = smov 34  }
  0x2e   :  { %s3264_s20 = sld [smem:[%s3869_s0 + %s3087_s15]]   ;;  %s3091_s15 = smov 35  }
  0x2f   :  { %3891 = sst [smem:[#allocation19_spill]] %s3249_s27 }
  0x30   :  { %s3269_s27 = sld [smem:[%s3869_s0 + %s3088_s22]]  }
  0x31   :  { %3892 = sst [smem:[#allocation20_spill]] %s3254_s19 }
  0x32   :  { %s3274_s19 = sld [smem:[%s3869_s0 + %s3089_s28]]  }
  0x33   :  { %3893 = sst [smem:[#allocation21_spill]] %s3259_s5 }
  0x34   :  { %3894 = sst [smem:[#allocation22_spill]] %s3264_s20 }
  0x35   :  { %s3279_s5 = sld [smem:[%s3869_s0 + %s3090_s7]]  }
  0x36   :  { %s3284_s20 = sld [smem:[%s3869_s0 + %s3091_s15]]  }
  0x37   :  { %v147_v0 = vld [vmem:[%s3134_s25] sm:$0x1]  ;;  %vm150_vm0 = vcmask 253952   ;;  %v174_v1 = vld [vmem:[%s3119_s13 + $0x8] sm:$0xff]  ;;  %vm175_vm1 = vcmask 261120  }
  0x38   :  { %v173_v2 = vld [vmem:[%s3119_s13] sm:$0xff]  ;;  %v151_v3 = vsel %vm150_vm0, %v147_v0, 0.0  ;;  %v179_v4 = vsel %vm175_vm1, %v174_v1, 0.0 }
  0x39   :  { %v176_v5 = vsel %vm175_vm1, %v173_v2, 0.0  ;;  %152 = vadd.xlane.f32.xlu0 %v151_v3  ;;  %180 = vadd.xlane.f32.xlu1 %v179_v4 }
  0x3d   :  { %177 = vadd.xlane.f32.xlu0 %v176_v5 }
  0x3e   :  { %77 = vsyncpa [#allocation3], 0  ;;  %v3092_v21 = vmov 0   ;;  %v219_v22 = vld [vmem:[%s3124_s17 + $0x8] sm:$0xff]  ;;  %v2915_v23 = vld [vmem:[%s3164_s24] sm:$0xff]   ;;  %v3093_v24 = vmov 0.0   ;;  %v168_v41 = vlaneseq }
  0x3f   :  { %2914 = vset.pattern.permute.xlu1 %v3092_v21  ;;  %2913 = vset.pattern.permute.xlu0 %v3092_v21  ;;  %v2916_v25 = vld [vmem:[%s3174_s6] sm:$0xff]   ;;  %v2917_v26 = vld [vmem:[%s3164_s24 + $0x8] sm:$0xff]   ;;  %vm3094_vm2 = vmmov 0   ;;  %v3340_v35 = vld [vmem:[%s3114_s9 + $0x10] sm:$0x3]  ;;  %vm878_vm3 = vcmask 254976  }
  0x40   :  { %2689 = vmatprep.subr.bf16.mxu0 %v3093_v24  ;;  %2697 = vmatprep.subr.bf16.mxu1 %v3093_v24  ;;  %v218_v27 = vld [vmem:[%s3124_s17] sm:$0xff]  ;;  %v2918_v28 = vld [vmem:[%s3174_s6 + $0x8] sm:$0xff]   ;;  %v879_v36 = vsel %vm878_vm3, %v3340_v35, 0.0  ;;  %v3095_v37 = vmov 0.0|0.0   ;;  %v3345_v46 = vand.u32 127, %v168_v41  ;;  %v3348_v50 = vshrl.u32 %v168_v41, 7 }
  0x41   :  { %2690 = vmatpush3.bf16.msra.mxu0 %v2915_v23  ;;  %2698 = vmatpush3.bf16.msra.mxu1 %v2916_v25  ;;  %v3325_v29 = vld [vmem:[%s3139_s29] sm:$0x1]  ;;  %v3335_v33 = vld [vmem:[%s3114_s9 + $0x8] sm:$0xff]  ;;  %s3097_s0 = smov 96   ;;  %s3900_s13 = sld [smem:[#allocation7_spill]] }
  0x42   :  { %2691 = vmatprep.subr.bf16.mxu0 %v3093_v24  ;;  %2693 = vmatprep.mubr.msk.bf16.mxu0 %vm3094_vm2, %v3093_v24  ;;  %v3328_v30 = vld [vmem:[%s3114_s9] sm:$0xff]  ;;  %v848_v31 = vsel %vm150_vm0, %v3325_v29, 0.0  ;;  %v875_v34 = vsel %vm175_vm1, %v3335_v33, 0.0  ;;  %v247_v49 = vadd.s32 1, %v3345_v46  ;;  %v3351_v51 = vmul.u32 8, %v3345_v46  ;;  %s3899_s9 = sld [smem:[#allocation6_spill]] }
  0x43   :  { %2699 = vmatprep.subr.bf16.mxu1 %v3093_v24  ;;  %2701 = vmatprep.mubr.msk.bf16.mxu1 %vm3094_vm2, %v3093_v24  ;;  %v872_v32 = vsel %vm175_vm1, %v3328_v30, 0.0  ;;  %v3356_v53 = vsub.s32 0, %v3348_v50  ;;  %v237_v54 = vadd.s32 8, %v3348_v50  ;;  %v148_v56 = vld [vmem:[%s3144_s3] sm:$0x1]  ;;  %s3901_s17 = sld [smem:[#allocation10_spill]] }
  0x44   :  { %v3353_v52 = vmul.u32 8, %v247_v49  ;;  %v149_v58 = vld [vmem:[%s3149_s8] sm:$0x1]  ;;  %vm243_vm4 = vcmp.ge.s32.totalorder %v3348_v50, %v3351_v51  ;;  %s3903_s25 = sld [smem:[#allocation11_spill]]  ;;  %s3904_s29 = sld [smem:[#allocation14_spill]] }
  0x45   :  { %2692 = vmatpush3.bf16.msra.mxu0 %v2917_v26  ;;  %2700 = vmatpush3.bf16.msra.mxu1 %v2918_v28  ;;  %v206_v60 = vrot.slane %v148_v56, %v3356_v53  ;;  %vm244_vm6 = vcmp.ge.s32.totalorder %v237_v54, %v3351_v51  ;;  %s3905_s3 = sld [smem:[#allocation5_spill]]  ;;  %s3906_s8 = sld [smem:[#allocation15_spill]] }
  0x46   :  { %2716 = vmatprep.subr.mxu1 %v3093_v24  ;;  %2841 = vmatprep.subr.bf16.mxu0 %v3095_v37  ;;  %vm249_vm5 = vcmp.lt.s32.totalorder %v3348_v50, %v3353_v52  ;;  %vm250_vm7 = vcmp.lt.s32.totalorder %v237_v54, %v3353_v52  ;;  %s3908_s24 = sld [smem:[#allocation18_spill]]  ;;  %s3910_s6 = sld [smem:[#allocation17_spill]] }
  0x47   :  { %vm253_vm8 = vmand %vm243_vm4, %vm249_vm5  ;;  %s3913_s22 = sld [smem:[#allocation19_spill]]  ;;  %s3915_s23 = sld [smem:[#allocation20_spill]] }
  0x48   :  { %vm254_vm9 = vmand %vm244_vm6, %vm250_vm7  ;;  %s3916_s26 = sld [smem:[#allocation21_spill]] }
  0x49   :  { %vm3373_vm10 = vmpackc.low %vm254_vm9, %vm253_vm8  ;;  %vm506_vm8 = vcmask 1043456  }
  0xc6   :  { %v153_v6 = vpop.xlane.xlu0 %152  ;;  %v181_v7 = vpop.xlane.xlu1 %180 }
  0xc7   :  { %v155_v8 = vmul.f32 0.03125, %v153_v6  ;;  %v183_v9 = vmul.f32 0.03125, %v181_v7 }
  0xc9   :  { %v3292_v10 = vsub.f32 %v147_v0, %v155_v8  ;;  %v3294_v11 = vsub.f32 %v174_v1, %v183_v9  ;;  %v214_v1 = vrot.slane %v149_v58, %v3356_v53  ;;  %v2515_v8 = vld [vmem:[%s3903_s25] ss:$0 sm:$0xff] }
  0xca   :  { %v178_v12 = vpop.xlane.xlu0 %177 }
  0xcb   :  { %v182_v13 = vmul.f32 0.03125, %v178_v12  ;;  %v157_v14 = vmul.f32 %v3292_v10, %v3292_v10  ;;  %v187_v15 = vmul.f32 %v3294_v11, %v3294_v11 }
  0xcd   :  { %v3300_v16 = vsub.f32 %v173_v2, %v182_v13  ;;  %v158_v17 = vsel %vm150_vm0, %v157_v14, 0.0  ;;  %v191_v18 = vsel %vm175_vm1, %v187_v15, 0.0 }
  0xce   :  { %159 = vadd.xlane.f32.xlu1 %v158_v17 }
  0xcf   :  { %v186_v19 = vmul.f32 %v3300_v16, %v3300_v16 }
  0xd1   :  { %v188_v20 = vsel %vm175_vm1, %v186_v19, 0.0 }
  0xd2   :  { %192 = vadd.xlane.f32.xlu1 %v191_v18  ;;  %189 = vadd.xlane.f32.xlu0 %v188_v20 }
  0xe3   :  { %673 = vperm.xlu1 %2914, %v219_v22  }
  0xe8   :  { %479 = vperm.xlu0 %2913, %v218_v27  }
 0x107   :  { %849 = vadd.xlane.f32.xlu1 %v848_v31  ;;  %873 = vadd.xlane.f32.xlu0 %v872_v32 }
 0x10b   :  { %876 = vadd.xlane.f32.xlu1 %v875_v34 }
 0x10f   :  { %880 = vadd.xlane.f32.xlu1 %v879_v36 }
 0x15b   :  { %v160_v38 = vpop.xlane.xlu1 %159 }
 0x15c   :  { %v161_v39 = vmul.f32 0.03125, %v160_v38  ;;  %v238_v38 = vadd.s32 16, %v3348_v50 }
 0x15e   :  { %v162_v40 = vadd.f32 1e-05, %v161_v39  ;;  %v239_v39 = vadd.s32 24, %v3348_v50  ;;  %vm245_vm11 = vcmp.ge.s32.totalorder %v238_v38, %v3351_v51  ;;  %vm251_vm13 = vcmp.lt.s32.totalorder %v238_v38, %v3353_v52 }
 0x15f   :  { %v193_v42 = vpop.xlane.xlu1 %192  ;;  %v190_v43 = vpop.xlane.xlu0 %189  ;;  %vm255_vm15 = vmand %vm245_vm11, %vm251_vm13  ;;  %vm483_vm11 = vcmask 31744   ;;  %vm1186_vm13 = vcmask 24576  }
 0x160   :  { %2957 = vrsqrt.f32 %v162_v40  ;;  %v195_v44 = vmul.f32 0.03125, %v193_v42  ;;  %v194_v45 = vmul.f32 0.03125, %v190_v43  ;;  %vm246_vm12 = vcmp.ge.s32.totalorder %v239_v39, %v3351_v51  ;;  %v2485_v40 = vld [vmem:[%s3169_s30] ss:$0 sm:$0xff]  ;;  %s3909_s30 = sld [smem:[#allocation16_spill]] }
 0x161   :  { %vm252_vm14 = vcmp.lt.s32.totalorder %v239_v39, %v3353_v52 }
 0x162   :  { %v197_v47 = vadd.f32 1e-05, %v195_v44  ;;  %v196_v48 = vadd.f32 1e-05, %v194_v45  ;;  %vm256_vm4 = vmand %vm246_vm12, %vm252_vm14  ;;  %v2489_v44 = vld [vmem:[%s3179_s12] ss:$0 sm:$0xff] }
 0x163   :  { %v3387_v12 = vpop.permute.xlu1 %673  ;;  %vm3421_vm5 = vmpackc.low %vm256_vm4, %vm255_vm15  ;;  %v3432_v45 = vsub.s32 1, %v3348_v50  ;;  %vm781_vm12 = vcmask 1040384   ;;  %s3911_s12 = sld [smem:[#allocation8_spill]] }
 0x164   :  { %2959 = vrsqrt.f32 %v197_v47 }
 0x165   :  { %2961 = vrsqrt.f32 %v196_v48 }
 0x167   :  { %v3389_v13 = vpop.permute.xlu0 %479 }
 0x16a   :  { %v2958_v55 = vpop.eup %2957 }
 0x16b   :  { %v164_v57 = vmul.f32 %v2958_v55, %v3292_v10 }
 0x16d   :  { %v165_v59 = vmul.f32 %v164_v57, %v148_v56 }
 0x16e   :  { %v2960_v61 = vpop.eup %2959 }
 0x16f   :  { %v2962_v62 = vpop.eup %2961  ;;  %v201_v63 = vmul.f32 %v2960_v61, %v3294_v11  ;;  %v166_v0 = vadd.f32 %v165_v59, %v149_v58  ;;  %v3096_v11 = vmov 1.0|1.0  }
 0x170   :  { %v200_v2 = vmul.f32 %v2962_v62, %v3300_v16  ;;  %v930_v62 = vld [vmem:[%s3129_s21] sm:$0xff] }
 0x171   :  { %v171_v3 = vrot.slane %v166_v0, %v3356_v53  ;;  %v209_v4 = vmul.f32 %v206_v60, %v201_v63  ;;  %v932_v63 = vld [vmem:[%s3129_s21 + $0x10] sm:$0x3] }
 0x172   :  { %v208_v5 = vmul.f32 %v206_v60, %v200_v2  ;;  %v931_v60 = vld [vmem:[%s3129_s21 + $0x8] sm:$0xff]  ;;  %s3902_s21 = sld [smem:[#allocation9_spill]] }
 0x173   :  { %v273_v6 = vpack.c.bf16 %v171_v3, %v171_v3  ;;  %v217_v7 = vadd.f32 %v214_v1, %v209_v4  ;;  %v265_v3 = vmul.u32 8, %v3348_v50 }
 0x174   :  { %v216_v9 = vadd.f32 %v214_v1, %v208_v5 }
 0x175   :  { %2694 = vmatmul.mubr.msk.bf16.vlgmr.msra.gmra.mrb[0].mxu0 %vm175_vm1, %v273_v6  ;;  %vm266_vm6 = vcmp.ge.s32.totalorder %v3345_v46, %v265_v3 }
 0x176   :  { %v335_v10 = vpack.c.bf16 %v217_v7, %v216_v9  ;;  %2843 = vmatpush3.bf16.msk.msra.mxu0 %vm3373_vm10, %v3096_v11  ;;  %2713 = vmatprep.mubr.msk.f32.mxu0 %vm3094_vm2, %v3093_v24 }
 0x177   :  { %2844 = vmatprep.subr.bf16.mxu0 %v3095_v37 }
 0x178   :  { %2702 = vmatmul.mubr.msk.bf16.vlgmr.msra.gmra.mrb[0].mxu1 %vm175_vm1, %v335_v10  ;;  %v2919_v10 = vld [vmem:[%s3194_s4] sm:$0xff]  }
 0x179   :  { %2718 = vmatprep.mubr.msk.f32.mxu1 %vm3094_vm2, %v3093_v24 }
 0x17a   :  { %2846 = vmatpush3.bf16.msk.msra.mxu0 %vm3421_vm5, %v3096_v11 }
 0x17b   :  { %2847 = vmatprep.subr.bf16.mxu0 %v3095_v37 }
 0x194   :  { %v850_v14 = vpop.xlane.xlu1 %849  ;;  %v874_v16 = vpop.xlane.xlu0 %873 }
 0x195   :  { %v851_v15 = vmul.f32 0.03125, %v850_v14  ;;  %v882_v17 = vmul.f32 0.03125, %v874_v16  ;;  %v3472_v14 = vld [vmem:[%s3899_s9] sm:$0x1] }
 0x197   :  { %v3392_v18 = vsub.f32 %v3325_v29, %v851_v15  ;;  %v3395_v19 = vsub.f32 %v3328_v30, %v882_v17  ;;  %v2920_v15 = vld [vmem:[%s3194_s4 + $0x8] sm:$0xff]   ;;  %s3912_s4 = sld [smem:[#allocation13_spill]] }
 0x198   :  { %v877_v20 = vpop.xlane.xlu1 %876 }
 0x199   :  { %v853_v22 = vmul.f32 %v3392_v18, %v3392_v18  ;;  %v883_v23 = vmul.f32 0.03125, %v877_v20  ;;  %v888_v25 = vmul.f32 %v3395_v19, %v3395_v19 }
 0x19b   :  { %v854_v26 = vsel %vm150_vm0, %v853_v22, 0.0  ;;  %v3403_v27 = vsub.f32 %v3335_v33, %v883_v23  ;;  %v891_v31 = vsel %vm175_vm1, %v888_v25, 0.0 }
 0x19c   :  { %855 = vadd.xlane.f32.xlu1 %v854_v26  ;;  %v881_v28 = vpop.xlane.xlu1 %880 }
 0x19d   :  { %v884_v29 = vmul.f32 0.03125, %v881_v28  ;;  %v889_v30 = vmul.f32 %v3403_v27, %v3403_v27 }
 0x19f   :  { %v3409_v32 = vsub.f32 %v3340_v35, %v884_v29  ;;  %v894_v34 = vsel %vm175_vm1, %v889_v30, 0.0 }
 0x1a0   :  { %892 = vadd.xlane.f32.xlu1 %v891_v31 }
 0x1a1   :  { %v890_v36 = vmul.f32 %v3409_v32, %v3409_v32 }
 0x1a3   :  { %v897_v33 = vsel %vm878_vm3, %v890_v36, 0.0 }
 0x1a4   :  { %895 = vadd.xlane.f32.xlu1 %v894_v34 }
 0x1a8   :  { %898 = vadd.xlane.f32.xlu1 %v897_v33 }
 0x229   :  { %v856_v0 = vpop.xlane.xlu1 %855 }
 0x22a   :  { %v857_v1 = vmul.f32 0.03125, %v856_v0 }
 0x22c   :  { %v858_v2 = vadd.f32 1e-05, %v857_v1 }
 0x22e   :  { %2963 = vrsqrt.f32 %v858_v2 }
 0x238   :  { %v2964_v5 = vpop.eup %2963 }
 0x239   :  { %v860_v7 = vmul.f32 %v2964_v5, %v3392_v18 }
 0x248   :  { %v329_v41 = vpop.f32.mrb[0].mxu0 }
 0x249   :  { %v330_v42 = vadd.f32 %v2485_v40, %v329_v41  ;;  %v2695_v43 = vpop.f32.mrb[1].mxu0 }
 0x24a   :  { %v332_v47 = vpop.f32.mrb[2].mxu0 }
 0x24b   :  { %v401_v48 = vrot.slane %v330_v42, %v3356_v53  ;;  %v391_v49 = vpop.f32.mrb[0].mxu1  ;;  %v2696_v51 = vpop.f32.mrb[3].mxu0  ;;  %v595_v56 = vrot.slane %v330_v42, %v3432_v45 }
 0x24c   :  { %v392_v52 = vadd.f32 %v2489_v44, %v391_v49  ;;  %v2703_v54 = vpop.f32.mrb[1].mxu1 }
 0x24d   :  { %v394_v55 = vpop.f32.mrb[2].mxu1 }
 0x24e   :  { %v402_v57 = vmul.f32 %v401_v48, %v392_v52  ;;  %v395_v58 = vadd.f32 %v2489_v44, %v394_v55  ;;  %581 = vrot.lane.b32.xlu0 %v392_v52, %s3097_s0  ;;  %v2704_v59 = vpop.f32.mrb[3].mxu1 }
 0x250   :  { %v596_v61 = vmul.f32 %v595_v56, %v395_v58  ;;  %2714 = vmatmul.mubr.msk.f32.vlgmr.msra.gmra.mrb[4].mxu0 %vm175_vm1, %v402_v57  ;;  %770 = vrot.lane.b32.xlu1 %v395_v58, %s3097_s0 }
 0x251   :  { %2849 = vmatpush3.bf16.msk.msra.mxu0 %vm3373_vm10, %v3096_v11  ;;  %2729 = vmatprep.mubr.msk.f32.mxu0 %vm3094_vm2, %v3093_v24 }
 0x252   :  { %2850 = vmatprep.subr.bf16.mxu0 %v3095_v37  ;;  %1180 = vperm.xlu0 %2913, %v931_v60   ;;  %v267_v37 = vadd.s32 1, %v3348_v50  ;;  %v3467_v50 = vld [vmem:[%s3154_s14] sm:$0x1]  ;;  %s3907_s14 = sld [smem:[#allocation12_spill]] }
 0x253   :  { %v861_v9 = vmul.f32 %v860_v7, %v3467_v50 }
 0x254   :  { %1175 = vperm.xlu1 %2914, %v930_v62   ;;  %v268_v4 = vmul.u32 8, %v267_v37 }
 0x255   :  { %2852 = vmatpush3.bf16.msk.msra.mxu0 %vm3421_vm5, %v3096_v11 }
 0x256   :  { %2745 = vmatprep.subr.bf16.mxu0 %v3093_v24  ;;  %vm269_vm7 = vcmp.lt.s32.totalorder %v3345_v46, %v268_v4  ;;  %v862_v46 = vadd.f32 %v861_v9, %v3472_v14 }
 0x257   :  { %vm270_vm9 = vmand %vm266_vm6, %vm269_vm7 }
 0x258   :  { %2730 = vmatmul.mubr.msk.f32.vlgmr.msra.gmra.mrb[6].mxu0 %vm175_vm1, %v596_v61  ;;  %1408 = vperm.xlu1 %2914, %v932_v63   ;;  %v3460_v6 = vsel %vm270_vm9, 1.0, %v3093_v24  ;;  %v867_v16 = vrot.slane %v862_v46, %v3356_v53  ;;  %v2922_v46 = vld [vmem:[%s3900_s13 + $0x8] sm:$0xff]  }
 0x259   :  { %2749 = vmatprep.mubr.msk.bf16.mxu0 %vm3094_vm2, %v3093_v24  ;;  %2717 = vmatpush3.msk.msra.mxu1 %vm506_vm8, %v3460_v6 }
 0x25a   :  { %2732 = vmatprep.subr.mxu1 %v3093_v24  ;;  %2746 = vmatpush3.bf16.msra.mxu0 %v2919_v10  ;;  %v948_v17 = vpack.c.bf16 %v867_v16, %v867_v16  ;;  %v2921_v10 = vld [vmem:[%s3900_s13] sm:$0xff]  }
 0x25b   :  { %2747 = vmatprep.subr.bf16.mxu0 %v3093_v24 }
 0x25e   :  { %2748 = vmatpush3.bf16.msra.mxu0 %v2920_v15  ;;  %v2923_v15 = vld [vmem:[%s3901_s17] sm:$0xff]  }
 0x25f   :  { %2854 = vmatprep.subr.msk.bf16.mxu0 %vm3373_vm10, %v3096_v11 }
 0x261   :  { %2750 = vmatmul.mubr.msk.bf16.vlgmr.msra.gmra.mrb[8].mxu0 %vm175_vm1, %v948_v17 }
 0x262   :  { %2856 = vmatpush3.bf16.msk.msra.mxu0 %vm3373_vm10, %v3096_v11 }
 0x263   :  { %2858 = vmatprep.subr.msk.bf16.mxu0 %vm3421_vm5, %v3096_v11 }
 0x266   :  { %2860 = vmatpush3.bf16.msk.msra.mxu0 %vm3421_vm5, %v3096_v11 }
 0x267   :  { %2772 = vmatprep.subr.msk.mxu0 %vm506_vm8, %v3460_v6 }
 0x323   :  { %v472_v18 = vpop.f32.mrb[4].mxu0 }
 0x324   :  { %v476_v20 = vmul.f32 0.35355338, %v472_v18  ;;  %v2715_v22 = vpop.f32.mrb[5].mxu0 }
 0x325   :  { %v893_v22 = vpop.xlane.xlu1 %892 }
 0x326   :  { %v482_v23 = vadd.f32 %v3389_v13, %v476_v20 }
 0x328   :  { %v484_v25 = vsel %vm483_vm11, %v482_v23, -inf }
 0x329   :  { %v485_v26 = vrot.slane %v484_v25, 4 }
 0x32b   :  { %v486_v28 = vmax.f32 %v484_v25, %v485_v26  ;;  %v666_v29 = vpop.f32.mrb[6].mxu0  ;;  %v896_v25 = vpop.xlane.xlu1 %895 }
 0x32c   :  { %v670_v31 = vmul.f32 0.35355338, %v666_v29  ;;  %v2731_v30 = vpop.f32.mrb[7].mxu0  ;;  %v901_v26 = vmul.f32 0.03125, %v896_v25 }
 0x32d   :  { %v487_v34 = vrot.slane %v486_v28, 2 }
 0x32e   :  { %v676_v36 = vadd.f32 %v3387_v12, %v670_v31  ;;  %v904_v29 = vadd.f32 1e-05, %v901_v26 }
 0x32f   :  { %v488_v33 = vmax.f32 %v486_v28, %v487_v34  ;;  %v899_v31 = vpop.xlane.xlu1 %898  ;;  %v582_v34 = vpop.permute.xlu0 %581 }
 0x330   :  { %v677_v38 = vsel %vm483_vm11, %v676_v36, -inf  ;;  %v902_v30 = vmul.f32 0.03125, %v899_v31 }
 0x331   :  { %v489_v39 = vrot.slane %v488_v33, 1  ;;  %v678_v40 = vrot.slane %v677_v38, 4 }
 0x333   :  { %v490_v41 = vmax.f32 %v488_v33, %v489_v39  ;;  %v679_v42 = vmax.f32 %v677_v38, %v678_v40  ;;  %v905_v40 = vadd.f32 1e-05, %v902_v30 }
 0x334   :  { %v3512_v16 = vpop.f32.mrb[8].mxu0 }
 0x335   :  { %v491_v43 = vsub.f32 %v482_v23, %v490_v41  ;;  %v680_v44 = vrot.slane %v679_v42, 2  ;;  %v2751_v17 = vpop.f32.mrb[9].mxu0  ;;  %v900_v23 = vmul.f32 0.03125, %v893_v22 }
 0x336   :  { %v1007_v18 = vpop.f32.mrb[10].mxu0  ;;  %v2511_v17 = vld [vmem:[%s3902_s21] ss:$0 sm:$0xff] }
 0x337   :  { %v492_v13 = vmul.f32 1.442695, %v491_v43  ;;  %v681_v47 = vmax.f32 %v679_v42, %v680_v44  ;;  %v2752_v20 = vpop.f32.mrb[11].mxu0  ;;  %v903_v28 = vadd.f32 1e-05, %v900_v23  ;;  %v771_v43 = vpop.permute.xlu1 %770  ;;  %v1005_v22 = vadd.f32 %v2511_v17, %v3512_v16 }
 0x339   :  { %2965 = vpow2.f32 %v492_v13  ;;  %v682_v48 = vrot.slane %v681_v47, 1  ;;  %v1316_v25 = vrot.slane %v1005_v22, %v3432_v45  ;;  %v1087_v35 = vrot.slane %v1005_v22, %v3356_v53 }
 0x33b   :  { %v683_v49 = vmax.f32 %v681_v47, %v682_v48 }
 0x33d   :  { %v684_v51 = vsub.f32 %v676_v36, %v683_v49 }
 0x33f   :  { %v685_v52 = vmul.f32 1.442695, %v684_v51 }
 0x341   :  { %2967 = vpow2.f32 %v685_v52 }
 0x343   :  { %v2966_v54 = vpop.eup %2965 }
 0x344   :  { %v494_v12 = vsel %vm483_vm11, %v2966_v54, 0.0 }
 0x345   :  { %v495_v55 = vrot.slane %v494_v12, 4 }
 0x347   :  { %v496_v56 = vadd.f32 %v495_v55, %v494_v12  ;;  %v916_v55 = vrot.slane %v3467_v50, %v3356_v53 }
 0x349   :  { %v497_v57 = vrot.slane %v496_v56, 2 }
 0x34b   :  { %v2968_v58 = vpop.eup %2967  ;;  %v498_v59 = vadd.f32 %v497_v57, %v496_v56 }
 0x34c   :  { %v687_v60 = vsel %vm483_vm11, %v2968_v58, 0.0 }
 0x34d   :  { %v499_v61 = vrot.slane %v498_v59, 1  ;;  %v688_v62 = vrot.slane %v687_v60, 4 }
 0x34f   :  { %v500_v63 = vadd.f32 %v499_v61, %v498_v59  ;;  %v689_v0 = vadd.f32 %v688_v62, %v687_v60 }
 0x351   :  { %2969 = vrcp.f32 %v500_v63  ;;  %v690_v1 = vrot.slane %v689_v0, 2 }
 0x353   :  { %v691_v2 = vadd.f32 %v690_v1, %v689_v0  ;;  %v925_v1 = vrot.slane %v3472_v14, %v3356_v53 }
 0x355   :  { %v692_v37 = vrot.slane %v691_v2, 1 }
 0x357   :  { %v693_v3 = vadd.f32 %v692_v37, %v691_v2 }
 0x359   :  { %2971 = vrcp.f32 %v693_v3 }
 0x35a   :  { %2973 = vrsqrt.f32 %v903_v28 }
 0x35b   :  { %v2970_v4 = vpop.eup %2969  ;;  %2975 = vrsqrt.f32 %v904_v29 }
 0x35c   :  { %v502_v5 = vmul.f32 %v2970_v4, %v2966_v54  ;;  %2977 = vrsqrt.f32 %v905_v40 }
 0x35e   :  { %2719 = vmatmul.mubr.msk.f32.vlgmr.msra.gmra.mrb[4].mxu1 %vm483_vm11, %v502_v5 }
 0x35f   :  { %2733 = vmatpush3.msk.msra.mxu1 %vm506_vm8, %v3460_v6  ;;  %2734 = vmatprep.mubr.msk.f32.mxu1 %vm3094_vm2, %v3093_v24 }
 0x360   :  { %2737 = vmatprep.subr.bf16.mxu1 %v3093_v24 }
 0x363   :  { %v2972_v7 = vpop.eup %2971 }
 0x364   :  { %v695_v9 = vmul.f32 %v2972_v7, %v2968_v58  ;;  %v2974_v48 = vpop.eup %2973  ;;  %v2924_v7 = vld [vmem:[%s3901_s17 + $0x8] sm:$0xff]  }
 0x365   :  { %v2976_v51 = vpop.eup %2975  ;;  %v909_v12 = vmul.f32 %v2974_v48, %v3395_v19 }
 0x366   :  { %2735 = vmatmul.mubr.msk.f32.vlgmr.msra.gmra.mrb[6].mxu1 %vm483_vm11, %v695_v9  ;;  %v910_v56 = vmul.f32 %v2976_v51, %v3403_v27  ;;  %v2978_v61 = vpop.eup %2977 }
 0x367   :  { %2741 = vmatprep.mubr.msk.bf16.mxu1 %vm3094_vm2, %v3093_v24  ;;  %2738 = vmatpush3.bf16.msra.mxu1 %v2921_v10  ;;  %v918_v60 = vmul.f32 %v916_v55, %v909_v12  ;;  %v911_v19 = vmul.f32 %v2978_v61, %v3409_v32 }
 0x368   :  { %2739 = vmatprep.subr.bf16.mxu1 %v3093_v24  ;;  %v919_v0 = vmul.f32 %v916_v55, %v910_v56 }
 0x369   :  { %v927_v3 = vadd.f32 %v925_v1, %v918_v60  ;;  %v920_v9 = vmul.f32 %v916_v55, %v911_v19 }
 0x36a   :  { %v928_v27 = vadd.f32 %v925_v1, %v919_v0 }
 0x36b   :  { %2740 = vmatpush3.bf16.msra.mxu1 %v2922_v46  ;;  %v929_v32 = vadd.f32 %v925_v1, %v920_v9 }
 0x36c   :  { %2753 = vmatprep.subr.bf16.mxu1 %v2923_v15  ;;  %v1010_v10 = vpack.c.bf16 %v928_v27, %v927_v3 }
 0x36d   :  { %v1011_v14 = vpack.c.bf16 %v929_v32, %v929_v32 }
 0x431   :  { %v576_v36 = vpop.f32.mrb[4].mxu1 }
 0x432   :  { %v584_v33 = vmul.f32 %v582_v34, %v576_v36  ;;  %v2720_v38 = vpop.f32.mrb[5].mxu1 }
 0x434   :  { %v585_v39 = vsel %vm175_vm1, %v584_v33, 0.0 }
 0x435   :  { %v586_v41 = vrot.slane %v585_v39, 4 }
 0x437   :  { %v587_v42 = vadd.f32 %v586_v41, %v585_v39  ;;  %v1176_v41 = vpop.permute.xlu1 %1175 }
 0x439   :  { %v765_v44 = vpop.f32.mrb[6].mxu1  ;;  %v588_v49 = vrot.slane %v587_v42, 2 }
 0x43a   :  { %v773_v13 = vmul.f32 %v771_v43, %v765_v44  ;;  %v2736_v47 = vpop.f32.mrb[7].mxu1 }
 0x43b   :  { %v589_v57 = vadd.f32 %v588_v49, %v587_v42  ;;  %v1181_v42 = vpop.permute.xlu0 %1180  ;;  %v1409_v43 = vpop.permute.xlu1 %1408 }
 0x43c   :  { %v774_v52 = vsel %vm175_vm1, %v773_v13, 0.0  ;;  %v1411_v49 = vrot.slane %v1409_v43, 1  ;;  %v1410_v51 = vrot.slane %v1181_v42, 1 }
 0x43d   :  { %v775_v54 = vrot.slane %v774_v52, 4  ;;  %v590_v62 = vrot.slane %v589_v57, 1 }
 0x43f   :  { %v776_v58 = vadd.f32 %v775_v54, %v774_v52  ;;  %v591_v37 = vadd.f32 %v590_v62, %v589_v57 }
 0x441   :  { %v777_v59 = vrot.slane %v776_v58, 2 }
 0x443   :  { %v778_v63 = vadd.f32 %v777_v59, %v776_v58 }
 0x445   :  { %v779_v2 = vrot.slane %v778_v63, 1 }
 0x447   :  { %v780_v50 = vadd.f32 %v779_v2, %v778_v63 }
 0x449   :  { %v782_v4 = vsel %vm781_vm12, %v591_v37, %v780_v50 }
 0x44a   :  { %v783_v5 = vpack.c.bf16 %v782_v4, %v782_v4 }
 0x44c   :  { %2742 = vmatmul.mubr.msk.bf16.vlgmr.msra.gmra.mrb[8].mxu1 %vm175_vm1, %v783_v5 }
 0x44d   :  { %2754 = vmatpush3.bf16.msra.mxu1 %v2923_v15  ;;  %2757 = vmatprep.mubr.msk.bf16.mxu1 %vm175_vm1, %v1010_v10 }
 0x44e   :  { %2755 = vmatprep.subr.bf16.mxu1 %v2924_v7 }
 0x451   :  { %2756 = vmatpush3.bf16.msra.mxu1 %v2924_v7 }
 0x452   :  { %2862 = vmatprep.subr.msk.bf16.mxu1 %vm3373_vm10, %v3096_v11 }
 0x454   :  { %2758 = vmatmul.mubr.msk.bf16.vlgmr.msra.gmra.mrb[12].mxu1 %vm175_vm1, %v1011_v14 }
 0x455   :  { %2864 = vmatpush3.bf16.msk.msra.mxu1 %vm3373_vm10, %v3096_v11  ;;  %vm1321_vm10 = vcmask 1046528  }
 0x456   :  { %2866 = vmatprep.subr.msk.bf16.mxu1 %vm3421_vm5, %v3096_v11  ;;  %v1412_v62 = vsel %vm1321_vm10, %v1410_v51, %v1411_v49 }
 0x459   :  { %2868 = vmatpush3.bf16.msk.msra.mxu1 %vm3421_vm5, %v3096_v11 }
 0x45a   :  { %2793 = vmatprep.subr.bf16.mxu1 %v3093_v24 }
 0x51f   :  { %v3541_v46 = vpop.f32.mrb[8].mxu1 }
 0x520   :  { %v2743_v15 = vpop.f32.mrb[9].mxu1 }
 0x521   :  { %v842_v18 = vpop.f32.mrb[10].mxu1 }
 0x522   :  { %v2744_v20 = vpop.f32.mrb[11].mxu1 }
 0x527   :  { %v2759_v23 = vpop.f32.mrb[12].mxu1 }
 0x528   :  { %v3547_v26 = vadd.f32 %v2759_v23, %v2515_v8  ;;  %v1070_v28 = vpop.f32.mrb[13].mxu1 }
 0x529   :  { %v3550_v11 = vadd.f32 %v2515_v8, %v1070_v28  ;;  %v2760_v29 = vpop.f32.mrb[14].mxu1 }
 0x52a   :  { %v1318_v31 = vmul.f32 %v1316_v25, %v3547_v26  ;;  %v1073_v30 = vpop.f32.mrb[15].mxu1 }
 0x52b   :  { %v1088_v34 = vmul.f32 %v1087_v35, %v3550_v11  ;;  %v3554_v36 = vadd.f32 %v2515_v8, %v1073_v30 }
 0x52c   :  { %v1323_v38 = vrot.slane %v1318_v31, 1 }
 0x52d   :  { %v1089_v16 = vmul.f32 %v1087_v35, %v3554_v36  ;;  %2769 = vmatprep.mubr.msk.f32.mxu0 %vm175_vm1, %v1088_v34  ;;  %v1317_v33 = vmul.f32 %v1316_v25, %v3554_v36 }
 0x52f   :  { %2770 = vmatmul.mubr.msk.f32.vlgmr.msra.gmra.mrb[12].mxu0 %vm175_vm1, %v1089_v16  ;;  %v1322_v39 = vrot.slane %v1317_v33, 1 }
 0x530   :  { %2773 = vmatpush3.msk.msra.mxu0 %vm506_vm8, %v3460_v6 }
 0x531   :  { %v1324_v40 = vsel %vm1321_vm10, %v1322_v39, %v1323_v38  ;;  %2788 = vmatprep.subr.msk.mxu0 %vm506_vm8, %v3460_v6 }
 0x532   :  { %2785 = vmatprep.mubr.msk.f32.mxu1 %vm175_vm1, %v1324_v40 }
 0x533   :  { %2786 = vmatmul.mubr.msk.f32.vlgmr.msra.gmra.mrb[16].mxu1 %vm175_vm1, %v1323_v38 }
 0x534   :  { %2797 = vmatprep.mubr.msk.bf16.mxu1 %vm3094_vm2, %v3093_v24 }
 0x602   :  { %v2771_v44 = vpop.f32.mrb[12].mxu0 }
 0x603   :  { %v1172_v13 = vmul.f32 0.35355338, %v2771_v44  ;;  %v1162_v47 = vpop.f32.mrb[13].mxu0 }
 0x604   :  { %v1171_v48 = vmul.f32 0.35355338, %v1162_v47 }
 0x605   :  { %v1184_v52 = vadd.f32 %v1181_v42, %v1172_v13 }
 0x606   :  { %v1183_v54 = vadd.f32 %v1176_v41, %v1171_v48  ;;  %v2787_v12 = vpop.f32.mrb[16].mxu1 }
 0x607   :  { %v1187_v55 = vsel %vm1186_vm13, %v1184_v52, -inf  ;;  %v1405_v56 = vmul.f32 0.35355338, %v2787_v12  ;;  %v1395_v57 = vpop.f32.mrb[17].mxu1 }
 0x608   :  { %v1185_v58 = vsel %vm483_vm11, %v1183_v54, -inf  ;;  %v1404_v59 = vmul.f32 0.35355338, %v1395_v57  ;;  %v3579_v57 = vld [vmem:[%s3904_s29 + $0x4] ss:$8 sps:$4 sm:$0xff]  }
 0x609   :  { %v1188_v60 = vmax.f32 %v1185_v58, %v1187_v55  ;;  %v1416_v61 = vadd.f32 %v1411_v49, %v1405_v56 }
 0x60a   :  { %v1415_v63 = vadd.f32 %v1412_v62, %v1404_v59  ;;  %v3590_v62 = vld [vmem:[%s3904_s29 + $0x14] ss:$8 sps:$4 sm:$0xff]  }
 0x60b   :  { %v1189_v0 = vrot.slane %v1188_v60, 4  ;;  %v1418_v1 = vsel %vm1186_vm13, %v1416_v61, -inf }
 0x60c   :  { %v1417_v2 = vsel %vm483_vm11, %v1415_v63, -inf }
 0x60d   :  { %v1190_v19 = vmax.f32 %v1188_v60, %v1189_v0  ;;  %v1419_v37 = vmax.f32 %v1417_v2, %v1418_v1  ;;  %v3586_v60 = vld [vmem:[%s3904_s29] ss:$8 sps:$4 sm:$0xff]  }
 0x60e   :  { %v146_v0 = vld [vmem:[%s3905_s3 + $0x8] sm:$0xff] }
 0x60f   :  { %v1191_v50 = vrot.slane %v1190_v19, 2  ;;  %v1420_v3 = vrot.slane %v1419_v37, 4 }
 0x611   :  { %v1192_v27 = vmax.f32 %v1190_v19, %v1191_v50  ;;  %v1421_v4 = vmax.f32 %v1419_v37, %v1420_v3  ;;  %v1614_v3 = vld [vmem:[%s3906_s8] sm:$0x3] }
 0x613   :  { %v1193_v5 = vrot.slane %v1192_v27, 1  ;;  %v1422_v7 = vrot.slane %v1421_v4, 2 }
 0x615   :  { %v1194_v9 = vmax.f32 %v1192_v27, %v1193_v5  ;;  %v1423_v10 = vmax.f32 %v1421_v4, %v1422_v7  ;;  %v3613_v27 = vrot.slane %v1614_v3, %v3356_v53  ;;  %v3616_v4 = vrot.slane %v1614_v3, %v3432_v45 }
 0x617   :  { %v1195_v32 = vsub.f32 %v1183_v54, %v1194_v9  ;;  %v1196_v14 = vsub.f32 %v1184_v52, %v1194_v9  ;;  %v1424_v15 = vrot.slane %v1423_v10, 1 }
 0x619   :  { %v1197_v17 = vmul.f32 1.442695, %v1195_v32  ;;  %v1199_v18 = vmul.f32 1.442695, %v1196_v14  ;;  %v1425_v20 = vmax.f32 %v1423_v10, %v1424_v15 }
 0x61b   :  { %2979 = vpow2.f32 %v1197_v17  ;;  %v1426_v22 = vsub.f32 %v1415_v63, %v1425_v20  ;;  %v1427_v8 = vsub.f32 %v1416_v61, %v1425_v20  ;;  %v3596_v63 = vld [vmem:[%s3904_s29 + $0x10] ss:$8 sps:$4 sm:$0xff]  }
 0x61c   :  { %2981 = vpow2.f32 %v1199_v18 }
 0x61d   :  { %v1428_v23 = vmul.f32 1.442695, %v1426_v22  ;;  %v1430_v25 = vmul.f32 1.442695, %v1427_v8  ;;  %v1526_v22 = vrot.slane %v3554_v36, 1  ;;  %v1527_v8 = vrot.slane %v3547_v26, 1 }
 0x61f   :  { %2983 = vpow2.f32 %v1428_v23  ;;  %v1528_v23 = vsel %vm1321_vm10, %v1526_v22, %v1527_v8 }
 0x620   :  { %2985 = vpow2.f32 %v1430_v25 }
 0x625   :  { %v2980_v28 = vpop.eup %2979 }
 0x626   :  { %v2982_v35 = vpop.eup %2981  ;;  %v1201_v29 = vsel %vm483_vm11, %v2980_v28, 0.0 }
 0x627   :  { %v1202_v31 = vsel %vm1186_vm13, %v2982_v35, 0.0 }
 0x628   :  { %v1203_v30 = vadd.f32 %v1202_v31, %v1201_v29 }
 0x629   :  { %v2984_v34 = vpop.eup %2983 }
 0x62a   :  { %v2986_v16 = vpop.eup %2985  ;;  %v1204_v33 = vrot.slane %v1203_v30, 4  ;;  %v1432_v38 = vsel %vm483_vm11, %v2984_v34, 0.0 }
 0x62b   :  { %v1433_v39 = vsel %vm1186_vm13, %v2986_v16, 0.0 }
 0x62c   :  { %v1205_v40 = vadd.f32 %v1204_v33, %v1203_v30  ;;  %v1434_v41 = vadd.f32 %v1433_v39, %v1432_v38 }
 0x62e   :  { %v1206_v42 = vrot.slane %v1205_v40, 2  ;;  %v1435_v43 = vrot.slane %v1434_v41, 4 }
 0x630   :  { %v1436_v44 = vadd.f32 %v1435_v43, %v1434_v41  ;;  %v1207_v13 = vadd.f32 %v1206_v42, %v1205_v40 }
 0x632   :  { %v1437_v47 = vrot.slane %v1436_v44, 2  ;;  %v1208_v48 = vrot.slane %v1207_v13, 1 }
 0x634   :  { %v1209_v49 = vadd.f32 %v1208_v48, %v1207_v13  ;;  %v1438_v51 = vadd.f32 %v1437_v47, %v1436_v44 }
 0x636   :  { %2987 = vrcp.f32 %v1209_v49  ;;  %v1439_v52 = vrot.slane %v1438_v51, 1 }
 0x638   :  { %v1440_v54 = vadd.f32 %v1439_v52, %v1438_v51  ;;  %v2931_v51 = vld [vmem:[%s3907_s14] sm:$0xff]   ;;  %v2932_v52 = vld [vmem:[%s3907_s14 + $0x8] sm:$0xff]  }
 0x639   :  { %2794 = vmatpush3.bf16.msra.mxu1 %v2931_v51 }
 0x63a   :  { %2989 = vrcp.f32 %v1440_v54  ;;  %2795 = vmatprep.subr.bf16.mxu1 %v3093_v24  ;;  %v3637_v54 = vld [vmem:[%s3908_s24 + $0x40] sm:$0xff]  }
 0x63d   :  { %2796 = vmatpush3.bf16.msra.mxu1 %v2932_v52 }
 0x63e   :  { %2627 = vmatprep.subr.bf16.mxu1 %v3637_v54 }
 0x640   :  { %v2988_v12 = vpop.eup %2987 }
 0x641   :  { %v1211_v55 = vmul.f32 %v2988_v12, %v2980_v28  ;;  %v1212_v56 = vmul.f32 %v2988_v12, %v2982_v35 }
 0x643   :  { %2774 = vmatprep.mubr.msk.f32.mxu0 %vm483_vm11, %v1211_v55 }
 0x644   :  { %v2990_v58 = vpop.eup %2989  ;;  %2775 = vmatmul.mubr.msk.f32.vlgmr.msra.gmra.mrb[14].mxu0 %vm483_vm11, %v1212_v56 }
 0x645   :  { %2789 = vmatpush3.msk.msra.mxu0 %vm506_vm8, %v3460_v6  ;;  %v1442_v59 = vmul.f32 %v2990_v58, %v2984_v34  ;;  %v1443_v61 = vmul.f32 %v2990_v58, %v2986_v16  ;;  %v145_v6 = vld [vmem:[%s3905_s3] sm:$0xff] }
 0x646   :  { %1704 = vmatprep.subr.bf16.mxu0 %v3579_v57  ;;  %v1669_v1 = vpack.c.bf16 %v146_v0, %v145_v6 }
 0x647   :  { %2790 = vmatprep.mubr.msk.f32.mxu0 %vm483_vm11, %v1442_v59 }
 0x648   :  { %2791 = vmatmul.mubr.msk.f32.vlgmr.msra.gmra.mrb[16].mxu0 %vm483_vm11, %v1443_v61 }
 0x649   :  { %1705 = vmatpush1.bf16.msra.mxu0 %v3586_v60  ;;  %1736 = vmatprep.mubr.bf16.mxu0 %v3092_v21 }
 0x64a   :  { %1706 = vmatprep.subr.bf16.mxu0 %v3590_v62 }
 0x64d   :  { %1707 = vmatpush1.bf16.msra.mxu0 %v3596_v63 }
 0x64e   :  { %2801 = vmatprep.subr.bf16.mxu0 %v3093_v24 }
 0x650   :  { %2546 = vmatmul.mubr.msk.bf16.vlgmr.msra.gmra.mrb[20].mxu0 %vm175_vm1, %v1669_v1 }
 0x651   :  { %2817 = vmatprep.mubr.msk.bf16.mxu0 %vm3094_vm2, %v3093_v24 }
 0x717   :  { %v3607_v2 = vpop.f32.mrb[14].mxu0 }
 0x718   :  { %v3609_v19 = vpop.f32.mrb[15].mxu0 }
 0x71b   :  { %v2792_v37 = vpop.f32.mrb[16].mxu0 }
 0x71c   :  { %v1516_v50 = vpop.f32.mrb[17].mxu0 }
 0x723   :  { %v1738_v5 = vpop.f32.mrb[20].mxu0 }
 0x724   :  { %v1739_v7 = vadd.f32 %v1738_v5, %v3613_v27  ;;  %v1740_v9 = vpop.f32.mrb[21].mxu0  ;;  %v1615_v5 = vld [vmem:[%s3909_s30] sm:$0x3] }
 0x725   :  { %v1741_v10 = vadd.f32 %v1740_v9, %v3616_v4  ;;  %v1742_v32 = vpop.f32.mrb[22].mxu0 }
 0x726   :  { %v1743_v14 = vadd.f32 %v1742_v32, %v3613_v27  ;;  %v1744_v15 = vpop.f32.mrb[23].mxu0  ;;  %v3647_v32 = vrot.slane %v1615_v5, %v3356_v53 }
 0x727   :  { %v1745_v17 = vadd.f32 %v1744_v15, %v3616_v4  ;;  %v1747_v18 = vadd.f32 %v1741_v10, %v1739_v7 }
 0x729   :  { %1748 = vadd.xlane.f32.xlu0 %v1747_v18  ;;  %v1750_v20 = vadd.f32 %v1745_v17, %v1743_v14 }
 0x72b   :  { %1751 = vadd.xlane.f32.xlu1 %v1750_v20 }
 0x73c   :  { %1296 = vrot.lane.b32.xlu1 %v3550_v11, %s3097_s0 }
 0x740   :  { %1529 = vrot.lane.b32.xlu1 %v1528_v23, %s3097_s0 }
 0x744   :  { %1531 = vrot.lane.b32.xlu1 %v1527_v8, %s3097_s0 }
 0x7b6   :  { %v1749_v25 = vpop.xlane.xlu0 %1748 }
 0x7b7   :  { %v1754_v28 = vmul.f32 0.00390625, %v1749_v25 }
 0x7b8   :  { %v1752_v35 = vpop.xlane.xlu1 %1751 }
 0x7b9   :  { %v1756_v29 = vsub.f32 %v1739_v7, %v1754_v28  ;;  %v1757_v31 = vsub.f32 %v1741_v10, %v1754_v28  ;;  %v1755_v30 = vmul.f32 0.00390625, %v1752_v35  ;;  %v1616_v10 = vld [vmem:[%s3910_s6] sm:$0x3] }
 0x7ba   :  { %v3653_v18 = vrot.slane %v1616_v10, %v3356_v53  ;;  %v3656_v8 = vrot.slane %v1616_v10, %v3432_v45  ;;  %v3702_v10 = vld [vmem:[%s3908_s24 + $0x10] sm:$0xff]  }
 0x7bb   :  { %v1758_v34 = vsub.f32 %v1743_v14, %v1755_v30  ;;  %v1759_v16 = vsub.f32 %v1745_v17, %v1755_v30  ;;  %v1760_v33 = vmul.f32 %v1756_v29, %v1756_v29  ;;  %v1761_v38 = vmul.f32 %v1757_v31, %v1757_v31 }
 0x7bc   :  { %v1297_v11 = vpop.permute.xlu1 %1296  ;;  %v3650_v14 = vrot.slane %v1615_v5, %v3432_v45 }
 0x7bd   :  { %v1764_v39 = vadd.f32 %v1761_v38, %v1760_v33  ;;  %v1762_v26 = vmul.f32 %v1758_v34, %v1758_v34  ;;  %v1763_v40 = vmul.f32 %v1759_v16, %v1759_v16 }
 0x7bf   :  { %1765 = vadd.xlane.f32.xlu0 %v1764_v39  ;;  %v1767_v42 = vadd.f32 %v1763_v40, %v1762_v26 }
 0x7c0   :  { %v1530_v41 = vpop.permute.xlu1 %1529 }
 0x7c1   :  { %v1535_v43 = vmul.f32 %v1530_v41, %v1516_v50 }
 0x7c3   :  { %1768 = vadd.xlane.f32.xlu0 %v1767_v42  ;;  %v1537_v47 = vsel %vm175_vm1, %v1535_v43, 0.0 }
 0x7c4   :  { %v1532_v44 = vpop.permute.xlu1 %1531 }
 0x7c5   :  { %v1536_v13 = vmul.f32 %v2792_v37, %v1532_v44 }
 0x7c7   :  { %v1538_v48 = vsel %vm150_vm0, %v1536_v13, 0.0 }
 0x7c8   :  { %v1539_v49 = vadd.f32 %v1538_v48, %v1537_v47 }
 0x7ca   :  { %v1540_v56 = vrot.slane %v1539_v49, 4 }
 0x7cc   :  { %v1541_v6 = vadd.f32 %v1540_v56, %v1539_v49  ;;  %v3680_v49 = vld [vmem:[%s3908_s24] sm:$0xff]   ;;  %v3685_v56 = vld [vmem:[%s3908_s24 + $0x48] sm:$0xff]  }
 0x7ce   :  { %v1542_v3 = vrot.slane %v1541_v6, 2 }
 0x7d0   :  { %v1543_v17 = vadd.f32 %v1542_v3, %v1541_v6 }
 0x7d2   :  { %v1544_v30 = vrot.slane %v1543_v17, 1 }
 0x7d4   :  { %v1545_v42 = vadd.f32 %v1544_v30, %v1543_v17  ;;  %v3706_v17 = vld [vmem:[%s3908_s24 + $0x58] sm:$0xff]  }
 0x7d9   :  { %1298 = vrot.lane.b32.xlu0 %v3554_v36, %s3097_s0  ;;  %v1302_v36 = vmul.f32 %v1297_v11, %v3609_v19 }
 0x7db   :  { %v1304_v50 = vsel %vm175_vm1, %v1302_v36, 0.0 }
 0x84c   :  { %v1766_v12 = vpop.xlane.xlu0 %1765 }
 0x84d   :  { %v1770_v55 = vmul.f32 0.00390625, %v1766_v12 }
 0x84f   :  { %v1772_v58 = vadd.f32 1e-05, %v1770_v55 }
 0x850   :  { %v1769_v59 = vpop.xlane.xlu0 %1768 }
 0x851   :  { %2991 = vrsqrt.f32 %v1772_v58  ;;  %v1771_v61 = vmul.f32 0.00390625, %v1769_v59 }
 0x853   :  { %v1773_v0 = vadd.f32 1e-05, %v1771_v61 }
 0x854   :  { %v1299_v1 = vpop.permute.xlu0 %1298 }
 0x855   :  { %2993 = vrsqrt.f32 %v1773_v0  ;;  %v1303_v37 = vmul.f32 %v3607_v2, %v1299_v1  ;;  %v3693_v0 = vld [vmem:[%s3908_s24 + $0x8] sm:$0xff]  }
 0x857   :  { %v1305_v7 = vsel %vm150_vm0, %v1303_v37, 0.0  ;;  %vm2189_vm0 = vcmask 1041408  }
 0x858   :  { %v1306_v9 = vadd.f32 %v1305_v7, %v1304_v50  ;;  %v3697_v50 = vld [vmem:[%s3908_s24 + $0x50] sm:$0xff]  }
 0x85a   :  { %v1307_v19 = vrot.slane %v1306_v9, 4 }
 0x85b   :  { %v2992_v15 = vpop.eup %2991 }
 0x85c   :  { %v1776_v2 = vmul.f32 %v2992_v15, %v1756_v29  ;;  %v1777_v20 = vmul.f32 %v2992_v15, %v1757_v31  ;;  %v1308_v22 = vadd.f32 %v1307_v19, %v1306_v9 }
 0x85e   :  { %v1791_v23 = vmul.f32 %v3647_v32, %v1776_v2  ;;  %v1792_v25 = vmul.f32 %v3650_v14, %v1777_v20  ;;  %v1309_v28 = vrot.slane %v1308_v22, 2  ;;  %v3710_v2 = vld [vmem:[%s3908_s24 + $0x18] sm:$0xff]   ;;  %v3714_v20 = vld [vmem:[%s3908_s24 + $0x60] sm:$0xff]  }
 0x85f   :  { %v2994_v35 = vpop.eup %2993 }
 0x860   :  { %v3661_v33 = vadd.f32 %v3653_v18, %v1791_v23  ;;  %v1778_v38 = vmul.f32 %v2994_v35, %v1758_v34  ;;  %v1779_v11 = vmul.f32 %v2994_v35, %v1759_v16  ;;  %v1310_v39 = vadd.f32 %v1309_v28, %v1308_v22  ;;  %v3718_v22 = vld [vmem:[%s3908_s24 + $0x20] sm:$0xff]  }
 0x861   :  { %v3664_v29 = vadd.f32 %v3656_v8, %v1792_v25  ;;  %v3722_v25 = vld [vmem:[%s3908_s24 + $0x68] sm:$0xff]  }
 0x862   :  { %v1793_v31 = vmul.f32 %v3647_v32, %v1778_v38  ;;  %v1794_v26 = vmul.f32 %v3650_v14, %v1779_v11  ;;  %v1311_v40 = vrot.slane %v1310_v39, 1  ;;  %v1810_v41 = vmul.f32 %v3661_v33, %v3661_v33  ;;  %v3726_v38 = vld [vmem:[%s3908_s24 + $0x28] sm:$0xff]  }
 0x863   :  { %v1811_v43 = vmul.f32 %v3664_v29, %v3664_v29 }
 0x864   :  { %v3673_v34 = vadd.f32 %v3653_v18, %v1793_v31  ;;  %v1312_v16 = vadd.f32 %v1311_v40, %v1310_v39  ;;  %v1809_v44 = vadd.f32 %v3656_v8, %v1794_v26  ;;  %v1814_v13 = vmul.f32 %v1810_v41, %v3661_v33  ;;  %v3730_v39 = vld [vmem:[%s3908_s24 + $0x70] sm:$0xff]  }
 0x865   :  { %v1815_v47 = vmul.f32 %v1811_v43, %v3664_v29  ;;  %v3734_v43 = vld [vmem:[%s3908_s24 + $0x30] sm:$0xff]  }
 0x866   :  { %v1546_v48 = vsel %vm781_vm12, %v1312_v16, %v1545_v42  ;;  %v1813_v51 = vmul.f32 %v1809_v44, %v1809_v44  ;;  %v1812_v52 = vmul.f32 %v3673_v34, %v3673_v34  ;;  %v1818_v12 = vmul.f32 0.044715, %v1814_v13 }
 0x867   :  { %v1547_v55 = vpack.c.bf16 %v1546_v48, %v1546_v48  ;;  %v1819_v58 = vmul.f32 0.044715, %v1815_v47  ;;  %v3739_v47 = vld [vmem:[%s3908_s24 + $0x78] sm:$0xff]  }
 0x868   :  { %v1817_v59 = vmul.f32 %v1813_v51, %v1809_v44  ;;  %v1816_v61 = vmul.f32 %v1812_v52, %v3673_v34  ;;  %v1822_v36 = vadd.f32 %v1818_v12, %v3661_v33  ;;  %v3743_v12 = vld [vmem:[%s3908_s24 + $0x38] sm:$0xff]  }
 0x869   :  { %2798 = vmatmul.mubr.msk.bf16.vlgmr.msra.gmra.mrb[20].mxu1 %vm175_vm1, %v1547_v55  ;;  %v1823_v6 = vadd.f32 %v1819_v58, %v3664_v29 }
 0x86a   :  { %2628 = vmatpush3.bf16.msra.mxu1 %v3680_v49  ;;  %v1821_v1 = vmul.f32 0.044715, %v1817_v59  ;;  %v1820_v37 = vmul.f32 0.044715, %v1816_v61  ;;  %v1826_v5 = vmul.f32 0.7978846, %v1822_v36 }
 0x86b   :  { %2629 = vmatprep.subr.bf16.mxu1 %v3685_v56  ;;  %v1827_v3 = vmul.f32 0.7978846, %v1823_v6  ;;  %v3764_v6 = vld [vmem:[%s3913_s22] ss:$0 sm:$0xff] }
 0x86c   :  { %v1825_v7 = vadd.f32 %v1821_v1, %v1809_v44  ;;  %v1824_v9 = vadd.f32 %v1820_v37, %v3673_v34 }
 0x86d   :  { %2995 = vtanh.f32 %v1827_v3 }
 0x86e   :  { %2630 = vmatpush3.bf16.msra.mxu1 %v3693_v0  ;;  %v1829_v19 = vmul.f32 0.7978846, %v1825_v7  ;;  %v1828_v15 = vmul.f32 0.7978846, %v1824_v9  ;;  %2997 = vtanh.f32 %v1826_v5 }
 0x86f   :  { %2631 = vmatprep.subr.bf16.mxu1 %v3697_v50 }
 0x870   :  { %2999 = vtanh.f32 %v1829_v19 }
 0x871   :  { %3001 = vtanh.f32 %v1828_v15 }
 0x872   :  { %2632 = vmatpush3.bf16.msra.mxu1 %v3702_v10 }
 0x873   :  { %2633 = vmatprep.subr.bf16.mxu1 %v3706_v17 }
 0x876   :  { %2634 = vmatpush3.bf16.msra.mxu1 %v3710_v2 }
 0x877   :  { %v2996_v23 = vpop.eup %2995  ;;  %2635 = vmatprep.subr.bf16.mxu1 %v3714_v20 }
 0x878   :  { %v1835_v28 = vadd.f32 1.0, %v2996_v23  ;;  %v2998_v35 = vpop.eup %2997 }
 0x879   :  { %v1834_v42 = vadd.f32 1.0, %v2998_v35 }
 0x87a   :  { %v3000_v30 = vpop.eup %2999  ;;  %2636 = vmatpush3.bf16.msra.mxu1 %v3718_v22  ;;  %v1839_v26 = vmul.f32 0.5, %v1835_v28 }
 0x87b   :  { %v3002_v11 = vpop.eup %3001  ;;  %2637 = vmatprep.subr.bf16.mxu1 %v3722_v25  ;;  %v1837_v31 = vadd.f32 1.0, %v3000_v30  ;;  %v1838_v52 = vmul.f32 0.5, %v1834_v42 }
 0x87c   :  { %v1836_v40 = vadd.f32 1.0, %v3002_v11  ;;  %v1843_v16 = vmul.f32 %v1839_v26, %v3664_v29 }
 0x87d   :  { %v1841_v41 = vmul.f32 0.5, %v1837_v31  ;;  %v1842_v58 = vmul.f32 %v1838_v52, %v3661_v33 }
 0x87e   :  { %2638 = vmatpush3.bf16.msra.mxu1 %v3726_v38  ;;  %v1840_v48 = vmul.f32 0.5, %v1836_v40 }
 0x87f   :  { %2639 = vmatprep.subr.bf16.mxu1 %v3730_v39  ;;  %v1845_v13 = vmul.f32 %v1841_v41, %v1809_v44  ;;  %v2507_v44 = vld [vmem:[%s3911_s12] ss:$0 sm:$0xff] }
 0x880   :  { %v1844_v55 = vmul.f32 %v1840_v48, %v3673_v34  ;;  %v840_v59 = vadd.f32 %v2507_v44, %v3541_v46 }
 0x881   :  { %v1847_v51 = vpack.c.bf16 %v1845_v13, %v1843_v16 }
 0x882   :  { %2640 = vmatpush3.bf16.msra.mxu1 %v3734_v43  ;;  %v1846_v29 = vpack.c.bf16 %v1844_v55, %v1842_v58  ;;  %v2144_v33 = vpack.c.bf16 %v840_v59, %v840_v59 }
 0x883   :  { %1982 = vmatprep.mubr.bf16.mxu1 %v1847_v51  ;;  %2641 = vmatprep.subr.bf16.mxu1 %v3739_v47 }
 0x886   :  { %2642 = vmatpush3.bf16.msra.mxu1 %v3743_v12 }
 0x887   :  { %2148 = vmatprep.subr.bf16.mxu1 %v3579_v57  ;;  %v2538_v57 = vld [vmem:[%s3912_s4] ss:$0 sm:$0xff] }
 0x889   :  { %1983 = vmatmul.mubr.bf16.vlgmr.msra.gmra.mrb[24].mxu1 %v1846_v29 }
 0x88a   :  { %2149 = vmatpush1.bf16.msra.mxu1 %v3586_v60  ;;  %2180 = vmatprep.mubr.bf16.mxu1 %v3092_v21 }
 0x88b   :  { %2150 = vmatprep.subr.bf16.mxu1 %v3590_v62 }
 0x88e   :  { %2151 = vmatpush1.bf16.msra.mxu1 %v3596_v63 }
 0x88f   :  { %2821 = vmatprep.subr.bf16.mxu1 %v3093_v24 }
 0x891   :  { %2575 = vmatmul.mubr.msk.bf16.vlgmr.msra.gmra.mrb[28].mxu1 %vm175_vm1, %v2144_v33  ;;  %vm2339_vm1 = vcmask 523264  }
 0x892   :  { %2837 = vmatprep.mubr.msk.bf16.mxu1 %vm3094_vm2, %v3093_v24 }
 0x93c   :  { %v1603_v34 = vpop.f32.mrb[20].mxu1 }
 0x93d   :  { %v1604_v60 = vadd.f32 %v2538_v57, %v1603_v34  ;;  %v2799_v61 = vpop.f32.mrb[21].mxu1 }
 0x93e   :  { %v1606_v21 = vpop.f32.mrb[22].mxu1 }
 0x93f   :  { %1609 = vst.msk [vmem:[%s3284_s20] sm:$0x3] %vm878_vm3, %v1604_v60  ;;  %v2800_v46 = vpop.f32.mrb[23].mxu1  ;;  %s3914_s20 = sld [smem:[#allocation22_spill]] }
 0x945   :  { %v2949_v57 = vld [vmem:[%s3914_s20] sm:$0xff]   ;;  %v2950_v34 = vld [vmem:[%s3914_s20 + $0x8] sm:$0xff]   ;;  %v2951_v60 = vld [vmem:[%s3914_s20 + $0x10] sm:$0xff]  }
 0x946   :  { %2802 = vmatpush3.bf16.msra.mxu0 %v2949_v57  ;;  %2822 = vmatpush3.bf16.msra.mxu1 %v2949_v57  ;;  %v2952_v61 = vld [vmem:[%s3914_s20 + $0x18] sm:$0xff]   ;;  %v2953_v21 = vld [vmem:[%s3914_s20 + $0x20] sm:$0xff]   ;;  %v2954_v46 = vld [vmem:[%s3914_s20 + $0x28] sm:$0xff]  }
 0x947   :  { %2803 = vmatprep.subr.bf16.mxu0 %v3093_v24  ;;  %2823 = vmatprep.subr.bf16.mxu1 %v3093_v24 }
 0x94a   :  { %2804 = vmatpush3.bf16.msra.mxu0 %v2950_v34  ;;  %2824 = vmatpush3.bf16.msra.mxu1 %v2950_v34 }
 0x94b   :  { %2805 = vmatprep.subr.bf16.mxu0 %v3093_v24  ;;  %2825 = vmatprep.subr.bf16.mxu1 %v3093_v24 }
 0x94e   :  { %2806 = vmatpush3.bf16.msra.mxu0 %v2951_v60  ;;  %2826 = vmatpush3.bf16.msra.mxu1 %v2951_v60 }
 0x94f   :  { %2807 = vmatprep.subr.bf16.mxu0 %v3093_v24  ;;  %2827 = vmatprep.subr.bf16.mxu1 %v3093_v24 }
 0x952   :  { %2808 = vmatpush3.bf16.msra.mxu0 %v2952_v61  ;;  %2828 = vmatpush3.bf16.msra.mxu1 %v2952_v61 }
 0x953   :  { %2809 = vmatprep.subr.bf16.mxu0 %v3093_v24  ;;  %2829 = vmatprep.subr.bf16.mxu1 %v3093_v24 }
 0x956   :  { %2810 = vmatpush3.bf16.msra.mxu0 %v2953_v21  ;;  %2830 = vmatpush3.bf16.msra.mxu1 %v2953_v21 }
 0x957   :  { %2811 = vmatprep.subr.bf16.mxu0 %v3093_v24  ;;  %2831 = vmatprep.subr.bf16.mxu1 %v3093_v24 }
 0x95a   :  { %2812 = vmatpush3.bf16.msra.mxu0 %v2954_v46  ;;  %2832 = vmatpush3.bf16.msra.mxu1 %v2954_v46 }
 0x95b   :  { %2813 = vmatprep.subr.bf16.mxu0 %v3093_v24  ;;  %2833 = vmatprep.subr.bf16.mxu1 %v3093_v24 }
 0x95c   :  { %v2643_v36 = vpop.f32.mrb[24].mxu1 }
 0x95d   :  { %v2644_v62 = vpop.f32.mrb[25].mxu1 }
 0x95e   :  { %v2645_v63 = vadd.f32 %v2644_v62, %v2643_v36  ;;  %v2646_v1 = vpop.f32.mrb[26].mxu1  ;;  %v2955_v36 = vld [vmem:[%s3914_s20 + $0x30] sm:$0xff]   ;;  %v2956_v62 = vld [vmem:[%s3914_s20 + $0x38] sm:$0xff]  }
 0x95f   :  { %v2647_v37 = vpop.f32.mrb[27].mxu1  ;;  %2814 = vmatpush3.bf16.msra.mxu0 %v2955_v36  ;;  %2834 = vmatpush3.bf16.msra.mxu1 %v2955_v36 }
 0x960   :  { %v2648_v3 = vadd.f32 %v2647_v37, %v2646_v1  ;;  %v1985_v5 = vadd.f32 %v2645_v63, %v3764_v6  ;;  %2815 = vmatprep.subr.bf16.mxu0 %v3093_v24  ;;  %2835 = vmatprep.subr.bf16.mxu1 %v3093_v24 }
 0x962   :  { %1991 = vadd.xlane.f32.xlu0 %v1985_v5  ;;  %v1988_v7 = vadd.f32 %v2648_v3, %v3764_v6 }
 0x963   :  { %2816 = vmatpush3.bf16.msra.mxu0 %v2956_v62  ;;  %2836 = vmatpush3.bf16.msra.mxu1 %v2956_v62 }
 0x964   :  { %v2182_v9 = vpop.f32.mrb[28].mxu1  ;;  %1993 = vadd.xlane.f32.xlu1 %v1988_v7  ;;  %2658 = vmatprep.subr.bf16.mxu0 %v3637_v54 }
 0x965   :  { %v2183_v19 = vadd.f32 %v2182_v9, %v3613_v27  ;;  %v2184_v15 = vpop.f32.mrb[29].mxu1 }
 0x966   :  { %v2185_v23 = vadd.f32 %v2184_v15, %v3616_v4  ;;  %v2186_v28 = vpop.f32.mrb[30].mxu1 }
 0x967   :  { %v2187_v35 = vpop.f32.mrb[31].mxu1  ;;  %v2190_v30 = vsel %vm2189_vm0, %v2183_v19, 0.0 }
 0x968   :  { %v2191_v11 = vsel %vm2189_vm0, %v2185_v23, 0.0 }
 0x969   :  { %v2192_v31 = vadd.f32 %v2191_v11, %v2190_v30  ;;  %v3818_v30 = vld [vmem:[%s3916_s26] ss:$0 sm:$0xff] }
 0x96b   :  { %2193 = vadd.xlane.f32.xlu0 %v2192_v31 }
 0x9ef   :  { %v1992_v26 = vpop.xlane.xlu0 %1991 }
 0x9f0   :  { %v1996_v40 = vmul.f32 0.0078125, %v1992_v26 }
 0x9f1   :  { %v1994_v41 = vpop.xlane.xlu1 %1993 }
 0x9f2   :  { %v3772_v42 = vsub.f32 %v1985_v5, %v1996_v40  ;;  %v1997_v16 = vmul.f32 0.0078125, %v1994_v41 }
 0x9f4   :  { %v3774_v13 = vsub.f32 %v1988_v7, %v1997_v16  ;;  %v2000_v27 = vmul.f32 %v3772_v42, %v3772_v42 }
 0x9f6   :  { %2002 = vadd.xlane.f32.xlu0 %v2000_v27  ;;  %v2001_v4 = vmul.f32 %v3774_v13, %v3774_v13 }
 0x9f8   :  { %2004 = vadd.xlane.f32.xlu1 %v2001_v4  ;;  %v2194_v48 = vpop.xlane.xlu0 %2193 }
 0x9f9   :  { %v2195_v51 = vmul.f32 0.00390625, %v2194_v48 }
 0x9fb   :  { %v3780_v52 = vsub.f32 %v2183_v19, %v2195_v51  ;;  %v3782_v55 = vsub.f32 %v2185_v23, %v2195_v51  ;;  %v3814_v23 = vld [vmem:[%s3915_s23] ss:$0 sm:$0xff] }
 0x9fd   :  { %v2198_v58 = vmul.f32 %v3780_v52, %v3780_v52  ;;  %v2199_v29 = vmul.f32 %v3782_v55, %v3782_v55 }
 0x9ff   :  { %v2200_v44 = vsel %vm2189_vm0, %v2198_v58, 0.0  ;;  %v2201_v59 = vsel %vm2189_vm0, %v2199_v29, 0.0 }
 0xa00   :  { %v2202_v33 = vadd.f32 %v2201_v59, %v2200_v44 }
 0xa02   :  { %2203 = vadd.xlane.f32.xlu0 %v2202_v33 }
 0xa83   :  { %v2003_v63 = vpop.xlane.xlu0 %2002 }
 0xa84   :  { %v2006_v1 = vmul.f32 0.0078125, %v2003_v63 }
 0xa85   :  { %v2005_v37 = vpop.xlane.xlu1 %2004 }
 0xa86   :  { %v2008_v3 = vadd.f32 1e-05, %v2006_v1  ;;  %v2007_v5 = vmul.f32 0.0078125, %v2005_v37 }
 0xa88   :  { %3003 = vrsqrt.f32 %v2008_v3  ;;  %v2009_v7 = vadd.f32 1e-05, %v2007_v5 }
 0xa8a   :  { %3005 = vrsqrt.f32 %v2009_v7 }
 0xa8f   :  { %v2204_v9 = vpop.xlane.xlu0 %2203 }
 0xa90   :  { %v2205_v19 = vmul.f32 0.00390625, %v2204_v9 }
 0xa92   :  { %v3004_v15 = vpop.eup %3003  ;;  %v2206_v28 = vadd.f32 1e-05, %v2205_v19 }
 0xa93   :  { %v2012_v24 = vmul.f32 %v3004_v15, %v3772_v42 }
 0xa94   :  { %v3006_v35 = vpop.eup %3005  ;;  %3007 = vrsqrt.f32 %v2206_v28 }
 0xa95   :  { %v2020_v54 = vmul.f32 %v3814_v23, %v2012_v24  ;;  %v2013_v11 = vmul.f32 %v3006_v35, %v3774_v13 }
 0xa97   :  { %v2028_v31 = vadd.f32 %v3818_v30, %v2020_v54  ;;  %v2021_v26 = vmul.f32 %v3814_v23, %v2013_v11 }
 0xa99   :  { %v2029_v40 = vadd.f32 %v3818_v30, %v2021_v26  ;;  %v2030_v41 = vmul.f32 %v2028_v31, %v2028_v31 }
 0xa9b   :  { %v2031_v16 = vmul.f32 %v2029_v40, %v2029_v40  ;;  %v2032_v27 = vmul.f32 %v2030_v41, %v2028_v31 }
 0xa9d   :  { %v2033_v4 = vmul.f32 %v2031_v16, %v2029_v40  ;;  %v2034_v48 = vmul.f32 0.044715, %v2032_v27 }
 0xa9e   :  { %v3008_v42 = vpop.eup %3007 }
 0xa9f   :  { %v2208_v51 = vmul.f32 %v3008_v42, %v3780_v52  ;;  %v2209_v58 = vmul.f32 %v3008_v42, %v3782_v55  ;;  %v2035_v29 = vmul.f32 0.044715, %v2033_v4  ;;  %v2036_v44 = vadd.f32 %v2034_v48, %v2028_v31 }
 0xaa1   :  { %v2210_v13 = vmul.f32 %v2208_v51, %v3647_v32  ;;  %v2037_v59 = vadd.f32 %v2035_v29, %v2029_v40  ;;  %v2038_v33 = vmul.f32 0.7978846, %v2036_v44  ;;  %v2211_v57 = vmul.f32 %v2209_v58, %v3650_v14 }
 0xaa3   :  { %v2039_v34 = vmul.f32 0.7978846, %v2037_v59  ;;  %3009 = vtanh.f32 %v2038_v33  ;;  %v2213_v60 = vadd.f32 %v2211_v57, %v3656_v8  ;;  %v2212_v21 = vadd.f32 %v2210_v13, %v3653_v18 }
 0xaa5   :  { %3011 = vtanh.f32 %v2039_v34  ;;  %v2215_v61 = vmul.f32 %v2213_v60, %v2213_v60  ;;  %v2214_v36 = vmul.f32 %v2212_v21, %v2212_v21 }
 0xaa7   :  { %v2217_v46 = vmul.f32 %v2215_v61, %v2213_v60  ;;  %v2216_v1 = vmul.f32 %v2214_v36, %v2212_v21 }
 0xaa9   :  { %v2219_v52 = vmul.f32 0.044715, %v2217_v46  ;;  %v2218_v5 = vmul.f32 0.044715, %v2216_v1 }
 0xaab   :  { %v2221_v55 = vadd.f32 %v2219_v52, %v2213_v60  ;;  %v2220_v19 = vadd.f32 %v2218_v5, %v2212_v21 }
 0xaad   :  { %v3010_v62 = vpop.eup %3009  ;;  %v2223_v63 = vmul.f32 0.7978846, %v2221_v55  ;;  %v2222_v28 = vmul.f32 0.7978846, %v2220_v19 }
 0xaae   :  { %v2042_v32 = vadd.f32 1.0, %v3010_v62 }
 0xaaf   :  { %v3012_v37 = vpop.eup %3011  ;;  %3013 = vtanh.f32 %v2223_v63 }
 0xab0   :  { %v2043_v3 = vadd.f32 1.0, %v3012_v37  ;;  %v2044_v14 = vmul.f32 0.5, %v2042_v32  ;;  %3015 = vtanh.f32 %v2222_v28 }
 0xab2   :  { %v2045_v7 = vmul.f32 0.5, %v2043_v3  ;;  %v2046_v9 = vmul.f32 %v2044_v14, %v2028_v31 }
 0xab4   :  { %v2047_v8 = vmul.f32 %v2045_v7, %v2029_v40 }
 0xab6   :  { %v2048_v15 = vpack.c.bf16 %v2047_v8, %v2046_v9 }
 0xab8   :  { %2818 = vmatmul.mubr.bf16.vlgmr.msra.gmra.mrb[24].mxu0 %v2048_v15 }
 0xab9   :  { %v3014_v18 = vpop.eup %3013  ;;  %2659 = vmatpush3.bf16.msra.mxu0 %v3680_v49 }
 0xaba   :  { %2660 = vmatprep.subr.bf16.mxu0 %v3685_v56  ;;  %v2227_v24 = vadd.f32 1.0, %v3014_v18  ;;  %v3016_v49 = vpop.eup %3015 }
 0xabb   :  { %v2226_v56 = vadd.f32 1.0, %v3016_v49 }
 0xabc   :  { %v2229_v35 = vmul.f32 0.5, %v2227_v24 }
 0xabd   :  { %2661 = vmatpush3.bf16.msra.mxu0 %v3693_v0  ;;  %v2228_v0 = vmul.f32 0.5, %v2226_v56 }
 0xabe   :  { %2662 = vmatprep.subr.bf16.mxu0 %v3697_v50  ;;  %v2231_v54 = vmul.f32 %v2229_v35, %v2213_v60 }
 0xabf   :  { %v2230_v50 = vmul.f32 %v2228_v0, %v2212_v21 }
 0xac0   :  { %v2233_v11 = vpack.c.bf16 %v2231_v54, %v2231_v54 }
 0xac1   :  { %2663 = vmatpush3.bf16.msra.mxu0 %v3702_v10  ;;  %v2232_v10 = vpack.c.bf16 %v2230_v50, %v2230_v50 }
 0xac2   :  { %2266 = vmatprep.mubr.bf16.mxu0 %v2233_v11  ;;  %2664 = vmatprep.subr.bf16.mxu0 %v3706_v17  ;;  %v2566_v17 = vld [vmem:[%s3269_s27] ss:$0 sm:$0xff]  ;;  %s3098_s27 = smov [#allocation2]  }
 0xac3   :  { %s2426_s28 = sshll.u32 %s3098_s27, 4  ;;  %s2427_s28 = int_to_ptr.vmem [resolvable:$true] %s2426_s28 }
 0xac4   :  { %s3033_s1 = scalar_lea.vmem %s2427_s28, 256  ;;  %p3038_p1 = scmp.lt.s32.totalorder %s2427_s28, %s2427_s28 }
 0xac5   :  { %2665 = vmatpush3.bf16.msra.mxu0 %v3710_v2  ;;  %p3034_p0 = scmp.ne.s32.totalorder %s2427_s28, %s3033_s1  ;;  %p3039_p2 = scmp.lt.s32.totalorder %s3033_s1, %s3033_s1 }
 0xac6   :  { %2666 = vmatprep.subr.bf16.mxu0 %v3714_v20 }
 0xac7   :  { %p3040_p3 = por %p3039_p2, %p3038_p1 }
 0xac9   :  { %2667 = vmatpush3.bf16.msra.mxu0 %v3718_v22  ;;  %p3041_p4 = pnand %p3040_p3, %p3034_p0 }
 0xaca   :  { %2668 = vmatprep.subr.bf16.mxu0 %v3722_v25 }
 0xacd   :  { %2669 = vmatpush3.bf16.msra.mxu0 %v3726_v38 }
 0xace   :  { %2670 = vmatprep.subr.bf16.mxu0 %v3730_v39 }
 0xad1   :  { %2671 = vmatpush3.bf16.msra.mxu0 %v3734_v43 }
 0xad2   :  { %2672 = vmatprep.subr.bf16.mxu0 %v3739_v47 }
 0xad5   :  { %2673 = vmatpush3.bf16.msra.mxu0 %v3743_v12 }
 0xad8   :  { %2267 = vmatmul.mubr.bf16.vlgmr.msra.gmra.mrb[28].mxu0 %v2232_v10 }
 0xb8b   :  { %v2137_v2 = vpop.f32.mrb[24].mxu0 }
 0xb8c   :  { %v2138_v20 = vadd.f32 %v2566_v17, %v2137_v2  ;;  %v2819_v22 = vpop.f32.mrb[25].mxu0 }
 0xb8d   :  { %v2140_v25 = vpop.f32.mrb[26].mxu0 }
 0xb8e   :  { %2340 = vst.msk [vmem:[#allocation2] sm:$0xff] %vm2339_vm1, %v2138_v20  ;;  %v2141_v38 = vadd.f32 %v2566_v17, %v2140_v25  ;;  %v2820_v39 = vpop.f32.mrb[27].mxu0  ;;  %v2350_v16 = vmul.f32 %v2138_v20, %v2138_v20 }
 0xb90   :  { %2341 = vst.msk [vmem:[#allocation2 + $0x8] sm:$0xff] %vm2339_vm1, %v2141_v38  ;;  %v2352_v27 = vsel %vm2339_vm1, %v2350_v16, 0.0  ;;  %v2351_v29 = vmul.f32 %v2141_v38, %v2141_v38 }
 0xb92   :  { %v2355_v44 = vsel %vm2339_vm1, %v2351_v29, 0.0 }
 0xbab   :  { %v2674_v43 = vpop.f32.mrb[28].mxu0 }
 0xbac   :  { %v2675_v31 = vpop.f32.mrb[29].mxu0 }
 0xbad   :  { %v2676_v47 = vadd.f32 %v2675_v31, %v2674_v43  ;;  %v2677_v26 = vpop.f32.mrb[30].mxu0 }
 0xbae   :  { %v2678_v40 = vpop.f32.mrb[31].mxu0 }
 0xbaf   :  { %v2269_v12 = vadd.f32 %v2676_v47, %v3764_v6 }
 0xbb1   :  { %v2274_v41 = vsel %vm2189_vm0, %v2269_v12, 0.0 }
 0xbb2   :  { %2275 = vadd.xlane.f32.xlu1 %v2274_v41 }
 0xbb6   :  { %2353 = vadd.xlane.f32.xlu1 %v2352_v27 }
 0xc3f   :  { %v2276_v4 = vpop.xlane.xlu1 %2275 }
 0xc40   :  { %v2277_v48 = vmul.f32 0.0078125, %v2276_v4 }
 0xc42   :  { %v2278_v42 = vsub.f32 %v2269_v12, %v2277_v48 }
 0xc44   :  { %v2279_v51 = vmul.f32 %v2278_v42, %v2278_v42 }
 0xc46   :  { %v2280_v58 = vsel %vm2189_vm0, %v2279_v51, 0.0 }
 0xc47   :  { %2281 = vadd.xlane.f32.xlu0 %v2280_v58 }
 0xc4b   :  { %2356 = vadd.xlane.f32.xlu0 %v2355_v44 }
 0xcd4   :  { %v2282_v13 = vpop.xlane.xlu0 %2281 }
 0xcd5   :  { %v2283_v6 = vmul.f32 0.0078125, %v2282_v13 }
 0xcd7   :  { %v2284_v59 = vadd.f32 1e-05, %v2283_v6 }
 0xcd9   :  { %3017 = vrsqrt.f32 %v2284_v59 }
 0xce3   :  { %v3018_v33 = vpop.eup %3017 }
 0xce4   :  { %v2286_v57 = vmul.f32 %v3018_v33, %v2278_v42 }
 0xce6   :  { %v2287_v34 = vmul.f32 %v3814_v23, %v2286_v57 }
 0xce8   :  { %v2288_v60 = vadd.f32 %v3818_v30, %v2287_v34 }
 0xcea   :  { %v2289_v61 = vmul.f32 %v2288_v60, %v2288_v60 }
 0xcec   :  { %v2290_v21 = vmul.f32 %v2289_v61, %v2288_v60 }
 0xcee   :  { %v2291_v46 = vmul.f32 0.044715, %v2290_v21 }
 0xcf0   :  { %v2292_v52 = vadd.f32 %v2291_v46, %v2288_v60 }
 0xcf2   :  { %v2293_v36 = vmul.f32 0.7978846, %v2292_v52 }
 0xcf4   :  { %3019 = vtanh.f32 %v2293_v36 }
 0xcfe   :  { %v3020_v55 = vpop.eup %3019 }
 0xcff   :  { %v2295_v62 = vadd.f32 1.0, %v3020_v55 }
 0xd01   :  { %v2296_v63 = vmul.f32 0.5, %v2295_v62 }
 0xd03   :  { %v2297_v1 = vmul.f32 %v2296_v63, %v2288_v60 }
 0xd05   :  { %v2298_v32 = vpack.c.bf16 %v2297_v1, %v2297_v1 }
 0xd07   :  { %2838 = vmatmul.mubr.bf16.vlgmr.msra.gmra.mrb[32].mxu1 %v2298_v32 }
 0xdda   :  { %v2333_v37 = vpop.f32.mrb[32].mxu1 }
 0xddb   :  { %v2334_v3 = vadd.f32 %v2566_v17, %v2333_v37  ;;  %v2839_v14 = vpop.f32.mrb[33].mxu1 }
 0xddc   :  { %v2336_v5 = vpop.f32.mrb[34].mxu1 }
 0xddd   :  { %v2345_v23 = vrot.slane %v2334_v3, %v3356_v53  ;;  %v2349_v30 = vrot.slane %v2334_v3, %v3432_v45  ;;  %v2840_v7 = vpop.f32.mrb[35].mxu1 }
 0xddf   :  { %v2373_v9 = vmul.f32 %v2349_v30, %v2349_v30  ;;  %v2372_v8 = vmul.f32 %v2345_v23, %v2345_v23  ;;  %v2401_v18 = vmul.f32 %v2349_v30, %v2141_v38  ;;  %v2400_v28 = vmul.f32 %v2345_v23, %v2138_v20 }
 0xde1   :  { %v2377_v19 = vsel %vm2339_vm1, %v2373_v9, 0.0  ;;  %v2374_v15 = vsel %vm2339_vm1, %v2372_v8, 0.0  ;;  %v2405_v24 = vsel %vm2339_vm1, %v2401_v18, 0.0  ;;  %v2402_v35 = vsel %vm2339_vm1, %v2400_v28, 0.0 }
 0xde2   :  { %2378 = vadd.xlane.f32.xlu0 %v2377_v19  ;;  %2375 = vadd.xlane.f32.xlu1 %v2374_v15 }
 0xde6   :  { %2406 = vadd.xlane.f32.xlu0 %v2405_v24  ;;  %2403 = vadd.xlane.f32.xlu1 %v2402_v35 }
 0xde7   :  { %3044 = shalt.err (!%p3041_p4)
}
 0xde8   :  { %s3045_s2 = scalar_lea.hbm %s3274_s19, 256 }
 0xde9   :  { %p3046_p5 = scmp.ne.s32.totalorder %s3274_s19, %s3045_s2  ;;  %p3049_p6 = scmp.lt.u32.totalorder %s3045_s2, %s3274_s19 }
 0xdeb   :  { %p3051_p7 = pnand %p3049_p6, %p3046_p5 }
 0xded   :  { %3054 = shalt.err (!%p3051_p7)
}
 0xdee   :  { %s3099_s7 = smov 128   ;;  %s3100_s10 = smov 8   ;;  %v2354_v53 = vpop.xlane.xlu1 %2353  ;;  %v2357_v45 = vpop.xlane.xlu0 %2356  ;;  %vm2418_vm8 = vcmask 7168  }
 0xdef   :  { %2432 = dma.vmem_to_hbm [thread:$0]  %s2427_s28, 256, %s3274_s19, [#allocation3], %s3099_s7, %s3099_s7, %s3100_s10   ;;  %3021 = vrsqrt.f32 %v2354_v53  ;;  %vm2360_vm2 = vcmp.eq.f32.partialorder %v2354_v53, inf  ;;  %vm2362_vm3 = vcmp.eq.f32.partialorder %v2354_v53, 0.0  ;;  %v2363_v17 = vand.u32 2147483648, %v2354_v53 }
 0xdf0   :  { %3023 = vrsqrt.f32 %v2357_v45  ;;  %vm2367_vm14 = vcmp.eq.f32.partialorder %v2357_v45, inf  ;;  %vm2369_vm15 = vcmp.eq.f32.partialorder %v2357_v45, 0.0  ;;  %v2370_v38 = vand.u32 2147483648, %v2357_v45 }
 0xdf9   :  { %v3022_v49 = vpop.eup %3021 }
 0xdfa   :  { %v3024_v56 = vpop.eup %3023  ;;  %v2359_v0 = vmul.f32 %v3022_v49, %v2354_v53 }
 0xdfb   :  { %v2366_v50 = vmul.f32 %v3024_v56, %v2357_v45 }
 0xdfc   :  { %v2361_v20 = vsel %vm2360_vm2, %v2354_v53, %v2359_v0 }
 0xdfd   :  { %v2368_v22 = vsel %vm2367_vm14, %v2357_v45, %v2366_v50  ;;  %v2364_v16 = vsel %vm2362_vm3, %v2363_v17, %v2361_v20 }
 0xdfe   :  { %v2371_v40 = vsel %vm2369_vm15, %v2370_v38, %v2368_v22 }
 0xe6f   :  { %v2379_v54 = vpop.xlane.xlu0 %2378  ;;  %v2376_v11 = vpop.xlane.xlu1 %2375 }
 0xe70   :  { %3025 = vrsqrt.f32 %v2379_v54  ;;  %vm2389_vm4 = vcmp.eq.f32.partialorder %v2379_v54, inf  ;;  %v2392_v39 = vand.u32 2147483648, %v2379_v54  ;;  %vm2391_vm5 = vcmp.eq.f32.partialorder %v2379_v54, 0.0 }
 0xe71   :  { %3027 = vrsqrt.f32 %v2376_v11  ;;  %vm2382_vm6 = vcmp.eq.f32.partialorder %v2376_v11, inf  ;;  %v2385_v47 = vand.u32 2147483648, %v2376_v11  ;;  %vm2384_vm7 = vcmp.eq.f32.partialorder %v2376_v11, 0.0 }
 0xe73   :  { %v2407_v58 = vpop.xlane.xlu0 %2406  ;;  %v2404_v13 = vpop.xlane.xlu1 %2403 }
 0xe7a   :  { %v3026_v10 = vpop.eup %3025 }
 0xe7b   :  { %v3028_v2 = vpop.eup %3027  ;;  %v2388_v25 = vmul.f32 %v3026_v10, %v2379_v54 }
 0xe7c   :  { %v2381_v43 = vmul.f32 %v3028_v2, %v2376_v11 }
 0xe7d   :  { %v2390_v31 = vsel %vm2389_vm4, %v2379_v54, %v2388_v25 }
 0xe7e   :  { %v2383_v26 = vsel %vm2382_vm6, %v2376_v11, %v2381_v43  ;;  %v2393_v12 = vsel %vm2391_vm5, %v2392_v39, %v2390_v31 }
 0xe7f   :  { %v2395_v41 = vmul.f32 %v2393_v12, %v2371_v40  ;;  %v2386_v27 = vsel %vm2384_vm7, %v2385_v47, %v2383_v26 }
 0xe80   :  { %v2394_v4 = vmul.f32 %v2386_v27, %v2364_v16 }
 0xe81   :  { %v2397_v48 = vmax.f32 %v2395_v41, 1e-12 }
 0xe82   :  { %v2396_v42 = vmax.f32 %v2394_v4, 1e-12 }
 0xe83   :  { %3029 = vrcp.f32 %v2397_v48 }
 0xe84   :  { %3031 = vrcp.f32 %v2396_v42 }
 0xe8d   :  { %v3030_v51 = vpop.eup %3029 }
 0xe8e   :  { %v3032_v29 = vpop.eup %3031  ;;  %v2409_v44 = vmul.f32 %v3030_v51, %v2407_v58 }
 0xe8f   :  { %v2408_v6 = vmul.f32 %v3032_v29, %v2404_v13 }
 0xe90   :  { %v2411_v59 = vadd.f32 1.0, %v2409_v44 }
 0xe91   :  { %v2410_v33 = vadd.f32 1.0, %v2408_v6 }
 0xe92   :  { %v2413_v57 = vmul.f32 0.5, %v2411_v59 }
 0xe93   :  { %v2412_v34 = vmul.f32 0.5, %v2410_v33 }
 0xe94   :  { %v2415_v60 = vmax.f32 %v2413_v57, 0.0 }
 0xe95   :  { %v2414_v61 = vmax.f32 %v2412_v34, 0.0 }
 0xe96   :  { %v2417_v21 = vmin.f32 %v2415_v60, 1.0 }
 0xe97   :  { %v2416_v46 = vmin.f32 %v2414_v61, 1.0 }
 0xe98   :  { %2420 = vst.msk [vmem:[%s3279_s5 + $0x8] sm:$0xff] %vm2418_vm8, %v2417_v21 }
 0xe99   :  { %2419 = vst.msk [vmem:[%s3279_s5] sm:$0xff] %vm2418_vm8, %v2416_v46 }
 0xe9a   :  { %3055 = dma.done.wait [#allocation3], 256  }
 0xe9b   :  { %3056 = vsyncadd [#allocation3], 4294967040 }
 0xe9c   :  { %2444 = vsyncpa [#allocation3], 1 }

// kernel: extra_modal_modeling_forward.7
= control target key start
LH: loop header
LB: loop body
LE: loop exit
PB: predicated region body
PF: predicated region fallthrough
CT: control target
= control target key end

     0   :  { %s3028_s6 = smov 1   ;;  %s3029_s10 = smov 2   ;;  %s3640_s0 = inlined_call_operand.smem [shape: u32[37], index: -1, kind: input, shape index: {}] }
   0x1   :  { %s3080_s5 = sld [smem:[%s3640_s0]]   ;;  %s3030_s14 = smov 3  }
   0x2   :  { %s3085_s9 = sld [smem:[%s3640_s0 + %s3028_s6]]   ;;  %s3031_s18 = smov 4  }
   0x3   :  { %s3090_s13 = sld [smem:[%s3640_s0 + %s3029_s10]]   ;;  %s3032_s22 = smov 5  }
   0x4   :  { %s3095_s17 = sld [smem:[%s3640_s0 + %s3030_s14]]   ;;  %s3033_s26 = smov 6  }
   0x5   :  { %s3100_s21 = sld [smem:[%s3640_s0 + %s3031_s18]]   ;;  %s3034_s30 = smov 7  }
   0x6   :  { %s3105_s25 = sld [smem:[%s3640_s0 + %s3032_s22]]   ;;  %s3035_s4 = smov 8  }
   0x7   :  { %s3110_s29 = sld [smem:[%s3640_s0 + %s3033_s26]]   ;;  %s3036_s10 = smov 9  }
   0x8   :  { %s3115_s3 = sld [smem:[%s3640_s0 + %s3034_s30]]   ;;  %s3037_s15 = smov 10  }
   0x9   :  { %s3120_s8 = sld [smem:[%s3640_s0 + %s3035_s4]]   ;;  %s3038_s20 = smov 11  }
   0xa   :  { %s3125_s14 = sld [smem:[%s3640_s0 + %s3036_s10]]   ;;  %s3039_s26 = smov 12  }
   0xb   :  { %s3130_s19 = sld [smem:[%s3640_s0 + %s3037_s15]]   ;;  %s3040_s1 = smov 13  }
   0xc   :  { %s3135_s24 = sld [smem:[%s3640_s0 + %s3038_s20]]   ;;  %s3041_s7 = smov 14  }
   0xd   :  { %s3140_s30 = sld [smem:[%s3640_s0 + %s3039_s26]]   ;;  %s3042_s15 = smov 15  }
   0xe   :  { %s3145_s6 = sld [smem:[%s3640_s0 + %s3040_s1]]   ;;  %s3043_s22 = smov 16  }
   0xf   :  { %s3150_s12 = sld [smem:[%s3640_s0 + %s3041_s7]]   ;;  %s3044_s28 = smov 17  }
  0x10   :  { %s3155_s20 = sld [smem:[%s3640_s0 + %s3042_s15]]   ;;  %s3045_s7 = smov 18  }
  0x11   :  { %s3160_s27 = sld [smem:[%s3640_s0 + %s3043_s22]]   ;;  %s3046_s15 = smov 19  }
  0x12   :  { %s3165_s4 = sld [smem:[%s3640_s0 + %s3044_s28]]   ;;  %s3047_s22 = smov 20  }
  0x13   :  { %s3048_s28 = smov 21  }
  0x14   :  { %3647 = sst [smem:[#allocation11_spill]] %s3145_s6 }
  0x15   :  { %s3170_s6 = sld [smem:[%s3640_s0 + %s3045_s7]]   ;;  %s3049_s7 = smov 22  }
  0x16   :  { %3648 = sst [smem:[#allocation12_spill]] %s3155_s20 }
  0x17   :  { %3649 = sst [smem:[#allocation13_spill]] %s3160_s27 }
  0x18   :  { %3650 = sst [smem:[#allocation14_spill]] %s3165_s4 }
  0x19   :  { %s3175_s20 = sld [smem:[%s3640_s0 + %s3046_s15]]   ;;  %s3050_s15 = smov 23  }
  0x1a   :  { %s3180_s27 = sld [smem:[%s3640_s0 + %s3047_s22]]   ;;  %s3051_s22 = smov 24  }
  0x1b   :  { %3651 = sst [smem:[#allocation15_spill]] %s3170_s6 }
  0x1c   :  { %s3185_s4 = sld [smem:[%s3640_s0 + %s3048_s28]]   ;;  %s3052_s28 = smov 25  }
  0x1d   :  { %s3190_s6 = sld [smem:[%s3640_s0 + %s3049_s7]]   ;;  %s3053_s7 = smov 26  }
  0x1f   :  { %3652 = sst [smem:[#allocation16_spill]] %s3175_s20 }
  0x20   :  { %3653 = sst [smem:[#allocation17_spill]] %s3180_s27 }
  0x21   :  { %s3195_s20 = sld [smem:[%s3640_s0 + %s3050_s15]]   ;;  %s3054_s15 = smov 27  }
  0x22   :  { %3654 = sst [smem:[#allocation18_spill]] %s3185_s4 }
  0x23   :  { %3655 = sst [smem:[#allocation19_spill]] %s3190_s6 }
  0x24   :  { %s3200_s27 = sld [smem:[%s3640_s0 + %s3051_s22]]   ;;  %s3055_s22 = smov 28  }
  0x25   :  { %s3205_s4 = sld [smem:[%s3640_s0 + %s3052_s28]]   ;;  %s3056_s28 = smov 29  }
  0x26   :  { %s3210_s6 = sld [smem:[%s3640_s0 + %s3053_s7]]   ;;  %s3057_s7 = smov 30  }
  0x27   :  { %3656 = sst [smem:[#allocation20_spill]] %s3195_s20 }
  0x28   :  { %s3215_s20 = sld [smem:[%s3640_s0 + %s3054_s15]]   ;;  %s3058_s15 = smov 31  }
  0x2a   :  { %3657 = sst [smem:[#allocation21_spill]] %s3200_s27 }
  0x2b   :  { %3658 = sst [smem:[#allocation22_spill]] %s3205_s4 }
  0x2c   :  { %3659 = sst [smem:[#allocation23_spill]] %s3210_s6 }
  0x2d   :  { %s3220_s27 = sld [smem:[%s3640_s0 + %s3055_s22]]   ;;  %s3059_s22 = smov 32  }
  0x2e   :  { %3660 = sst [smem:[#allocation24_spill]] %s3215_s20 }
  0x2f   :  { %s3225_s4 = sld [smem:[%s3640_s0 + %s3056_s28]]   ;;  %s3060_s28 = smov 33  }
  0x30   :  { %s3230_s6 = sld [smem:[%s3640_s0 + %s3057_s7]]   ;;  %s3061_s7 = smov 34  }
  0x31   :  { %s3235_s20 = sld [smem:[%s3640_s0 + %s3058_s15]]   ;;  %s3062_s15 = smov 35  }
  0x33   :  { %3661 = sst [smem:[#allocation25_spill]] %s3220_s27 }
  0x34   :  { %s3240_s27 = sld [smem:[%s3640_s0 + %s3059_s22]]   ;;  %s3063_s22 = smov 36  }
  0x35   :  { %3662 = sst [smem:[#allocation26_spill]] %s3225_s4 }
  0x36   :  { %3663 = sst [smem:[#allocation27_spill]] %s3230_s6 }
  0x37   :  { %3664 = sst [smem:[#allocation28_spill]] %s3235_s20 }
  0x38   :  { %s3245_s4 = sld [smem:[%s3640_s0 + %s3060_s28]]  }
  0x39   :  { %s3250_s6 = sld [smem:[%s3640_s0 + %s3061_s7]]  }
  0x3a   :  { %3665 = sst [smem:[#allocation29_spill]] %s3240_s27 }
  0x3b   :  { %s3255_s20 = sld [smem:[%s3640_s0 + %s3062_s15]]  }
  0x3c   :  { %s3260_s27 = sld [smem:[%s3640_s0 + %s3063_s22]]  }
  0x3d   :  { %78 = vsyncpa [#allocation4], 0 }
  0x3e   :  { %79 = vsyncpa [#allocation6], 0 }
  0x3f   :  { %80 = vsyncpa [#allocation3], 0  ;;  %s87_s28 = sshll.u32 %s3080_s5, 4  ;;  %s97_s1 = sshll.u32 %s3085_s9, 4  ;;  %s88_s28 = int_to_ptr.vmem [resolvable:$true] %s87_s28  ;;  %s98_s1 = int_to_ptr.vmem [resolvable:$true] %s97_s1 }
  0x40   :  { %s2976_s2 = scalar_lea.vmem %s88_s28, 32  ;;  %p2981_p1 = scmp.lt.s32.totalorder %s88_s28, %s88_s28 }
  0x41   :  { %p2977_p0 = scmp.ne.s32.totalorder %s88_s28, %s2976_s2  ;;  %p2982_p2 = scmp.lt.s32.totalorder %s2976_s2, %s2976_s2 }
  0x43   :  { %p2983_p3 = por %p2982_p2, %p2981_p1 }
  0x45   :  { %p2984_p4 = pnand %p2983_p3, %p2977_p0 }
  0x47   :  { %2987 = shalt.err (!%p2984_p4)
}
  0x48   :  { %s3064_s7 = smov [#allocation2]   ;;  %s2988_s0 = scalar_lea.vmem %s98_s1, 32 }
  0x49   :  { %90 = dma.vmem_to_smem %s88_s28, 32, %s3064_s7, [#allocation4]  }
  0x4a   :  { %p2989_p5 = scmp.ne.s32.totalorder %s98_s1, %s2988_s0  ;;  %p2993_p6 = scmp.lt.s32.totalorder %s98_s1, %s98_s1 }
  0x4b   :  { %p2994_p7 = scmp.lt.s32.totalorder %s2988_s0, %s2988_s0 }
  0x4d   :  { %p2995_p8 = por %p2994_p7, %p2993_p6 }
  0x4f   :  { %p2996_p9 = pnand %p2995_p8, %p2989_p5 }
  0x51   :  { %2999 = shalt.err (!%p2996_p9)
}
  0x52   :  { %s3065_s5 = smov [#allocation5]  }
  0x53   :  { %100 = dma.vmem_to_smem %s98_s1, 32, %s3065_s5, [#allocation6]  }
  0x54   :  { %3022 = dma.done.wait [#allocation4], 32  }
  0x55   :  { %3023 = vsyncadd [#allocation4], 4294967264 }
  0x56   :  { %3024 = dma.done.wait [#allocation6], 32  }
  0x57   :  { %3025 = vsyncadd [#allocation6], 4294967264 }
  0x58   :  { %175 = sfence }
  0x59   :  { %v3265_v0 = vld [vmem:[%s3095_s17 + $0x8] sm:$0xff]  ;;  %v3268_v1 = vld [vmem:[%s3095_s17] sm:$0xff]  ;;  %v181_v2 = vlaneseq  ;;  %v3066_v3 = vmov 0.0   ;;  %vm202_vm0 = vcmask 1040384   ;;  %vm204_vm1 = vcmask 1041408   ;;  %s2445_s9 = sld [smem:[#allocation2 + $0x80]] }
  0x5a   :  { %2653 = vmatprep.subr.mxu1 %v3066_v3  ;;  %2648 = vmatprep.subr.mxu0 %v3066_v3  ;;  %vm3067_vm2 = vmmov 0   ;;  %vm206_vm3 = vcmask 1042432   ;;  %s2447_s17 = sld [smem:[#allocation2 + $0x81]]  ;;  %s2449_s10 = sld [smem:[#allocation2 + $0x82]]  ;;  %vm208_vm4 = vcmask 64512   ;;  %v2912_v36 = vld [vmem:[%s3100_s21] sm:$0xff]  }
  0x5b   :  { %2654 = vmatpush3.msra.mxu1 %v3265_v0  ;;  %2655 = vmatprep.mubr.msk.f32.mxu1 %vm3067_vm2, %v3066_v3  ;;  %v3276_v4 = vand.u32 127, %v181_v2  ;;  %s2451_s11 = sld [smem:[#allocation2 + $0x83]]  ;;  %s180_s15 = sld [smem:[#allocation2]]  ;;  %v2913_v44 = vld [vmem:[%s3100_s21 + $0x8] sm:$0xff]   ;;  %v2914_v46 = vld [vmem:[%s3110_s29] sm:$0xff]   ;;  %v3392_v55 = vshrl.u32 %v181_v2, 7 }
  0x5c   :  { %2649 = vmatpush3.msra.mxu0 %v3268_v1  ;;  %2650 = vmatprep.mubr.msk.f32.mxu0 %vm3067_vm2, %v3066_v3  ;;  %s3281_s16 = sld [smem:[#allocation2 + $0x1]]  ;;  %s3283_s18 = sld [smem:[#allocation2 + $0x2]]  ;;  %v3382_v52 = vld [vmem:[%s3090_s13] sm:$0x3]  ;;  %v2915_v54 = vld [vmem:[%s3110_s29 + $0x8] sm:$0xff]   ;;  %v3068_v58 = vmov 0.0|0.0  }
  0x5d   :  { %2658 = vmatprep.subr.mxu0 %v3066_v3  ;;  %2663 = vmatprep.subr.mxu1 %v3066_v3  ;;  %s3287_s22 = sld [smem:[#allocation2 + $0x3]]  ;;  %s3289_s23 = sld [smem:[#allocation5]]  ;;  %v630_v53 = vpack.c.bf16 %v3382_v52, %v3382_v52  ;;  %v596_v56 = vadd.s32 8, %v3392_v55  ;;  %v599_v57 = vmul.u32 8, %v3276_v4  ;;  %v604_v59 = vadd.s32 1, %v3276_v4 }
  0x5e   :  { %s3291_s26 = sld [smem:[#allocation5 + $0x1]]  ;;  %s3293_s28 = sld [smem:[#allocation5 + $0x2]]  ;;  %v3069_v62 = vmov 1.0|1.0  }
  0x5f   :  { %v283_v5 = vstv %s2445_s9  ;;  %s3295_s1 = sld [smem:[#allocation5 + $0x3]]  ;;  %s3297_s2 = sld [smem:[#allocation5 + $0x80]]  ;;  %v605_v60 = vmul.u32 8, %v604_v59 }
  0x60   :  { %vm284_vm5 = vcmp.eq.s32.totalorder %v3276_v4, %v283_v5  ;;  %v288_v6 = vstv %s2447_s17  ;;  %v293_v7 = vstv %s2449_s10  ;;  %s3300_s7 = sld [smem:[#allocation5 + $0x81]]  ;;  %s3302_s0 = sld [smem:[#allocation5 + $0x82]] }
  0x61   :  { %v2446_v8 = vsel %vm284_vm5, 1.0, %v3066_v3  ;;  %vm289_vm6 = vcmp.eq.s32.totalorder %v3276_v4, %v288_v6  ;;  %vm294_vm7 = vcmp.eq.s32.totalorder %v3276_v4, %v293_v7  ;;  %v298_v9 = vstv %s2451_s11  ;;  %s3307_s5 = sld [smem:[#allocation5 + $0x83]]  ;;  %s3070_s13 = smov 96  }
  0x62   :  { %v2448_v10 = vsel %vm289_vm6, 1.0, %v3066_v3  ;;  %v2450_v11 = vsel %vm294_vm7, 1.0, %v3066_v3  ;;  %vm299_vm8 = vcmp.eq.s32.totalorder %v3276_v4, %v298_v9  ;;  %v183_v12 = vstv %s180_s15  ;;  %s3670_s21 = sld [smem:[#allocation11_spill]]  ;;  %s3672_s29 = sld [smem:[#allocation15_spill]] }
  0x63   :  { %v2452_v13 = vsel %vm299_vm8, 1.0, %v3066_v3  ;;  %v302_v14 = vsel %vm202_vm0, %v2446_v8, %v2448_v10  ;;  %vm184_vm9 = vcmp.eq.s32.totalorder %v3276_v4, %v183_v12  ;;  %v188_v15 = vstv %s3281_s16  ;;  %s3680_s9 = sld [smem:[#allocation21_spill]]  ;;  %s3681_s17 = sld [smem:[#allocation23_spill]] }
  0x64   :  { %v303_v16 = vsel %vm204_vm1, %v302_v14, %v2450_v11  ;;  %v2437_v17 = vsel %vm184_vm9, 1.0, %v3066_v3  ;;  %vm189_vm10 = vcmp.eq.s32.totalorder %v3276_v4, %v188_v15  ;;  %v193_v18 = vstv %s3283_s18  ;;  %s3682_s10 = sld [smem:[#allocation22_spill]]  ;;  %s3683_s11 = sld [smem:[#allocation24_spill]] }
  0x65   :  { %v304_v19 = vsel %vm206_vm3, %v303_v16, %v2452_v13  ;;  %v2439_v20 = vsel %vm189_vm10, 1.0, %v3066_v3  ;;  %vm194_vm11 = vcmp.eq.s32.totalorder %v3276_v4, %v193_v18  ;;  %v198_v21 = vstv %s3287_s22  ;;  %s3684_s15 = sld [smem:[#allocation27_spill]]  ;;  %s3685_s16 = sld [smem:[#allocation25_spill]] }
  0x66   :  { %2656 = vmatmul.mubr.msk.f32.vlgmr.msra.gmra.mrb[0].mxu1 %vm208_vm4, %v304_v19  ;;  %v2441_v22 = vsel %vm194_vm11, 1.0, %v3066_v3  ;;  %vm199_vm12 = vcmp.eq.s32.totalorder %v3276_v4, %v198_v21  ;;  %v203_v23 = vsel %vm202_vm0, %v2437_v17, %v2439_v20  ;;  %v384_v24 = vstv %s3289_s23  ;;  %v2476_v21 = vld [vmem:[%s3105_s25] ss:$0 sm:$0xff]  ;;  %s3671_s25 = sld [smem:[#allocation12_spill]]  ;;  %s3686_s18 = sld [smem:[#allocation26_spill]] }
  0x67   :  { %v2443_v25 = vsel %vm199_vm12, 1.0, %v3066_v3  ;;  %v205_v26 = vsel %vm204_vm1, %v203_v23, %v2441_v22  ;;  %vm385_vm13 = vcmp.eq.s32.totalorder %v3276_v4, %v384_v24  ;;  %v389_v27 = vstv %s3291_s26  ;;  %2664 = vmatpush3.msra.mxu1 %v3265_v0  ;;  %2665 = vmatprep.mubr.msk.f32.mxu1 %vm3067_vm2, %v3066_v3  ;;  %s3687_s22 = sld [smem:[#allocation28_spill]]  ;;  %s3688_s23 = sld [smem:[#allocation29_spill]] }
  0x68   :  { %v207_v28 = vsel %vm206_vm3, %v205_v26, %v2443_v25  ;;  %v2454_v29 = vsel %vm385_vm13, 1.0, %v3066_v3  ;;  %vm390_vm14 = vcmp.eq.s32.totalorder %v3276_v4, %v389_v27  ;;  %v394_v30 = vstv %s3293_s28  ;;  %2676 = vmatprep.subr.bf16.mxu1 %v3066_v3  ;;  %v2480_v25 = vld [vmem:[%s3115_s3] ss:$0 sm:$0xff]  ;;  %s3673_s3 = sld [smem:[#allocation17_spill]] }
  0x69   :  { %2651 = vmatmul.mubr.msk.f32.vlgmr.msra.gmra.mrb[0].mxu0 %vm208_vm4, %v207_v28  ;;  %v2456_v31 = vsel %vm390_vm14, 1.0, %v3066_v3  ;;  %vm395_vm15 = vcmp.eq.s32.totalorder %v3276_v4, %v394_v30  ;;  %v399_v32 = vstv %s3295_s1  ;;  %v480_v33 = vstv %s3297_s2 }
  0x6a   :  { %2659 = vmatpush3.msra.mxu0 %v3268_v1  ;;  %2660 = vmatprep.mubr.msk.f32.mxu0 %vm3067_vm2, %v3066_v3  ;;  %v2458_v34 = vsel %vm395_vm15, 1.0, %v3066_v3  ;;  %vm400_vm5 = vcmp.eq.s32.totalorder %v3276_v4, %v399_v32  ;;  %v403_v35 = vsel %vm202_vm0, %v2454_v29, %v2456_v31  ;;  %vm481_vm6 = vcmp.eq.s32.totalorder %v3276_v4, %v480_v33 }
  0x6b   :  { %2668 = vmatprep.subr.bf16.mxu0 %v3066_v3  ;;  %v2460_v37 = vsel %vm400_vm5, 1.0, %v3066_v3  ;;  %v404_v38 = vsel %vm204_vm1, %v403_v35, %v2458_v34  ;;  %v2463_v39 = vsel %vm481_vm6, 1.0, %v3066_v3  ;;  %v485_v40 = vstv %s3300_s7 }
  0x6c   :  { %v405_v41 = vsel %vm206_vm3, %v404_v38, %v2460_v37  ;;  %vm486_vm7 = vcmp.eq.s32.totalorder %v3276_v4, %v485_v40  ;;  %v490_v42 = vstv %s3302_s0  ;;  %v495_v43 = vstv %s3307_s5 }
  0x6d   :  { %2661 = vmatmul.mubr.msk.f32.vlgmr.msra.gmra.mrb[2].mxu0 %vm208_vm4, %v405_v41  ;;  %v2465_v45 = vsel %vm486_vm7, 1.0, %v3066_v3  ;;  %vm491_vm8 = vcmp.eq.s32.totalorder %v3276_v4, %v490_v42  ;;  %vm496_vm9 = vcmp.eq.s32.totalorder %v3276_v4, %v495_v43  ;;  %vm649_vm10 = vcmask 261120  }
  0x6e   :  { %2669 = vmatpush3.bf16.msra.mxu0 %v2912_v36  ;;  %v2467_v47 = vsel %vm491_vm8, 1.0, %v3066_v3  ;;  %v2469_v48 = vsel %vm496_vm9, 1.0, %v3066_v3  ;;  %v499_v49 = vsel %vm202_vm0, %v2463_v39, %v2465_v45  ;;  %2672 = vmatprep.mubr.msk.bf16.mxu0 %vm3067_vm2, %v3066_v3  ;;  %vm607_vm11 = vcmp.lt.s32.totalorder %v596_v56, %v605_v60 }
  0x6f   :  { %v500_v50 = vsel %vm204_vm1, %v499_v49, %v2467_v47  ;;  %2670 = vmatprep.subr.bf16.mxu0 %v3066_v3  ;;  %vm600_vm1 = vcmp.ge.s32.totalorder %v3392_v55, %v599_v57  ;;  %vm381_vm15 = vcmask 1043456   ;;  %v597_v16 = vadd.s32 16, %v3392_v55 }
  0x70   :  { %v501_v51 = vsel %vm206_vm3, %v500_v50, %v2469_v48  ;;  %vm601_vm3 = vcmp.ge.s32.totalorder %v596_v56, %v599_v57  ;;  %v598_v17 = vadd.s32 24, %v3392_v55  ;;  %v757_v23 = vsub.s32 0, %v3392_v55 }
  0x71   :  { %2666 = vmatmul.mubr.msk.f32.vlgmr.msra.gmra.mrb[2].mxu1 %vm208_vm4, %v501_v51  ;;  %vm606_vm4 = vcmp.lt.s32.totalorder %v3392_v55, %v605_v60  ;;  %vm611_vm13 = vmand %vm601_vm3, %vm607_vm11  ;;  %vm602_vm5 = vcmp.ge.s32.totalorder %v597_v16, %v599_v57  ;;  %vm608_vm7 = vcmp.lt.s32.totalorder %v597_v16, %v605_v60  ;;  %v946_v24 = vsub.s32 1, %v3392_v55 }
  0x72   :  { %2671 = vmatpush3.bf16.msra.mxu0 %v2913_v44  ;;  %2677 = vmatpush3.bf16.msra.mxu1 %v2914_v46  ;;  %vm610_vm12 = vmand %vm600_vm1, %vm606_vm4  ;;  %vm603_vm6 = vcmp.ge.s32.totalorder %v598_v17, %v599_v57  ;;  %vm609_vm8 = vcmp.lt.s32.totalorder %v598_v17, %v605_v60  ;;  %v624_v37 = vadd.s32 1, %v3392_v55  ;;  %v622_v38 = vmul.u32 8, %v3392_v55 }
  0x73   :  { %2678 = vmatprep.subr.bf16.mxu1 %v3066_v3  ;;  %2680 = vmatprep.mubr.msk.bf16.mxu1 %vm3067_vm2, %v3066_v3  ;;  %vm3400_vm14 = vmpackc.low %vm611_vm13, %vm610_vm12  ;;  %vm834_vm13 = vcmask 27648  }
  0x74   :  { %2844 = vmatprep.subr.bf16.mxu0 %v3068_v58  ;;  %vm612_vm9 = vmand %vm602_vm5, %vm608_vm7  ;;  %v625_v39 = vmul.u32 8, %v624_v37  ;;  %vm623_vm4 = vcmp.ge.s32.totalorder %v3276_v4, %v622_v38  ;;  %vm854_vm5 = vcmask 31744   ;;  %vm1280_vm7 = vcmask 517120  }
  0x75   :  { %2673 = vmatmul.mubr.msk.bf16.vlgmr.msra.gmra.mrb[4].mxu0 %vm649_vm10, %v630_v53  ;;  %vm613_vm1 = vmand %vm603_vm6, %vm609_vm8  ;;  %vm936_vm6 = vcmask 257024   ;;  %vm1349_vm8 = vcmask 523264  }
  0x76   :  { %2692 = vmatprep.mubr.msk.f32.mxu0 %vm3067_vm2, %v3066_v3  ;;  %2679 = vmatpush3.bf16.msra.mxu1 %v2915_v54  ;;  %vm3417_vm3 = vmpackc.low %vm613_vm1, %vm612_vm9  ;;  %vm626_vm11 = vcmp.lt.s32.totalorder %v3276_v4, %v625_v39 }
  0x77   :  { %2695 = vmatprep.subr.mxu1 %v3066_v3  ;;  %2846 = vmatpush3.bf16.msk.msra.mxu0 %vm3400_vm14, %v3069_v62  ;;  %vm627_vm12 = vmand %vm623_vm4, %vm626_vm11 }
  0x78   :  { %2847 = vmatprep.subr.bf16.mxu0 %v3068_v58  ;;  %v3454_v40 = vsel %vm627_vm12, 1.0, %v3066_v3 }
  0x7b   :  { %2849 = vmatpush3.bf16.msk.msra.mxu0 %vm3417_vm3, %v3069_v62 }
  0x7c   :  { %2850 = vmatprep.subr.bf16.mxu0 %v3068_v58 }
 0x139   :  { %v374_v63 = vpop.f32.mrb[0].mxu1 }
 0x13a   :  { %v379_v0 = vrot.slane %v374_v63, 4  ;;  %v2657_v1 = vpop.f32.mrb[1].mxu1 }
 0x13c   :  { %v278_v2 = vpop.f32.mrb[0].mxu0 }
 0x13d   :  { %v382_v5 = vsel %vm381_vm15, %v278_v2, %v379_v0  ;;  %v2652_v6 = vpop.f32.mrb[1].mxu0 }
 0x13e   :  { %v693_v7 = vpack.c.bf16 %v382_v5, %v382_v5 }
 0x140   :  { %2681 = vmatmul.mubr.msk.bf16.vlgmr.msra.gmra.mrb[4].mxu1 %vm649_vm10, %v693_v7  ;;  %v475_v8 = vpop.f32.mrb[2].mxu0 }
 0x141   :  { %v2662_v9 = vpop.f32.mrb[3].mxu0  ;;  %2697 = vmatprep.mubr.msk.f32.mxu1 %vm3067_vm2, %v3066_v3  ;;  %2696 = vmatpush3.msk.msra.mxu1 %vm381_vm15, %v3454_v40 }
 0x142   :  { %2711 = vmatprep.subr.mxu1 %v3066_v3 }
 0x144   :  { %v571_v10 = vpop.f32.mrb[2].mxu1 }
 0x145   :  { %v576_v11 = vrot.slane %v571_v10, 4  ;;  %v2667_v12 = vpop.f32.mrb[3].mxu1 }
 0x147   :  { %v3413_v13 = vsel %vm381_vm15, %v475_v8, %v576_v11 }
 0x148   :  { %v687_v14 = vpop.f32.mrb[4].mxu0 }
 0x149   :  { %v2674_v15 = vpop.f32.mrb[5].mxu0  ;;  %v688_v22 = vadd.f32 %v2476_v21, %v687_v14 }
 0x14a   :  { %v690_v18 = vpop.f32.mrb[6].mxu0 }
 0x14b   :  { %v2675_v19 = vpop.f32.mrb[7].mxu0  ;;  %v758_v26 = vrot.slane %v688_v22, %v757_v23  ;;  %v947_v27 = vrot.slane %v688_v22, %v946_v24 }
 0x213   :  { %v749_v28 = vpop.f32.mrb[4].mxu1 }
 0x214   :  { %v750_v29 = vadd.f32 %v2480_v25, %v749_v28  ;;  %v2682_v30 = vpop.f32.mrb[5].mxu1 }
 0x215   :  { %v752_v31 = vpop.f32.mrb[6].mxu1 }
 0x216   :  { %v759_v32 = vmul.f32 %v758_v26, %v750_v29  ;;  %v948_v33 = vmul.f32 %v947_v27, %v750_v29  ;;  %932 = vrot.lane.b32.xlu0 %v750_v29, %s3070_s13  ;;  %v2683_v34 = vpop.f32.mrb[7].mxu1  ;;  %v1116_v35 = vrot.slane %v750_v29, 4  ;;  %v2916_v31 = vld [vmem:[%s3120_s8] sm:$0xff]  }
 0x218   :  { %2693 = vmatmul.mubr.msk.f32.vlgmr.msra.gmra.mrb[8].mxu0 %vm649_vm10, %v759_v32  ;;  %v950_v36 = vrot.slane %v948_v33, 4  ;;  %v2917_v32 = vld [vmem:[%s3120_s8 + $0x8] sm:$0xff]   ;;  %v2918_v33 = vld [vmem:[%s3130_s19] sm:$0xff]   ;;  %s3674_s8 = sld [smem:[#allocation13_spill]] }
 0x219   :  { %2852 = vmatpush3.bf16.msk.msra.mxu0 %vm3400_vm14, %v3069_v62  ;;  %2708 = vmatprep.mubr.msk.f32.mxu0 %vm3067_vm2, %v3066_v3 }
 0x21a   :  { %1117 = vrot.lane.b32.xlu0 %v1116_v35, %s3070_s13  ;;  %2853 = vmatprep.subr.bf16.mxu0 %v3068_v58 }
 0x21d   :  { %2855 = vmatpush3.bf16.msk.msra.mxu0 %vm3417_vm3, %v3069_v62 }
 0x21e   :  { %2724 = vmatprep.subr.bf16.mxu0 %v3066_v3 }
 0x220   :  { %2709 = vmatmul.mubr.msk.f32.vlgmr.msra.gmra.mrb[10].mxu0 %vm649_vm10, %v950_v36 }
 0x221   :  { %2728 = vmatprep.mubr.msk.bf16.mxu0 %vm3067_vm2, %v3066_v3  ;;  %2725 = vmatpush3.bf16.msra.mxu0 %v2918_v33  ;;  %v2506_v33 = vld [vmem:[%s3140_s30] ss:$0 sm:$0xff]  ;;  %s3678_s30 = sld [smem:[#allocation20_spill]] }
 0x222   :  { %2726 = vmatprep.subr.bf16.mxu0 %v3066_v3 }
 0x288   :  { %v933_v34 = vpop.permute.xlu0 %932 }
 0x2eb   :  { %v829_v41 = vpop.f32.mrb[8].mxu0 }
 0x2ec   :  { %v833_v42 = vmul.f32 0.35355338, %v829_v41  ;;  %v2694_v43 = vpop.f32.mrb[9].mxu0 }
 0x2ee   :  { %v835_v44 = vsel %vm834_vm13, %v833_v42, -inf }
 0x2ef   :  { %v836_v45 = vrot.slane %v835_v44, 4 }
 0x2f1   :  { %v837_v46 = vmax.f32 %v835_v44, %v836_v45 }
 0x2f3   :  { %v838_v47 = vrot.slane %v837_v46, 2  ;;  %v1019_v48 = vpop.f32.mrb[10].mxu0 }
 0x2f4   :  { %v1023_v4 = vmul.f32 0.35355338, %v1019_v48  ;;  %v2710_v49 = vpop.f32.mrb[11].mxu0 }
 0x2f5   :  { %v839_v50 = vmax.f32 %v837_v46, %v838_v47 }
 0x2f6   :  { %v1024_v51 = vsel %vm834_vm13, %v1023_v4, -inf }
 0x2f7   :  { %v840_v53 = vrot.slane %v839_v50, 1  ;;  %v1025_v54 = vrot.slane %v1024_v51, 4 }
 0x2f9   :  { %v841_v56 = vmax.f32 %v839_v50, %v840_v53  ;;  %v1026_v57 = vmax.f32 %v1024_v51, %v1025_v54 }
 0x2fb   :  { %v842_v59 = vsub.f32 %v833_v42, %v841_v56  ;;  %v1027_v60 = vrot.slane %v1026_v57, 2  ;;  %v1118_v42 = vpop.permute.xlu0 %1117 }
 0x2fd   :  { %v843_v63 = vmul.f32 1.442695, %v842_v59  ;;  %v1028_v0 = vmax.f32 %v1026_v57, %v1027_v60 }
 0x2ff   :  { %2944 = vpow2.f32 %v843_v63  ;;  %v1029_v1 = vrot.slane %v1028_v0, 1  ;;  %v2919_v63 = vld [vmem:[%s3130_s19 + $0x8] sm:$0xff]   ;;  %s3676_s19 = sld [smem:[#allocation19_spill]] }
 0x300   :  { %2727 = vmatpush3.bf16.msra.mxu0 %v2919_v63 }
 0x301   :  { %v1030_v2 = vmax.f32 %v1028_v0, %v1029_v1  ;;  %2744 = vmatprep.subr.bf16.mxu0 %v3066_v3  ;;  %v2498_v0 = vld [vmem:[%s3125_s14] ss:$0 sm:$0xff]  ;;  %s3675_s14 = sld [smem:[#allocation14_spill]] }
 0x303   :  { %v1031_v5 = vsub.f32 %v1023_v4, %v1030_v2 }
 0x305   :  { %v1032_v6 = vmul.f32 1.442695, %v1031_v5 }
 0x307   :  { %2946 = vpow2.f32 %v1032_v6 }
 0x309   :  { %v2945_v7 = vpop.eup %2944 }
 0x30a   :  { %v845_v8 = vsel %vm834_vm13, %v2945_v7, 0.0 }
 0x30b   :  { %v846_v9 = vrot.slane %v845_v8, 4 }
 0x30d   :  { %v847_v10 = vadd.f32 %v846_v9, %v845_v8  ;;  %v2502_v9 = vld [vmem:[%s3135_s24] ss:$0 sm:$0xff]  ;;  %s3677_s24 = sld [smem:[#allocation16_spill]] }
 0x30f   :  { %v848_v11 = vrot.slane %v847_v10, 2 }
 0x311   :  { %v2947_v12 = vpop.eup %2946  ;;  %v849_v14 = vadd.f32 %v848_v11, %v847_v10 }
 0x312   :  { %v1034_v15 = vsel %vm834_vm13, %v2947_v12, 0.0 }
 0x313   :  { %v850_v16 = vrot.slane %v849_v14, 1  ;;  %v1035_v17 = vrot.slane %v1034_v15, 4 }
 0x315   :  { %v851_v18 = vadd.f32 %v850_v16, %v849_v14  ;;  %v1036_v19 = vadd.f32 %v1035_v17, %v1034_v15 }
 0x317   :  { %2948 = vrcp.f32 %v851_v18  ;;  %v1037_v21 = vrot.slane %v1036_v19, 2 }
 0x319   :  { %v1038_v22 = vadd.f32 %v1037_v21, %v1036_v19 }
 0x31b   :  { %v1039_v25 = vrot.slane %v1038_v22, 1 }
 0x31d   :  { %v1040_v26 = vadd.f32 %v1039_v25, %v1038_v22  ;;  %v2920_v25 = vld [vmem:[%s3150_s12] sm:$0xff]  }
 0x31f   :  { %2950 = vrcp.f32 %v1040_v26  ;;  %v2921_v26 = vld [vmem:[%s3150_s12 + $0x8] sm:$0xff]  }
 0x321   :  { %v2949_v27 = vpop.eup %2948 }
 0x322   :  { %v853_v28 = vmul.f32 %v2949_v27, %v2945_v7  ;;  %v2922_v27 = vld [vmem:[%s3150_s12 + $0x10] sm:$0xff]  }
 0x324   :  { %2698 = vmatmul.mubr.msk.f32.vlgmr.msra.gmra.mrb[8].mxu1 %vm854_vm5, %v853_v28  ;;  %v2923_v28 = vld [vmem:[%s3150_s12 + $0x18] sm:$0xff]   ;;  %s3679_s12 = sld [smem:[#allocation18_spill]] }
 0x325   :  { %2712 = vmatpush3.msk.msra.mxu1 %vm381_vm15, %v3454_v40  ;;  %2713 = vmatprep.mubr.msk.f32.mxu1 %vm3067_vm2, %v3066_v3 }
 0x326   :  { %2716 = vmatprep.subr.bf16.mxu1 %v3066_v3 }
 0x329   :  { %v2951_v29 = vpop.eup %2950 }
 0x32a   :  { %v1042_v30 = vmul.f32 %v2951_v29, %v2947_v12 }
 0x32c   :  { %2714 = vmatmul.mubr.msk.f32.vlgmr.msra.gmra.mrb[10].mxu1 %vm854_vm5, %v1042_v30 }
 0x32d   :  { %2720 = vmatprep.mubr.msk.bf16.mxu1 %vm3067_vm2, %v3066_v3  ;;  %2717 = vmatpush3.bf16.msra.mxu1 %v2916_v31 }
 0x32e   :  { %2718 = vmatprep.subr.bf16.mxu1 %v3066_v3 }
 0x331   :  { %2719 = vmatpush3.bf16.msra.mxu1 %v2917_v32 }
 0x332   :  { %2732 = vmatprep.subr.bf16.mxu1 %v3066_v3 }
 0x3f7   :  { %v927_v35 = vpop.f32.mrb[8].mxu1 }
 0x3f8   :  { %v935_v36 = vmul.f32 %v933_v34, %v927_v35  ;;  %v2699_v37 = vpop.f32.mrb[9].mxu1  ;;  %v2507_v35 = vld [vmem:[%s3670_s21] ss:$0 sm:$0xff] }
 0x3fa   :  { %v937_v38 = vsel %vm936_vm6, %v935_v36, 0.0 }
 0x3fb   :  { %v938_v39 = vrot.slane %v937_v38, 4 }
 0x3fd   :  { %v939_v41 = vadd.f32 %v938_v39, %v937_v38 }
 0x3ff   :  { %v1112_v43 = vpop.f32.mrb[10].mxu1  ;;  %v940_v46 = vrot.slane %v939_v41, 2 }
 0x400   :  { %v1120_v44 = vmul.f32 %v1118_v42, %v1112_v43  ;;  %v2715_v45 = vpop.f32.mrb[11].mxu1 }
 0x401   :  { %v941_v4 = vadd.f32 %v940_v46, %v939_v41 }
 0x402   :  { %v1121_v47 = vsel %vm936_vm6, %v1120_v44, 0.0 }
 0x403   :  { %v1122_v48 = vrot.slane %v1121_v47, 4  ;;  %v942_v51 = vrot.slane %v941_v4, 1 }
 0x405   :  { %v1123_v49 = vadd.f32 %v1122_v48, %v1121_v47  ;;  %v943_v56 = vadd.f32 %v942_v51, %v941_v4  ;;  %v2508_v4 = vld [vmem:[%s3671_s25] ss:$0 sm:$0xff] }
 0x407   :  { %v1124_v50 = vrot.slane %v1123_v49, 2 }
 0x409   :  { %v1125_v53 = vadd.f32 %v1124_v50, %v1123_v49 }
 0x40b   :  { %v1126_v54 = vrot.slane %v1125_v53, 1 }
 0x40d   :  { %v1127_v57 = vadd.f32 %v1126_v54, %v1125_v53 }
 0x40f   :  { %v1128_v59 = vsel %vm202_vm0, %v943_v56, %v1127_v57 }
 0x410   :  { %v1129_v60 = vpack.c.bf16 %v1128_v59, %v1128_v59 }
 0x412   :  { %2721 = vmatmul.mubr.msk.bf16.vlgmr.msra.gmra.mrb[12].mxu1 %vm649_vm10, %v1129_v60 }
 0x413   :  { %2740 = vmatprep.mubr.msk.bf16.mxu1 %vm3067_vm2, %v3066_v3  ;;  %2733 = vmatpush3.bf16.msra.mxu1 %v2920_v25 }
 0x414   :  { %2734 = vmatprep.subr.bf16.mxu1 %v3066_v3 }
 0x417   :  { %2735 = vmatpush3.bf16.msra.mxu1 %v2921_v26 }
 0x418   :  { %2736 = vmatprep.subr.bf16.mxu1 %v3066_v3 }
 0x41b   :  { %2737 = vmatpush3.bf16.msra.mxu1 %v2922_v27 }
 0x41c   :  { %2738 = vmatprep.subr.bf16.mxu1 %v3066_v3 }
 0x41f   :  { %2739 = vmatpush3.bf16.msra.mxu1 %v2923_v28 }
 0x420   :  { %2756 = vmatprep.subr.bf16.mxu1 %v3066_v3 }
 0x4e5   :  { %v1185_v1 = vpop.f32.mrb[12].mxu1 }
 0x4e6   :  { %v1186_v2 = vadd.f32 %v2498_v0, %v1185_v1  ;;  %v2722_v5 = vpop.f32.mrb[13].mxu1  ;;  %v2924_v1 = vld [vmem:[%s3672_s29] sm:$0xff]  }
 0x4e7   :  { %v1188_v6 = vpop.f32.mrb[14].mxu1  ;;  %v2926_v5 = vld [vmem:[%s3672_s29 + $0x10] sm:$0xff]  }
 0x4e8   :  { %v1218_v7 = vpack.c.bf16 %v1186_v2, %v1186_v2  ;;  %v2723_v8 = vpop.f32.mrb[15].mxu1  ;;  %v2925_v2 = vld [vmem:[%s3672_s29 + $0x8] sm:$0xff]   ;;  %v2927_v6 = vld [vmem:[%s3672_s29 + $0x18] sm:$0xff]  }
 0x4ea   :  { %2729 = vmatmul.mubr.msk.bf16.vlgmr.msra.gmra.mrb[12].mxu0 %vm649_vm10, %v1218_v7  ;;  %v2930_v7 = vld [vmem:[%s3673_s3] sm:$0xff]  }
 0x4eb   :  { %2752 = vmatprep.mubr.msk.bf16.mxu0 %vm3067_vm2, %v3066_v3  ;;  %2745 = vmatpush3.bf16.msra.mxu0 %v2924_v1 }
 0x4ec   :  { %2746 = vmatprep.subr.bf16.mxu0 %v3066_v3 }
 0x4ef   :  { %2747 = vmatpush3.bf16.msra.mxu0 %v2925_v2 }
 0x4f0   :  { %2748 = vmatprep.subr.bf16.mxu0 %v3066_v3 }
 0x4f3   :  { %2749 = vmatpush3.bf16.msra.mxu0 %v2926_v5 }
 0x4f4   :  { %2750 = vmatprep.subr.bf16.mxu0 %v3066_v3 }
 0x4f7   :  { %2751 = vmatpush3.bf16.msra.mxu0 %v2927_v6 }
 0x4f8   :  { %2764 = vmatprep.subr.bf16.mxu0 %v3066_v3 }
 0x5bd   :  { %v1274_v10 = vpop.f32.mrb[12].mxu0 }
 0x5be   :  { %v1275_v11 = vadd.f32 %v2502_v9, %v1274_v10  ;;  %v2730_v12 = vpop.f32.mrb[13].mxu0 }
 0x5bf   :  { %v1277_v14 = vpop.f32.mrb[14].mxu0  ;;  %v2514_v12 = vld [vmem:[%s3674_s8] ss:$0 sm:$0xff] }
 0x5c0   :  { %v2731_v15 = vpop.f32.mrb[15].mxu0  ;;  %v1281_v16 = vsel %vm1280_vm7, %v1275_v11, 0.0 }
 0x5c1   :  { %1282 = vadd.xlane.f32.xlu1 %v1281_v16  ;;  %v2515_v15 = vld [vmem:[%s3675_s14] ss:$0 sm:$0xff] }
 0x64e   :  { %v1283_v17 = vpop.xlane.xlu1 %1282 }
 0x64f   :  { %v1285_v18 = vmul.f32 0.015625, %v1283_v17 }
 0x651   :  { %v1286_v19 = vsub.f32 %v1275_v11, %v1285_v18 }
 0x653   :  { %v1287_v21 = vmul.f32 %v1286_v19, %v1286_v19 }
 0x655   :  { %v1288_v22 = vsel %vm1280_vm7, %v1287_v21, 0.0 }
 0x656   :  { %1289 = vadd.xlane.f32.xlu1 %v1288_v22 }
 0x6e3   :  { %v1290_v29 = vpop.xlane.xlu1 %1289 }
 0x6e4   :  { %v1291_v30 = vmul.f32 0.015625, %v1290_v29 }
 0x6e6   :  { %v1292_v31 = vadd.f32 1e-05, %v1291_v30  ;;  %v2928_v30 = vld [vmem:[%s3676_s19] sm:$0xff]  }
 0x6e8   :  { %2952 = vrsqrt.f32 %v1292_v31 }
 0x6f2   :  { %v2953_v32 = vpop.eup %2952 }
 0x6f3   :  { %v1294_v34 = vmul.f32 %v2953_v32, %v1286_v19  ;;  %v2929_v32 = vld [vmem:[%s3676_s19 + $0x8] sm:$0xff]  }
 0x6f5   :  { %v1301_v36 = vmul.f32 %v2506_v33, %v1294_v34  ;;  %v1581_v33 = vpack.c.bf16 %v3413_v13, %v3413_v13  ;;  %v2931_v34 = vld [vmem:[%s3673_s3 + $0x8] sm:$0xff]  }
 0x6f7   :  { %v1308_v37 = vadd.f32 %v2507_v35, %v1301_v36  ;;  %v2516_v35 = vld [vmem:[%s3677_s24] ss:$0 sm:$0xff] }
 0x6f9   :  { %v1309_v38 = vmul.f32 %v1308_v37, %v1308_v37 }
 0x6fb   :  { %v1310_v39 = vmul.f32 %v1309_v38, %v1308_v37 }
 0x6fd   :  { %v1311_v41 = vmul.f32 0.044715, %v1310_v39 }
 0x6ff   :  { %v1312_v42 = vadd.f32 %v1311_v41, %v1308_v37 }
 0x701   :  { %v1313_v43 = vmul.f32 0.7978846, %v1312_v42 }
 0x703   :  { %2954 = vtanh.f32 %v1313_v43  ;;  %v2526_v43 = vld [vmem:[%s3678_s30] ss:$0 sm:$0xff] }
 0x70d   :  { %v2955_v44 = vpop.eup %2954 }
 0x70e   :  { %v1315_v45 = vadd.f32 1.0, %v2955_v44 }
 0x710   :  { %v1316_v46 = vmul.f32 0.5, %v1315_v45 }
 0x712   :  { %v1317_v47 = vmul.f32 %v1316_v46, %v1308_v37 }
 0x714   :  { %v1318_v48 = vpack.c.bf16 %v1317_v47, %v1317_v47 }
 0x716   :  { %2741 = vmatmul.mubr.msk.bf16.vlgmr.msra.gmra.mrb[16].mxu1 %vm1349_vm8, %v1318_v48 }
 0x717   :  { %2760 = vmatprep.mubr.msk.bf16.mxu1 %vm3067_vm2, %v3066_v3  ;;  %2757 = vmatpush3.bf16.msra.mxu1 %v2930_v7 }
 0x718   :  { %2758 = vmatprep.subr.bf16.mxu1 %v3066_v3 }
 0x71b   :  { %2759 = vmatpush3.bf16.msra.mxu1 %v2931_v34 }
 0x71c   :  { %2856 = vmatprep.subr.bf16.mxu1 %v3068_v58 }
 0x7e9   :  { %v1387_v49 = vpop.f32.mrb[16].mxu1 }
 0x7ea   :  { %v1388_v50 = vadd.f32 %v2508_v4, %v1387_v49  ;;  %v2742_v51 = vpop.f32.mrb[17].mxu1  ;;  %v2522_v4 = vld [vmem:[%s3679_s12] ss:$0 sm:$0xff] }
 0x7eb   :  { %v1390_v53 = vpop.f32.mrb[18].mxu1 }
 0x7ec   :  { %v2743_v54 = vpop.f32.mrb[19].mxu1  ;;  %v1393_v56 = vsel %vm1280_vm7, %v1388_v50, 0.0 }
 0x7ed   :  { %1394 = vadd.xlane.f32.xlu0 %v1393_v56 }
 0x87a   :  { %v1395_v57 = vpop.xlane.xlu0 %1394 }
 0x87b   :  { %v1396_v59 = vmul.f32 0.015625, %v1395_v57 }
 0x87d   :  { %v1397_v60 = vsub.f32 %v1388_v50, %v1396_v59 }
 0x87f   :  { %v1398_v63 = vmul.f32 %v1397_v60, %v1397_v60 }
 0x881   :  { %v1399_v0 = vsel %vm1280_vm7, %v1398_v63, 0.0 }
 0x882   :  { %1400 = vadd.xlane.f32.xlu1 %v1399_v0 }
 0x90f   :  { %v1401_v8 = vpop.xlane.xlu1 %1400 }
 0x910   :  { %v1402_v9 = vmul.f32 0.015625, %v1401_v8 }
 0x912   :  { %v1403_v10 = vadd.f32 1e-05, %v1402_v9 }
 0x914   :  { %2956 = vrsqrt.f32 %v1403_v10 }
 0x91e   :  { %v2957_v11 = vpop.eup %2956 }
 0x91f   :  { %v1405_v14 = vmul.f32 %v2957_v11, %v1397_v60 }
 0x921   :  { %v1412_v16 = vmul.f32 %v2514_v12, %v1405_v14 }
 0x923   :  { %v1419_v17 = vadd.f32 %v2515_v15, %v1412_v16 }
 0x925   :  { %v1420_v18 = vmul.f32 %v1419_v17, %v1419_v17 }
 0x927   :  { %v1421_v19 = vmul.f32 %v1420_v18, %v1419_v17 }
 0x929   :  { %v1422_v21 = vmul.f32 0.044715, %v1421_v19 }
 0x92b   :  { %v1423_v22 = vadd.f32 %v1422_v21, %v1419_v17 }
 0x92d   :  { %v1424_v25 = vmul.f32 0.7978846, %v1423_v22 }
 0x92f   :  { %2958 = vtanh.f32 %v1424_v25 }
 0x939   :  { %v2959_v26 = vpop.eup %2958 }
 0x93a   :  { %v1426_v27 = vadd.f32 1.0, %v2959_v26 }
 0x93c   :  { %v1427_v28 = vmul.f32 0.5, %v1426_v27 }
 0x93e   :  { %v1428_v29 = vmul.f32 %v1427_v28, %v1419_v17 }
 0x940   :  { %v1429_v31 = vpack.c.bf16 %v1428_v29, %v1428_v29 }
 0x942   :  { %2753 = vmatmul.mubr.msk.bf16.vlgmr.msra.gmra.mrb[16].mxu0 %vm1349_vm8, %v1429_v31 }
 0x943   :  { %2765 = vmatpush3.bf16.msra.mxu0 %v2928_v30  ;;  %2768 = vmatprep.mubr.msk.bf16.mxu0 %vm3067_vm2, %v3066_v3 }
 0x944   :  { %2766 = vmatprep.subr.bf16.mxu0 %v3066_v3 }
 0x947   :  { %2767 = vmatpush3.bf16.msra.mxu0 %v2929_v32 }
 0x948   :  { %2783 = vmatprep.subr.mxu0 %v3066_v3 }
 0x94a   :  { %2769 = vmatmul.mubr.msk.bf16.vlgmr.msra.gmra.mrb[20].mxu0 %vm649_vm10, %v1581_v33 }
 0x94b   :  { %2784 = vmatpush3.msk.msra.mxu0 %vm381_vm15, %v3454_v40  ;;  %2785 = vmatprep.mubr.msk.f32.mxu0 %vm3067_vm2, %v3066_v3 }
 0x94c   :  { %2799 = vmatprep.subr.mxu0 %v3066_v3 }
 0xa15   :  { %v1497_v36 = vpop.f32.mrb[16].mxu0 }
 0xa16   :  { %v1498_v13 = vadd.f32 %v2516_v35, %v1497_v36  ;;  %v2754_v37 = vpop.f32.mrb[17].mxu0 }
 0xa17   :  { %v1500_v38 = vpop.f32.mrb[18].mxu0 }
 0xa18   :  { %v3540_v39 = vadd.f32 %v1498_v13, %v3382_v52  ;;  %v2755_v41 = vpop.f32.mrb[19].mxu0 }
 0xa1a   :  { %v1519_v42 = vpack.c.bf16 %v3540_v39, %v3540_v39 }
 0xa1c   :  { %2761 = vmatmul.mubr.msk.bf16.vlgmr.msra.gmra.mrb[20].mxu1 %vm649_vm10, %v1519_v42 }
 0xa1d   :  { %v1637_v44 = vpop.f32.mrb[20].mxu0  ;;  %2858 = vmatpush3.bf16.msk.msra.mxu1 %vm3400_vm14, %v3069_v62  ;;  %2780 = vmatprep.mubr.msk.f32.mxu1 %vm3067_vm2, %v3066_v3 }
 0xa1e   :  { %v1638_v45 = vadd.f32 %v2526_v43, %v1637_v44  ;;  %v2770_v46 = vpop.f32.mrb[21].mxu0  ;;  %2859 = vmatprep.subr.bf16.mxu1 %v3068_v58  ;;  %v2932_v44 = vld [vmem:[%s3680_s9] sm:$0xff]  }
 0xa1f   :  { %v1640_v52 = vpop.f32.mrb[22].mxu0 }
 0xa20   :  { %1815 = vrot.lane.b32.xlu1 %v1638_v45, %s3070_s13  ;;  %v2771_v47 = vpop.f32.mrb[23].mxu0  ;;  %v1998_v48 = vrot.slane %v1638_v45, 4 }
 0xa21   :  { %2861 = vmatpush3.bf16.msk.msra.mxu1 %vm3417_vm3, %v3069_v62 }
 0xa22   :  { %2862 = vmatprep.subr.bf16.mxu1 %v3068_v58 }
 0xa24   :  { %1999 = vrot.lane.b32.xlu1 %v1998_v48, %s3070_s13 }
 0xa92   :  { %v1816_v46 = vpop.permute.xlu1 %1815 }
 0xaef   :  { %v1575_v49 = vpop.f32.mrb[20].mxu1 }
 0xaf0   :  { %v1576_v50 = vadd.f32 %v2522_v4, %v1575_v49  ;;  %v2762_v51 = vpop.f32.mrb[21].mxu1 }
 0xaf1   :  { %v1578_v53 = vpop.f32.mrb[22].mxu1  ;;  %v2000_v51 = vpop.permute.xlu1 %1999 }
 0xaf2   :  { %v1646_v54 = vrot.slane %v1576_v50, %v757_v23  ;;  %v2763_v56 = vpop.f32.mrb[23].mxu1  ;;  %v1829_v59 = vrot.slane %v1576_v50, %v946_v24 }
 0xaf4   :  { %v1647_v57 = vmul.f32 %v1646_v54, %v1638_v45  ;;  %v1830_v60 = vmul.f32 %v1829_v59, %v1638_v45  ;;  %v2933_v45 = vld [vmem:[%s3680_s9 + $0x8] sm:$0xff]  }
 0xaf6   :  { %2781 = vmatmul.mubr.msk.f32.vlgmr.msra.gmra.mrb[24].mxu1 %vm649_vm10, %v1647_v57  ;;  %v1832_v23 = vrot.slane %v1830_v60, 4 }
 0xaf7   :  { %2864 = vmatpush3.bf16.msk.msra.mxu1 %vm3400_vm14, %v3069_v62  ;;  %2796 = vmatprep.mubr.msk.f32.mxu1 %vm3067_vm2, %v3066_v3 }
 0xaf8   :  { %2865 = vmatprep.subr.bf16.mxu1 %v3068_v58 }
 0xafb   :  { %2867 = vmatpush3.bf16.msk.msra.mxu1 %vm3417_vm3, %v3069_v62 }
 0xafc   :  { %2812 = vmatprep.subr.bf16.mxu1 %v3066_v3 }
 0xafe   :  { %2797 = vmatmul.mubr.msk.f32.vlgmr.msra.gmra.mrb[26].mxu1 %vm649_vm10, %v1832_v23 }
 0xaff   :  { %2816 = vmatprep.mubr.msk.bf16.mxu1 %vm3067_vm2, %v3066_v3 }
 0xbc9   :  { %v1717_v55 = vpop.f32.mrb[24].mxu1 }
 0xbca   :  { %v1721_v61 = vmul.f32 0.35355338, %v1717_v55  ;;  %v2782_v24 = vpop.f32.mrb[25].mxu1 }
 0xbcc   :  { %v1722_v63 = vsel %vm834_vm13, %v1721_v61, -inf }
 0xbcd   :  { %v1723_v0 = vrot.slane %v1722_v63, 4 }
 0xbcf   :  { %v1724_v1 = vmax.f32 %v1722_v63, %v1723_v0 }
 0xbd1   :  { %v1725_v58 = vrot.slane %v1724_v1, 2  ;;  %v1901_v2 = vpop.f32.mrb[26].mxu1 }
 0xbd2   :  { %v1905_v5 = vmul.f32 0.35355338, %v1901_v2  ;;  %v2798_v20 = vpop.f32.mrb[27].mxu1 }
 0xbd3   :  { %v1726_v62 = vmax.f32 %v1724_v1, %v1725_v58  ;;  %v2935_v20 = vld [vmem:[%s3681_s17 + $0x8] sm:$0xff]  }
 0xbd4   :  { %v1906_v6 = vsel %vm834_vm13, %v1905_v5, -inf }
 0xbd5   :  { %v1727_v7 = vrot.slane %v1726_v62, 1  ;;  %v1907_v8 = vrot.slane %v1906_v6, 4 }
 0xbd7   :  { %v1728_v9 = vmax.f32 %v1726_v62, %v1727_v7  ;;  %v1908_v10 = vmax.f32 %v1906_v6, %v1907_v8  ;;  %v2544_v62 = vld [vmem:[%s3682_s10] ss:$0 sm:$0xff] }
 0xbd9   :  { %v1729_v11 = vsub.f32 %v1721_v61, %v1728_v9  ;;  %v1909_v12 = vrot.slane %v1908_v10, 2 }
 0xbdb   :  { %v1730_v14 = vmul.f32 1.442695, %v1729_v11  ;;  %v1910_v15 = vmax.f32 %v1908_v10, %v1909_v12  ;;  %v2548_v12 = vld [vmem:[%s3683_s11] ss:$0 sm:$0xff] }
 0xbdd   :  { %2960 = vpow2.f32 %v1730_v14  ;;  %v1911_v16 = vrot.slane %v1910_v15, 1 }
 0xbdf   :  { %v1912_v17 = vmax.f32 %v1910_v15, %v1911_v16 }
 0xbe1   :  { %v1913_v18 = vsub.f32 %v1905_v5, %v1912_v17 }
 0xbe3   :  { %v1914_v19 = vmul.f32 1.442695, %v1913_v18 }
 0xbe5   :  { %2962 = vpow2.f32 %v1914_v19 }
 0xbe7   :  { %v2961_v21 = vpop.eup %2960 }
 0xbe8   :  { %v1732_v22 = vsel %vm834_vm13, %v2961_v21, 0.0 }
 0xbe9   :  { %v1733_v25 = vrot.slane %v1732_v22, 4 }
 0xbeb   :  { %v1734_v26 = vadd.f32 %v1733_v25, %v1732_v22 }
 0xbed   :  { %v1735_v27 = vrot.slane %v1734_v26, 2 }
 0xbef   :  { %v2963_v28 = vpop.eup %2962  ;;  %v1736_v29 = vadd.f32 %v1735_v27, %v1734_v26 }
 0xbf0   :  { %v1916_v30 = vsel %vm834_vm13, %v2963_v28, 0.0 }
 0xbf1   :  { %v1737_v31 = vrot.slane %v1736_v29, 1  ;;  %v1917_v32 = vrot.slane %v1916_v30, 4 }
 0xbf3   :  { %v1738_v33 = vadd.f32 %v1737_v31, %v1736_v29  ;;  %v1918_v34 = vadd.f32 %v1917_v32, %v1916_v30  ;;  %v2937_v29 = vld [vmem:[%s3684_s15 + $0x8] sm:$0xff]   ;;  %v2938_v30 = vld [vmem:[%s3684_s15 + $0x10] sm:$0xff]   ;;  %v2939_v31 = vld [vmem:[%s3684_s15 + $0x18] sm:$0xff]  }
 0xbf5   :  { %2964 = vrcp.f32 %v1738_v33  ;;  %v1919_v35 = vrot.slane %v1918_v34, 2 }
 0xbf7   :  { %v1920_v36 = vadd.f32 %v1919_v35, %v1918_v34 }
 0xbf9   :  { %v1921_v13 = vrot.slane %v1920_v36, 1 }
 0xbfb   :  { %v1922_v37 = vadd.f32 %v1921_v13, %v1920_v36  ;;  %v2552_v36 = vld [vmem:[%s3685_s16] ss:$0 sm:$0xff] }
 0xbfd   :  { %2966 = vrcp.f32 %v1922_v37  ;;  %v2553_v37 = vld [vmem:[%s3686_s18] ss:$0 sm:$0xff] }
 0xbff   :  { %v2965_v38 = vpop.eup %2964 }
 0xc00   :  { %v1740_v41 = vmul.f32 %v2965_v38, %v2961_v21 }
 0xc02   :  { %2786 = vmatmul.mubr.msk.f32.vlgmr.msra.gmra.mrb[24].mxu0 %vm854_vm5, %v1740_v41 }
 0xc03   :  { %2800 = vmatpush3.msk.msra.mxu0 %vm381_vm15, %v3454_v40  ;;  %2801 = vmatprep.mubr.msk.f32.mxu0 %vm3067_vm2, %v3066_v3  ;;  %v2934_v40 = vld [vmem:[%s3681_s17] sm:$0xff]  }
 0xc04   :  { %2804 = vmatprep.subr.bf16.mxu0 %v3066_v3  ;;  %2813 = vmatpush3.bf16.msra.mxu1 %v2934_v40 }
 0xc05   :  { %2814 = vmatprep.subr.bf16.mxu1 %v3066_v3 }
 0xc07   :  { %v2967_v42 = vpop.eup %2966 }
 0xc08   :  { %v1924_v43 = vmul.f32 %v2967_v42, %v2963_v28  ;;  %2815 = vmatpush3.bf16.msra.mxu1 %v2935_v20  ;;  %v2936_v28 = vld [vmem:[%s3684_s15] sm:$0xff]  }
 0xc09   :  { %2832 = vmatprep.subr.bf16.mxu1 %v3066_v3 }
 0xc0a   :  { %2802 = vmatmul.mubr.msk.f32.vlgmr.msra.gmra.mrb[26].mxu0 %vm854_vm5, %v1924_v43 }
 0xc0b   :  { %2808 = vmatprep.mubr.msk.bf16.mxu0 %vm3067_vm2, %v3066_v3  ;;  %2805 = vmatpush3.bf16.msra.mxu0 %v2932_v44 }
 0xc0c   :  { %2806 = vmatprep.subr.bf16.mxu0 %v3066_v3 }
 0xc0f   :  { %2807 = vmatpush3.bf16.msra.mxu0 %v2933_v45 }
 0xc10   :  { %2820 = vmatprep.subr.bf16.mxu0 %v3066_v3 }
 0xcd5   :  { %v1810_v52 = vpop.f32.mrb[24].mxu0 }
 0xcd6   :  { %v1818_v47 = vmul.f32 %v1816_v46, %v1810_v52  ;;  %v2787_v48 = vpop.f32.mrb[25].mxu0 }
 0xcd8   :  { %v1819_v4 = vsel %vm936_vm6, %v1818_v47, 0.0 }
 0xcd9   :  { %v1820_v49 = vrot.slane %v1819_v4, 4 }
 0xcdb   :  { %v1821_v50 = vadd.f32 %v1820_v49, %v1819_v4  ;;  %v2554_v49 = vld [vmem:[%s3687_s22] ss:$0 sm:$0xff] }
 0xcdd   :  { %v1994_v53 = vpop.f32.mrb[26].mxu0  ;;  %v1822_v57 = vrot.slane %v1821_v50, 2 }
 0xcde   :  { %v2002_v54 = vmul.f32 %v2000_v51, %v1994_v53  ;;  %v2803_v56 = vpop.f32.mrb[27].mxu0 }
 0xcdf   :  { %v1823_v23 = vadd.f32 %v1822_v57, %v1821_v50 }
 0xce0   :  { %v2003_v59 = vsel %vm936_vm6, %v2002_v54, 0.0 }
 0xce1   :  { %v2004_v60 = vrot.slane %v2003_v59, 4  ;;  %v1824_v24 = vrot.slane %v1823_v23, 1 }
 0xce3   :  { %v2005_v55 = vadd.f32 %v2004_v60, %v2003_v59  ;;  %v1825_v1 = vadd.f32 %v1824_v24, %v1823_v23  ;;  %v2940_v24 = vld [vmem:[%s3250_s6] sm:$0xff]  }
 0xce5   :  { %v2006_v61 = vrot.slane %v2005_v55, 2 }
 0xce7   :  { %v2007_v63 = vadd.f32 %v2006_v61, %v2005_v55 }
 0xce9   :  { %v2008_v0 = vrot.slane %v2007_v63, 1 }
 0xceb   :  { %v2009_v58 = vadd.f32 %v2008_v0, %v2007_v63  ;;  %v2941_v63 = vld [vmem:[%s3250_s6 + $0x8] sm:$0xff]   ;;  %v2942_v0 = vld [vmem:[%s3250_s6 + $0x10] sm:$0xff]  }
 0xced   :  { %v2010_v2 = vsel %vm202_vm0, %v1825_v1, %v2009_v58  ;;  %v2943_v1 = vld [vmem:[%s3250_s6 + $0x18] sm:$0xff]   ;;  %s3071_s6 = smov [#allocation7]   ;;  %vm2383_vm0 = vcmask 254976  }
 0xcee   :  { %v2011_v5 = vpack.c.bf16 %v2010_v2, %v2010_v2  ;;  %s2391_s26 = sshll.u32 %s3071_s6, 4  ;;  %s2392_s26 = int_to_ptr.vmem [resolvable:$true] %s2391_s26 }
 0xcef   :  { %p3005_p11 = scmp.lt.s32.totalorder %s2392_s26, %s2392_s26 }
 0xcf0   :  { %2809 = vmatmul.mubr.msk.bf16.vlgmr.msra.gmra.mrb[28].mxu0 %vm649_vm10, %v2011_v5 }
 0xcf1   :  { %2828 = vmatprep.mubr.msk.bf16.mxu0 %vm3067_vm2, %v3066_v3  ;;  %2821 = vmatpush3.bf16.msra.mxu0 %v2936_v28 }
 0xcf2   :  { %2822 = vmatprep.subr.bf16.mxu0 %v3066_v3 }
 0xcf5   :  { %2823 = vmatpush3.bf16.msra.mxu0 %v2937_v29 }
 0xcf6   :  { %2824 = vmatprep.subr.bf16.mxu0 %v3066_v3 }
 0xcf9   :  { %2825 = vmatpush3.bf16.msra.mxu0 %v2938_v30 }
 0xcfa   :  { %2826 = vmatprep.subr.bf16.mxu0 %v3066_v3 }
 0xcfd   :  { %2827 = vmatpush3.bf16.msra.mxu0 %v2939_v31 }
 0xdc3   :  { %v2067_v6 = vpop.f32.mrb[28].mxu0 }
 0xdc4   :  { %v2068_v7 = vadd.f32 %v2544_v62, %v2067_v6  ;;  %v2810_v8 = vpop.f32.mrb[29].mxu0  ;;  %v2560_v62 = vld [vmem:[%s3688_s23] ss:$0 sm:$0xff] }
 0xdc5   :  { %v2070_v9 = vpop.f32.mrb[30].mxu0 }
 0xdc6   :  { %v2100_v10 = vpack.c.bf16 %v2068_v7, %v2068_v7  ;;  %v2811_v11 = vpop.f32.mrb[31].mxu0  ;;  %v2561_v7 = vld [vmem:[%s3245_s4] ss:$0 sm:$0xff]  ;;  %s3000_s4 = scalar_lea.vmem %s2392_s26, 32 }
 0xdc7   :  { %p3001_p10 = scmp.ne.s32.totalorder %s2392_s26, %s3000_s4  ;;  %p3006_p12 = scmp.lt.s32.totalorder %s3000_s4, %s3000_s4 }
 0xdc8   :  { %2817 = vmatmul.mubr.msk.bf16.vlgmr.msra.gmra.mrb[28].mxu1 %vm649_vm10, %v2100_v10 }
 0xdc9   :  { %2840 = vmatprep.mubr.msk.bf16.mxu1 %vm3067_vm2, %v3066_v3  ;;  %2833 = vmatpush3.bf16.msra.mxu1 %v2940_v24  ;;  %p3007_p13 = por %p3006_p12, %p3005_p11 }
 0xdca   :  { %2834 = vmatprep.subr.bf16.mxu1 %v3066_v3 }
 0xdcb   :  { %p3008_p0 = pnand %p3007_p13, %p3001_p10 }
 0xdcd   :  { %2835 = vmatpush3.bf16.msra.mxu1 %v2941_v63 }
 0xdce   :  { %2836 = vmatprep.subr.bf16.mxu1 %v3066_v3 }
 0xdd1   :  { %2837 = vmatpush3.bf16.msra.mxu1 %v2942_v0 }
 0xdd2   :  { %2838 = vmatprep.subr.bf16.mxu1 %v3066_v3 }
 0xdd5   :  { %2839 = vmatpush3.bf16.msra.mxu1 %v2943_v1 }
 0xe9b   :  { %v2156_v14 = vpop.f32.mrb[28].mxu1 }
 0xe9c   :  { %v2157_v15 = vadd.f32 %v2548_v12, %v2156_v14  ;;  %v2818_v16 = vpop.f32.mrb[29].mxu1 }
 0xe9d   :  { %v2159_v17 = vpop.f32.mrb[30].mxu1 }
 0xe9e   :  { %v2819_v18 = vpop.f32.mrb[31].mxu1  ;;  %v2162_v19 = vsel %vm1280_vm7, %v2157_v15, 0.0 }
 0xe9f   :  { %2163 = vadd.xlane.f32.xlu1 %v2162_v19 }
 0xf2c   :  { %v2164_v21 = vpop.xlane.xlu1 %2163 }
 0xf2d   :  { %v2165_v22 = vmul.f32 0.015625, %v2164_v21  ;;  %v2562_v21 = vld [vmem:[%s3255_s20] ss:$0 sm:$0xff] }
 0xf2f   :  { %v2166_v25 = vsub.f32 %v2157_v15, %v2165_v22 }
 0xf31   :  { %v2167_v26 = vmul.f32 %v2166_v25, %v2166_v25 }
 0xf33   :  { %v2168_v27 = vsel %vm1280_vm7, %v2167_v26, 0.0 }
 0xf34   :  { %2169 = vadd.xlane.f32.xlu0 %v2168_v27 }
 0xfc1   :  { %v2170_v32 = vpop.xlane.xlu0 %2169 }
 0xfc2   :  { %v2171_v33 = vmul.f32 0.015625, %v2170_v32 }
 0xfc4   :  { %v2172_v34 = vadd.f32 1e-05, %v2171_v33 }
 0xfc6   :  { %2968 = vrsqrt.f32 %v2172_v34 }
 0xfd0   :  { %v2969_v35 = vpop.eup %2968 }
 0xfd1   :  { %v2174_v13 = vmul.f32 %v2969_v35, %v2166_v25 }
 0xfd3   :  { %v2181_v38 = vmul.f32 %v2552_v36, %v2174_v13 }
 0xfd5   :  { %v2188_v41 = vadd.f32 %v2553_v37, %v2181_v38 }
 0xfd7   :  { %v2189_v42 = vmul.f32 %v2188_v41, %v2188_v41 }
 0xfd9   :  { %v2190_v43 = vmul.f32 %v2189_v42, %v2188_v41 }
 0xfdb   :  { %v2191_v44 = vmul.f32 0.044715, %v2190_v43 }
 0xfdd   :  { %v2192_v45 = vadd.f32 %v2191_v44, %v2188_v41 }
 0xfdf   :  { %v2193_v40 = vmul.f32 0.7978846, %v2192_v45 }
 0xfe1   :  { %2970 = vtanh.f32 %v2193_v40 }
 0xfeb   :  { %v2971_v46 = vpop.eup %2970 }
 0xfec   :  { %v2195_v52 = vadd.f32 1.0, %v2971_v46 }
 0xfee   :  { %v2196_v47 = vmul.f32 0.5, %v2195_v52 }
 0xff0   :  { %v2197_v48 = vmul.f32 %v2196_v47, %v2188_v41 }
 0xff2   :  { %v2198_v4 = vpack.c.bf16 %v2197_v48, %v2197_v48 }
 0xff4   :  { %2829 = vmatmul.mubr.msk.bf16.vlgmr.msra.gmra.mrb[32].mxu0 %vm1349_vm8, %v2198_v4 }
0x10c7   :  { %v2266_v50 = vpop.f32.mrb[32].mxu0 }
0x10c8   :  { %v2267_v51 = vadd.f32 %v2554_v49, %v2266_v50  ;;  %v2830_v53 = vpop.f32.mrb[33].mxu0 }
0x10c9   :  { %v2269_v54 = vpop.f32.mrb[34].mxu0 }
0x10ca   :  { %v2831_v56 = vpop.f32.mrb[35].mxu0  ;;  %v2272_v57 = vsel %vm1280_vm7, %v2267_v51, 0.0 }
0x10cb   :  { %2273 = vadd.xlane.f32.xlu0 %v2272_v57 }
0x1158   :  { %v2274_v59 = vpop.xlane.xlu0 %2273 }
0x1159   :  { %v2275_v60 = vmul.f32 0.015625, %v2274_v59 }
0x115b   :  { %v2276_v23 = vsub.f32 %v2267_v51, %v2275_v60 }
0x115d   :  { %v2277_v55 = vmul.f32 %v2276_v23, %v2276_v23 }
0x115f   :  { %v2278_v61 = vsel %vm1280_vm7, %v2277_v55, 0.0 }
0x1160   :  { %2279 = vadd.xlane.f32.xlu0 %v2278_v61 }
0x11ed   :  { %v2280_v58 = vpop.xlane.xlu0 %2279 }
0x11ee   :  { %v2281_v2 = vmul.f32 0.015625, %v2280_v58 }
0x11f0   :  { %v2282_v5 = vadd.f32 1e-05, %v2281_v2 }
0x11f2   :  { %2972 = vrsqrt.f32 %v2282_v5 }
0x11fc   :  { %v2973_v20 = vpop.eup %2972 }
0x11fd   :  { %v2284_v6 = vmul.f32 %v2973_v20, %v2276_v23 }
0x11ff   :  { %v2291_v8 = vmul.f32 %v2560_v62, %v2284_v6 }
0x1201   :  { %v2298_v9 = vadd.f32 %v2561_v7, %v2291_v8 }
0x1203   :  { %v2299_v10 = vmul.f32 %v2298_v9, %v2298_v9 }
0x1205   :  { %v2300_v11 = vmul.f32 %v2299_v10, %v2298_v9 }
0x1207   :  { %v2301_v12 = vmul.f32 0.044715, %v2300_v11 }
0x1209   :  { %v2302_v14 = vadd.f32 %v2301_v12, %v2298_v9 }
0x120b   :  { %v2303_v15 = vmul.f32 0.7978846, %v2302_v14 }
0x120d   :  { %2974 = vtanh.f32 %v2303_v15 }
0x1217   :  { %v2975_v16 = vpop.eup %2974 }
0x1218   :  { %v2305_v3 = vadd.f32 1.0, %v2975_v16 }
0x121a   :  { %v2306_v17 = vmul.f32 0.5, %v2305_v3 }
0x121c   :  { %v2307_v18 = vmul.f32 %v2306_v17, %v2298_v9 }
0x121e   :  { %v2308_v19 = vpack.c.bf16 %v2307_v18, %v2307_v18 }
0x1220   :  { %2841 = vmatmul.mubr.msk.bf16.vlgmr.msra.gmra.mrb[32].mxu1 %vm1349_vm8, %v2308_v19 }
0x12f3   :  { %v2376_v22 = vpop.f32.mrb[32].mxu1 }
0x12f4   :  { %v2377_v25 = vadd.f32 %v2562_v21, %v2376_v22  ;;  %v2842_v26 = vpop.f32.mrb[33].mxu1 }
0x12f5   :  { %v2379_v27 = vpop.f32.mrb[34].mxu1 }
0x12f6   :  { %v2843_v28 = vpop.f32.mrb[35].mxu1  ;;  %v2382_v29 = vadd.f32 %v2377_v25, %v3540_v39 }
0x12f8   :  { %2384 = vst.msk [vmem:[#allocation7] sm:$0x3] %vm2383_vm0, %v2382_v29 }
0x12f9   :  { %3011 = shalt.err (!%p3008_p0)
}
0x12fa   :  { %s3012_s20 = scalar_lea.hbm %s3260_s27, 32 }
0x12fb   :  { %p3013_p1 = scmp.ne.s32.totalorder %s3260_s27, %s3012_s20  ;;  %p3016_p2 = scmp.lt.u32.totalorder %s3012_s20, %s3260_s27 }
0x12fd   :  { %p3018_p3 = pnand %p3016_p2, %p3013_p1 }
0x12ff   :  { %3021 = shalt.err (!%p3018_p3)
}
0x1300   :  { %2394 = dma.vmem_to_hbm [thread:$0]  %s2392_s26, 32, %s3260_s27, [#allocation3]  }
0x1301   :  { %3026 = dma.done.wait [#allocation3], 32  }
0x1302   :  { %3027 = vsyncadd [#allocation3], 4294967264 }
0x1303   :  { %2398 = vsyncpa [#allocation3], 1 }
0x1304   :  { %2399 = vsyncpa [#allocation4], 1 }
0x1305   :  { %2400 = vsyncpa [#allocation6], 1 }

</bundles_post_ra>
